<compile_context>
chip_gen: v7x
topology: tpu7x:2x2x1
jax: 0.10.0
libtpu: 0.0.40
codegen_flags: <defaults>
</compile_context>

<pallas_src>
import jax
import jax.numpy as jnp
import numpy as np
from jax.experimental import pallas as pl
from jax.experimental.pallas import tpu as pltpu

BN_EPS = 1e-5
KERNEL_SIZES = (3, 5, 7)
NT = max(KERNEL_SIZES)                     # 7 real taps (all kernels aligned to center)
MAX_PAD = (NT - 1) // 2                    # 3
TB = 128                                   # batch tile: full MXU M-fill, few grid steps
HID = 128                                  # fc1 width (fixed by the module)
MXU_DTYPE = jnp.bfloat16                   # MXU operand dtype (f32 accumulation)


def _round_up(x, m):
    return (x + m - 1) // m * m


def _conv_geometry(L):
    """Time-chunking geometry for the block-Toeplitz conv."""
    Lc = min(_round_up(L, 8), 16)          # chunk length (time steps per MXU pass)
    n_chunks = (L + Lc - 1) // Lc
    Kc = _round_up(Lc + NT - 1, 8)         # input span per chunk, sublane-rounded.
    # Toeplitz rows s with s - t outside [0, NT) are structurally zero, so the extra
    # rounded rows (and any padded input lanes they read) contribute nothing.
    LPAD = (n_chunks - 1) * Lc + Kc        # padded input length (>= L + 6 always)
    return Lc, Kc, n_chunks, LPAD


def _make_kernel(L, Lc, n_chunks, Fp):
    def kernel(xpad_ref, wtoe_ref, bconv_ref, w1_ref, b1_ref, w2_ref, b2_ref, out_ref):
        xpad = xpad_ref[...]                               # [TB, LPAD]   f32
        wtoe = wtoe_ref[...]                               # [Kc, Lc*Fp]  bf16 (BN folded)
        Kc = wtoe.shape[0]

        pooled = None
        # Chunked time axis: per-chunk conv intermediate is [TB, Lc*Fp] independent of
        # L, keeping VMEM bounded.  For very long L this static unrolled loop would be
        # moved to a lax.fori_loop / second ("arbitrary") grid axis — same structure.
        for c in range(n_chunks):
            xc = xpad[:, c * Lc:c * Lc + Kc].astype(MXU_DTYPE)          # [TB, Kc]
            conv = jnp.dot(xc, wtoe, preferred_element_type=jnp.float32)  # [TB, Lc*Fp]
            # AdaptiveMaxPool1d(1): running max over valid time steps only; each slice
            # is an aligned 256-lane chunk (offset multiple of 256) -> no relayout.
            for t in range(min(Lc, L - c * Lc)):
                sl = conv[:, t * Fp:(t + 1) * Fp]                        # [TB, Fp]
                pooled = sl if pooled is None else jnp.maximum(pooled, sl)

        # Per-channel bias add and ReLU commute with max over time -> apply to the
        # pooled [TB, Fp] tensor instead of the full conv output (exact reorder).
        pooled = jnp.maximum(pooled + bconv_ref[...], 0.0)               # [TB, Fp] f32

        # fc1 + ReLU  (M=TB=128 -> full MXU row fill)
        h = jnp.dot(pooled.astype(MXU_DTYPE), w1_ref[...],
                    preferred_element_type=jnp.float32) + b1_ref[...]
        h = jnp.maximum(h, 0.0)

        # TODO(synk): dropout is eval-mode identity; training-mode stochastic masking
        # (pltpu.prng_*) not implemented.
        out_ref[...] = (jnp.dot(h.astype(MXU_DTYPE), w2_ref[...],
                                preferred_element_type=jnp.float32) + b2_ref[...])
    return kernel


def cnn1d_forward(x, packed_params, num_classes):
    """x: [B, 1, input_dim] float32 (PyTorch NCL layout, C=1)."""
    wtoe, bconv, w1, b1, w2, b2 = packed_params
    B, _, L = x.shape
    Fp = bconv.shape[1]
    OUTP = w2.shape[1]
    Lc, Kc, n_chunks, LPAD = _conv_geometry(L)
    assert wtoe.shape == (Kc, Lc * Fp)
    Bp = _round_up(B, TB)

    x2 = x.reshape(B, L).astype(jnp.float32)
    xpad = jnp.pad(x2, ((0, Bp - B), (MAX_PAD, LPAD - MAX_PAD - L)))     # [Bp, LPAD]

    out = pl.pallas_call(
        _make_kernel(L, Lc, n_chunks, Fp),
        out_shape=jax.ShapeDtypeStruct((Bp, OUTP), jnp.float32),
        grid=(Bp // TB,),
        in_specs=[
            pl.BlockSpec((TB, LPAD), lambda i: (i, 0)),          # batch-tiled input
            pl.BlockSpec((Kc, Lc * Fp), lambda i: (0, 0)),       # resident Toeplitz conv W
            pl.BlockSpec((1, Fp), lambda i: (0, 0)),             # folded BN bias
            pl.BlockSpec((Fp, HID), lambda i: (0, 0)),           # fc1
            pl.BlockSpec((1, HID), lambda i: (0, 0)),
            pl.BlockSpec((HID, OUTP), lambda i: (0, 0)),         # fc2
            pl.BlockSpec((1, OUTP), lambda i: (0, 0)),
        ],
        out_specs=pl.BlockSpec((TB, OUTP), lambda i: (i, 0)),
        compiler_params=pltpu.CompilerParams(
            dimension_semantics=("parallel",),                   # megacore on multi-TC chips
            vmem_limit_bytes=32 * 1024 * 1024),                  # > v5e 16 MiB default, < v7x 64 MiB
    )(xpad, wtoe, bconv, w1, b1, w2, b2)
    return out[:B, :num_classes]


def make_params(key, input_dim, num_classes, num_filters=64):
    """Deterministic synthetic params: PyTorch-shaped raw + Pallas-packed/folded."""
    F = num_filters
    F3 = F * len(KERNEL_SIZES)
    Fp = _round_up(F3, 128)                 # 192 -> 256 lanes
    OUTP = _round_up(num_classes, 128)      # lane-dense output
    Lc, Kc, _, _ = _conv_geometry(input_dim)
    keys = jax.random.split(key, 24)
    ki = iter(range(24))

    conv_ws, conv_bs, gammas, betas, means, vars_ = [], [], [], [], [], []
    for k in KERNEL_SIZES:
        conv_ws.append(0.3 * jax.random.normal(keys[next(ki)], (F, 1, k), jnp.float32))
        conv_bs.append(0.1 * jax.random.normal(keys[next(ki)], (F,), jnp.float32))
        gammas.append(1.0 + 0.1 * jax.random.normal(keys[next(ki)], (F,), jnp.float32))
        betas.append(0.1 * jax.random.normal(keys[next(ki)], (F,), jnp.float32))
        means.append(0.1 * jax.random.normal(keys[next(ki)], (F,), jnp.float32))
        vars_.append(0.5 + jax.random.uniform(keys[next(ki)], (F,), jnp.float32))

    fc1_w = 0.1 * jax.random.normal(keys[next(ki)], (HID, F3), jnp.float32)  # [out, in]
    fc1_b = 0.1 * jax.random.normal(keys[next(ki)], (HID,), jnp.float32)
    fc2_w = 0.1 * jax.random.normal(keys[next(ki)], (num_classes, HID), jnp.float32)
    fc2_b = 0.1 * jax.random.normal(keys[next(ki)], (num_classes,), jnp.float32)

    # --- fold eval-mode BatchNorm into the conv weights/bias.
    gamma = jnp.concatenate(gammas)
    beta = jnp.concatenate(betas)
    mean = jnp.concatenate(means)
    var = jnp.concatenate(vars_)
    bconv = jnp.concatenate(conv_bs)
    scale = gamma * jax.lax.rsqrt(var + BN_EPS)                  # [F3]
    bfold = (bconv - mean) * scale + beta

    # --- align the three "same"-padded Conv1d's to one 7-tap weight [NT, Fp].
    wfold = jnp.zeros((NT, Fp), jnp.float32)
    for i, k in enumerate(KERNEL_SIZES):
        off = MAX_PAD - (k - 1) // 2
        wk = conv_ws[i][:, 0, :].T * scale[i * F:(i + 1) * F][None, :]   # [k, F]
        wfold = wfold.at[off:off + k, i * F:(i + 1) * F].set(wk)

    # --- block-Toeplitz conv weight [Kc, Lc*Fp]:  wtoe[s, t*Fp+f] = wfold[s-t, f].
    #     Rows with s - t outside [0, NT) stay exactly zero (incl. the Kc rounding).
    wtoe = jnp.zeros((Kc, Lc, Fp), jnp.float32)
    for t in range(Lc):
        wtoe = wtoe.at[t:t + NT, t, :].set(wfold)
    wtoe = wtoe.reshape(Kc, Lc * Fp).astype(MXU_DTYPE)

    bconv_p = jnp.zeros((1, Fp), jnp.float32).at[0, :F3].set(bfold)
    w1_p = jnp.zeros((Fp, HID), jnp.float32).at[:F3, :].set(fc1_w.T).astype(MXU_DTYPE)
    b1_p = fc1_b.reshape(1, HID)
    w2_p = jnp.zeros((HID, OUTP), jnp.float32).at[:, :num_classes].set(fc2_w.T).astype(MXU_DTYPE)
    b2_p = jnp.zeros((1, OUTP), jnp.float32).at[0, :num_classes].set(fc2_b)

    packed = (wtoe, bconv_p, w1_p, b1_p, w2_p, b2_p)
    raw = (conv_ws, conv_bs, gammas, betas, means, vars_, fc1_w, fc1_b, fc2_w, fc2_b)
    return packed, raw


def reference_forward(x, raw):
    """Pure-JAX f32 replica of the PyTorch forward (eval mode) for validation."""
    conv_ws, conv_bs, gammas, betas, means, vars_, fc1_w, fc1_b, fc2_w, fc2_b = raw
    outs = []
    for w, b, g, bt, m, v, k in zip(conv_ws, conv_bs, gammas, betas, means, vars_,
                                    KERNEL_SIZES):
        pad = (k - 1) // 2
        y = jax.lax.conv_general_dilated(
            x, w, window_strides=(1,), padding=[(pad, pad)],
            dimension_numbers=("NCH", "OIH", "NCH"))
        y = y + b[None, :, None]
        y = (y - m[None, :, None]) * jax.lax.rsqrt(v[None, :, None] + BN_EPS) \
            * g[None, :, None] + bt[None, :, None]
        y = jnp.maximum(y, 0.0)
        outs.append(jnp.max(y, axis=-1))                 # AdaptiveMaxPool1d(1).squeeze
    feat = jnp.concatenate(outs, axis=1)
    h = jnp.maximum(feat @ fc1_w.T + fc1_b, 0.0)
    return h @ fc2_w.T + fc2_b


if __name__ == "__main__":
    # input_dim=24 exercises two time chunks incl. a partial last chunk; B=3 exercises
    # batch padding to the 128-row tile.
    B, input_dim, num_classes, num_filters = 3, 24, 5, 64
    key = jax.random.PRNGKey(0)
    k_param, k_x = jax.random.split(key)
    packed, raw = make_params(k_param, input_dim, num_classes, num_filters)
    x = jax.random.normal(k_x, (B, 1, input_dim), jnp.float32)

    out = jax.block_until_ready(cnn1d_forward(x, packed, num_classes))
    ref = jax.block_until_ready(reference_forward(x, raw))
    # bf16 MXU operands (f32 accumulate) vs f32 reference -> loose-ish tolerance;
    # structural bugs (tap misalignment, BN fold) would show up as O(1) errors.
    np.testing.assert_allclose(np.asarray(out), np.asarray(ref), rtol=5e-2, atol=5e-2)
    print("KERNEL_OK")
</pallas_src>

<mosaic_0001>
module attributes {stable_mosaic.version = 11 : i64} {
  func.func @kernel(%arg0: i32, %arg1: memref<128x40xf32, #tpu.memory_space<vmem>>, %arg2: memref<24x4096xbf16, #tpu.memory_space<vmem>>, %arg3: memref<1x256xf32, #tpu.memory_space<vmem>>, %arg4: memref<256x128xbf16, #tpu.memory_space<vmem>>, %arg5: memref<1x128xf32, #tpu.memory_space<vmem>>, %arg6: memref<128x128xbf16, #tpu.memory_space<vmem>>, %arg7: memref<1x128xf32, #tpu.memory_space<vmem>>, %arg8: memref<128x128xf32, #tpu.memory_space<vmem>>) attributes {dimension_semantics = [#tpu.dimension_semantics<parallel>], iteration_bounds = array<i64: 1>, scalar_prefetch = 0 : i64, scratch_operands = 0 : i64, tpu.core_type = #tpu.core_type<tc>, window_params = [{transform_indices = @transform_0, window_bounds = array<i64: 128, 40>}, {pipeline_mode = #tpu.pipeline_mode<synchronous>, transform_indices = @transform_1, window_bounds = array<i64: 24, 4096>}, {pipeline_mode = #tpu.pipeline_mode<synchronous>, transform_indices = @transform_2, window_bounds = array<i64: 1, 256>}, {pipeline_mode = #tpu.pipeline_mode<synchronous>, transform_indices = @transform_3, window_bounds = array<i64: 256, 128>}, {pipeline_mode = #tpu.pipeline_mode<synchronous>, transform_indices = @transform_4, window_bounds = array<i64: 1, 128>}, {pipeline_mode = #tpu.pipeline_mode<synchronous>, transform_indices = @transform_5, window_bounds = array<i64: 128, 128>}, {pipeline_mode = #tpu.pipeline_mode<synchronous>, transform_indices = @transform_6, window_bounds = array<i64: 1, 128>}, {transform_indices = @transform_7, window_bounds = array<i64: 128, 128>}]} {
    %c0 = arith.constant 0 : index
    %c0_0 = arith.constant 0 : index
    %0 = vector.load %arg1[%c0, %c0_0] : memref<128x40xf32, #tpu.memory_space<vmem>>, vector<128x40xf32>
    %c0_1 = arith.constant 0 : index
    %c0_2 = arith.constant 0 : index
    %1 = vector.load %arg2[%c0_1, %c0_2] : memref<24x4096xbf16, #tpu.memory_space<vmem>>, vector<24x4096xbf16>
    %2 = vector.extract_strided_slice %0 {offsets = [0, 0], sizes = [128, 24], strides = [1, 1]} : vector<128x40xf32> to vector<128x24xf32>
    %3 = arith.truncf %2 : vector<128x24xf32> to vector<128x24xbf16>
    %cst = arith.constant dense<0.000000e+00> : vector<128x4096xf32>
    %4 = tpu.matmul %3, %1, %cst {dimension_numbers = #tpu.dot_dimension_numbers<[1], [0], [0], [1], [0, 0, 1, 1], [], []>} : vector<128x24xbf16>, vector<24x4096xbf16>, vector<128x4096xf32> -> vector<128x4096xf32>
    %5 = vector.extract_strided_slice %4 {offsets = [0, 0], sizes = [128, 256], strides = [1, 1]} : vector<128x4096xf32> to vector<128x256xf32>
    %6 = vector.extract_strided_slice %4 {offsets = [0, 256], sizes = [128, 256], strides = [1, 1]} : vector<128x4096xf32> to vector<128x256xf32>
    %7 = arith.maximumf %5, %6 : vector<128x256xf32>
    %8 = vector.extract_strided_slice %4 {offsets = [0, 512], sizes = [128, 256], strides = [1, 1]} : vector<128x4096xf32> to vector<128x256xf32>
    %9 = arith.maximumf %7, %8 : vector<128x256xf32>
    %10 = vector.extract_strided_slice %4 {offsets = [0, 768], sizes = [128, 256], strides = [1, 1]} : vector<128x4096xf32> to vector<128x256xf32>
    %11 = arith.maximumf %9, %10 : vector<128x256xf32>
    %12 = vector.extract_strided_slice %4 {offsets = [0, 1024], sizes = [128, 256], strides = [1, 1]} : vector<128x4096xf32> to vector<128x256xf32>
    %13 = arith.maximumf %11, %12 : vector<128x256xf32>
    %14 = vector.extract_strided_slice %4 {offsets = [0, 1280], sizes = [128, 256], strides = [1, 1]} : vector<128x4096xf32> to vector<128x256xf32>
    %15 = arith.maximumf %13, %14 : vector<128x256xf32>
    %16 = vector.extract_strided_slice %4 {offsets = [0, 1536], sizes = [128, 256], strides = [1, 1]} : vector<128x4096xf32> to vector<128x256xf32>
    %17 = arith.maximumf %15, %16 : vector<128x256xf32>
    %18 = vector.extract_strided_slice %4 {offsets = [0, 1792], sizes = [128, 256], strides = [1, 1]} : vector<128x4096xf32> to vector<128x256xf32>
    %19 = arith.maximumf %17, %18 : vector<128x256xf32>
    %20 = vector.extract_strided_slice %4 {offsets = [0, 2048], sizes = [128, 256], strides = [1, 1]} : vector<128x4096xf32> to vector<128x256xf32>
    %21 = arith.maximumf %19, %20 : vector<128x256xf32>
    %22 = vector.extract_strided_slice %4 {offsets = [0, 2304], sizes = [128, 256], strides = [1, 1]} : vector<128x4096xf32> to vector<128x256xf32>
    %23 = arith.maximumf %21, %22 : vector<128x256xf32>
    %24 = vector.extract_strided_slice %4 {offsets = [0, 2560], sizes = [128, 256], strides = [1, 1]} : vector<128x4096xf32> to vector<128x256xf32>
    %25 = arith.maximumf %23, %24 : vector<128x256xf32>
    %26 = vector.extract_strided_slice %4 {offsets = [0, 2816], sizes = [128, 256], strides = [1, 1]} : vector<128x4096xf32> to vector<128x256xf32>
    %27 = arith.maximumf %25, %26 : vector<128x256xf32>
    %28 = vector.extract_strided_slice %4 {offsets = [0, 3072], sizes = [128, 256], strides = [1, 1]} : vector<128x4096xf32> to vector<128x256xf32>
    %29 = arith.maximumf %27, %28 : vector<128x256xf32>
    %30 = vector.extract_strided_slice %4 {offsets = [0, 3328], sizes = [128, 256], strides = [1, 1]} : vector<128x4096xf32> to vector<128x256xf32>
    %31 = arith.maximumf %29, %30 : vector<128x256xf32>
    %32 = vector.extract_strided_slice %4 {offsets = [0, 3584], sizes = [128, 256], strides = [1, 1]} : vector<128x4096xf32> to vector<128x256xf32>
    %33 = arith.maximumf %31, %32 : vector<128x256xf32>
    %34 = vector.extract_strided_slice %4 {offsets = [0, 3840], sizes = [128, 256], strides = [1, 1]} : vector<128x4096xf32> to vector<128x256xf32>
    %35 = arith.maximumf %33, %34 : vector<128x256xf32>
    %36 = vector.extract_strided_slice %0 {offsets = [0, 16], sizes = [128, 24], strides = [1, 1]} : vector<128x40xf32> to vector<128x24xf32>
    %37 = arith.truncf %36 : vector<128x24xf32> to vector<128x24xbf16>
    %cst_3 = arith.constant dense<0.000000e+00> : vector<128x4096xf32>
    %38 = tpu.matmul %37, %1, %cst_3 {dimension_numbers = #tpu.dot_dimension_numbers<[1], [0], [0], [1], [0, 0, 1, 1], [], []>} : vector<128x24xbf16>, vector<24x4096xbf16>, vector<128x4096xf32> -> vector<128x4096xf32>
    %39 = vector.extract_strided_slice %38 {offsets = [0, 0], sizes = [128, 256], strides = [1, 1]} : vector<128x4096xf32> to vector<128x256xf32>
    %40 = arith.maximumf %35, %39 : vector<128x256xf32>
    %41 = vector.extract_strided_slice %38 {offsets = [0, 256], sizes = [128, 256], strides = [1, 1]} : vector<128x4096xf32> to vector<128x256xf32>
    %42 = arith.maximumf %40, %41 : vector<128x256xf32>
    %43 = vector.extract_strided_slice %38 {offsets = [0, 512], sizes = [128, 256], strides = [1, 1]} : vector<128x4096xf32> to vector<128x256xf32>
    %44 = arith.maximumf %42, %43 : vector<128x256xf32>
    %45 = vector.extract_strided_slice %38 {offsets = [0, 768], sizes = [128, 256], strides = [1, 1]} : vector<128x4096xf32> to vector<128x256xf32>
    %46 = arith.maximumf %44, %45 : vector<128x256xf32>
    %47 = vector.extract_strided_slice %38 {offsets = [0, 1024], sizes = [128, 256], strides = [1, 1]} : vector<128x4096xf32> to vector<128x256xf32>
    %48 = arith.maximumf %46, %47 : vector<128x256xf32>
    %49 = vector.extract_strided_slice %38 {offsets = [0, 1280], sizes = [128, 256], strides = [1, 1]} : vector<128x4096xf32> to vector<128x256xf32>
    %50 = arith.maximumf %48, %49 : vector<128x256xf32>
    %51 = vector.extract_strided_slice %38 {offsets = [0, 1536], sizes = [128, 256], strides = [1, 1]} : vector<128x4096xf32> to vector<128x256xf32>
    %52 = arith.maximumf %50, %51 : vector<128x256xf32>
    %53 = vector.extract_strided_slice %38 {offsets = [0, 1792], sizes = [128, 256], strides = [1, 1]} : vector<128x4096xf32> to vector<128x256xf32>
    %54 = arith.maximumf %52, %53 : vector<128x256xf32>
    %c0_4 = arith.constant 0 : index
    %c0_5 = arith.constant 0 : index
    %55 = vector.load %arg3[%c0_4, %c0_5] : memref<1x256xf32, #tpu.memory_space<vmem>>, vector<1x256xf32>
    %56 = vector.broadcast %55 : vector<1x256xf32> to vector<128x256xf32>
    %57 = arith.addf %54, %56 : vector<128x256xf32>
    %cst_6 = arith.constant 0.000000e+00 : f32
    %58 = vector.broadcast %cst_6 : f32 to vector<128x256xf32>
    %59 = arith.maximumf %57, %58 : vector<128x256xf32>
    %60 = arith.truncf %59 : vector<128x256xf32> to vector<128x256xbf16>
    %c0_7 = arith.constant 0 : index
    %c0_8 = arith.constant 0 : index
    %61 = vector.load %arg4[%c0_7, %c0_8] : memref<256x128xbf16, #tpu.memory_space<vmem>>, vector<256x128xbf16>
    %cst_9 = arith.constant dense<0.000000e+00> : vector<128x128xf32>
    %62 = tpu.matmul %60, %61, %cst_9 {dimension_numbers = #tpu.dot_dimension_numbers<[1], [0], [0], [1], [0, 0, 1, 1], [], []>} : vector<128x256xbf16>, vector<256x128xbf16>, vector<128x128xf32> -> vector<128x128xf32>
    %c0_10 = arith.constant 0 : index
    %c0_11 = arith.constant 0 : index
    %63 = vector.load %arg5[%c0_10, %c0_11] : memref<1x128xf32, #tpu.memory_space<vmem>>, vector<1x128xf32>
    %64 = vector.broadcast %63 : vector<1x128xf32> to vector<128x128xf32>
    %65 = arith.addf %62, %64 : vector<128x128xf32>
    %cst_12 = arith.constant 0.000000e+00 : f32
    %66 = vector.broadcast %cst_12 : f32 to vector<128x128xf32>
    %67 = arith.maximumf %65, %66 : vector<128x128xf32>
    %68 = arith.truncf %67 : vector<128x128xf32> to vector<128x128xbf16>
    %c0_13 = arith.constant 0 : index
    %c0_14 = arith.constant 0 : index
    %69 = vector.load %arg6[%c0_13, %c0_14] : memref<128x128xbf16, #tpu.memory_space<vmem>>, vector<128x128xbf16>
    %cst_15 = arith.constant dense<0.000000e+00> : vector<128x128xf32>
    %70 = tpu.matmul %68, %69, %cst_15 {dimension_numbers = #tpu.dot_dimension_numbers<[1], [0], [0], [1], [0, 0, 1, 1], [], []>} : vector<128x128xbf16>, vector<128x128xbf16>, vector<128x128xf32> -> vector<128x128xf32>
    %c0_16 = arith.constant 0 : index
    %c0_17 = arith.constant 0 : index
    %71 = vector.load %arg7[%c0_16, %c0_17] : memref<1x128xf32, #tpu.memory_space<vmem>>, vector<1x128xf32>
    %72 = vector.broadcast %71 : vector<1x128xf32> to vector<128x128xf32>
    %73 = arith.addf %70, %72 : vector<128x128xf32>
    %c0_18 = arith.constant 0 : index
    %c0_19 = arith.constant 0 : index
    %74 = vector.load %arg8[%c0_18, %c0_19] : memref<128x128xf32, #tpu.memory_space<vmem>>, vector<128x128xf32>
    tpu.vector_store %arg8[%c0_18, %c0_19], %73 {strides = array<i32>} : memref<128x128xf32, #tpu.memory_space<vmem>>, vector<128x128xf32>,
    return
  }
  func.func @transform_0(%arg0: i32) -> (i32, i32) {
    %c0_i32 = arith.constant 0 : i32
    %c0_i32_0 = arith.constant 0 : i32
    return %arg0, %c0_i32 : i32, i32
  }
  func.func @transform_1(%arg0: i32) -> (i32, i32) {
    %c0_i32 = arith.constant 0 : i32
    %c0_i32_0 = arith.constant 0 : i32
    %c0_i32_1 = arith.constant 0 : i32
    return %c0_i32, %c0_i32_0 : i32, i32
  }
  func.func @transform_2(%arg0: i32) -> (i32, i32) {
    %c0_i32 = arith.constant 0 : i32
    %c0_i32_0 = arith.constant 0 : i32
    %c0_i32_1 = arith.constant 0 : i32
    return %c0_i32, %c0_i32_0 : i32, i32
  }
  func.func @transform_3(%arg0: i32) -> (i32, i32) {
    %c0_i32 = arith.constant 0 : i32
    %c0_i32_0 = arith.constant 0 : i32
    %c0_i32_1 = arith.constant 0 : i32
    return %c0_i32, %c0_i32_0 : i32, i32
  }
  func.func @transform_4(%arg0: i32) -> (i32, i32) {
    %c0_i32 = arith.constant 0 : i32
    %c0_i32_0 = arith.constant 0 : i32
    %c0_i32_1 = arith.constant 0 : i32
    return %c0_i32, %c0_i32_0 : i32, i32
  }
  func.func @transform_5(%arg0: i32) -> (i32, i32) {
    %c0_i32 = arith.constant 0 : i32
    %c0_i32_0 = arith.constant 0 : i32
    %c0_i32_1 = arith.constant 0 : i32
    return %c0_i32, %c0_i32_0 : i32, i32
  }
  func.func @transform_6(%arg0: i32) -> (i32, i32) {
    %c0_i32 = arith.constant 0 : i32
    %c0_i32_0 = arith.constant 0 : i32
    %c0_i32_1 = arith.constant 0 : i32
    return %c0_i32, %c0_i32_0 : i32, i32
  }
  func.func @transform_7(%arg0: i32) -> (i32, i32) {
    %c0_i32 = arith.constant 0 : i32
    %c0_i32_0 = arith.constant 0 : i32
    return %arg0, %c0_i32 : i32, i32
  }
}

</mosaic_0001>

<bundles_post_ra>
// kernel: tpu_custom_call.1
= control target key start
LH: loop header
LB: loop body
LE: loop exit
PB: predicated region body
PF: predicated region fallthrough
CT: control target
= control target key end

     0   :  { %12 = vsyncpa [#allocation3], 0  ;;  %s9461_s0 = inlined_call_operand.vmem [shape: f32[128,40], index: 0, kind: input, shape index: {}]   ;;  %s9462_s1 = inlined_call_operand.hbm [shape: bf16[24,4096], index: 1, kind: input, shape index: {}]   ;;  %s9463_s2 = inlined_call_operand.vmem [shape: f32[1,256], index: 2, kind: input, shape index: {}]   ;;  %s9464_s3 = inlined_call_operand.vmem [shape: bf16[256,128], index: 3, kind: input, shape index: {}]   ;;  %s9465_s4 = inlined_call_operand.vmem [shape: f32[1,128], index: 4, kind: input, shape index: {}]   ;;  %s9466_s5 = inlined_call_operand.hbm [shape: bf16[128,128], index: 5, kind: input, shape index: {}]   ;;  %s9467_s6 = inlined_call_operand.vmem [shape: f32[1,128], index: 6, kind: input, shape index: {}]   ;;  %s9468_s7 = inlined_call_operand.hbm [shape: f32[128,128], index: 7, kind: output, shape index: {}]  }
   0x1   :  { %13 = vsyncpa [#allocation6], 0 }
   0x2   :  { %14 = vsyncpa [#allocation4], 0  ;;  %s5096_s24 = smov [#allocation2]   ;;  %s5024_s28 = scalar_lea.hbm %s9462_s1, 6144 }
   0x3   :  { %s22_s25 = sshll.u32 %s5096_s24, 4  ;;  %p5025_p0 = scmp.ne.s32.totalorder %s9462_s1, %s5024_s28  ;;  %s23_s25 = int_to_ptr.vmem [resolvable:$true] %s22_s25 }
   0x4   :  { %p5028_p1 = scmp.lt.u32.totalorder %s5024_s28, %s9462_s1 }
   0x6   :  { %p5030_p2 = pnand %p5028_p1, %p5025_p0 }
   0x8   :  { %5033 = shalt.err (!%p5030_p2)
}
   0x9   :  { %s5034_s10 = scalar_lea.vmem %s23_s25, 6144  ;;  %p5039_p4 = scmp.lt.s32.totalorder %s23_s25, %s23_s25 }
   0xa   :  { %p5035_p3 = scmp.ne.s32.totalorder %s23_s25, %s5034_s10  ;;  %p5040_p5 = scmp.lt.s32.totalorder %s5034_s10, %s5034_s10 }
   0xc   :  { %p5041_p6 = por %p5040_p5, %p5039_p4 }
   0xe   :  { %p5042_p7 = pnand %p5041_p6, %p5035_p3 }
  0x10   :  { %5045 = shalt.err (!%p5042_p7)
}
  0x11   :  { %s5097_s11 = smov 2048   ;;  %s5098_s12 = smov 128  }
  0x12   :  { %28 = dma.hbm_to_vmem [thread:$0]  %s9462_s1, 6144, %s23_s25, [#allocation3], %s5097_s11, %s5097_s11, %s5098_s12  }
  0x13   :  { %s5099_s15 = smov [#allocation5]   ;;  %s5046_s19 = scalar_lea.hbm %s9466_s5, 1024 }
  0x14   :  { %s40_s16 = sshll.u32 %s5099_s15, 4  ;;  %p5047_p8 = scmp.ne.s32.totalorder %s9466_s5, %s5046_s19  ;;  %s41_s16 = int_to_ptr.vmem [resolvable:$true] %s40_s16 }
  0x15   :  { %p5050_p9 = scmp.lt.u32.totalorder %s5046_s19, %s9466_s5 }
  0x17   :  { %p5052_p10 = pnand %p5050_p9, %p5047_p8 }
  0x19   :  { %5055 = shalt.err (!%p5052_p10)
}
  0x1a   :  { %s5056_s24 = scalar_lea.vmem %s41_s16, 1024  ;;  %p5061_p12 = scmp.lt.s32.totalorder %s41_s16, %s41_s16 }
  0x1b   :  { %p5057_p11 = scmp.ne.s32.totalorder %s41_s16, %s5056_s24  ;;  %p5062_p13 = scmp.lt.s32.totalorder %s5056_s24, %s5056_s24 }
  0x1d   :  { %p5063_p0 = por %p5062_p13, %p5061_p12 }
  0x1f   :  { %p5064_p1 = pnand %p5063_p0, %p5057_p11 }
  0x21   :  { %5067 = shalt.err (!%p5064_p1)
}
  0x22   :  { %s5100_s1 = smov 64   ;;  %s5101_s25 = smov 4  }
  0x23   :  { %46 = dma.hbm_to_vmem [thread:$0]  %s9466_s5, 1024, %s41_s16, [#allocation6], %s5100_s1, %s5100_s1, %s5101_s25  }
  0x24   :  { %5090 = dma.done.wait [#allocation3], 6144  }
  0x25   :  { %5091 = vsyncadd [#allocation3], 4294961152 }
  0x26   :  { %5092 = dma.done.wait [#allocation6], 1024  }
  0x27   :  { %5093 = vsyncadd [#allocation6], 4294966272  ;;  %v9474_v0 = vmov 0   ;;  %v72_v1 = vld [vmem:[#allocation2] sm:$0xff]  ;;  %vm393_vm0 = vcmask 1043456   ;;  %v73_v8 = vld [vmem:[#allocation2 + $0x8] sm:$0xff] }
  0x28   :  { %522 = vmatprep.mubr.bf16.mxu0 %v9474_v0  ;;  %582 = vmatprep.mubr.bf16.mxu1 %v9474_v0  ;;  %v88_v2 = vld [vmem:[#allocation2 + $0x80] sm:$0xff]  ;;  %v89_v9 = vld [vmem:[#allocation2 + $0x88] sm:$0xff]  ;;  %v74_v17 = vld [vmem:[#allocation2 + $0x10] sm:$0xff]  ;;  %vm368_vm1 = vcmask 195584  }
  0x29   :  { %v104_v3 = vld [vmem:[#allocation2 + $0x100] sm:$0xff]  ;;  %v5173_v4 = vcombine.high %v72_v1, %v88_v2  ;;  %v5175_v5 = vcombine.low %v72_v1, %v88_v2  ;;  %v57_v11 = vld [vmem:[%s9461_s0 + $0x8] sm:$0xff]  ;;  %v5202_v15 = vcombine.high %v73_v8, %v89_v9  ;;  %v90_v20 = vld [vmem:[#allocation2 + $0x90] sm:$0xff]  ;;  %v5210_v21 = vcombine.low %v73_v8, %v89_v9 }
  0x2a   :  { %v5177_v6 = vcombine.high %v104_v3, %v104_v3  ;;  %v4568_v7 = vcombine.low %v104_v3, %v104_v3  ;;  %v56_v10 = vld [vmem:[%s9461_s0] sm:$0xff]  ;;  %v69_v13 = vld [vmem:[%s9461_s0 + $0x68] sm:$0xff]  ;;  %v5212_v23 = vcombine.high %v74_v17, %v90_v20  ;;  %v106_v24 = vld [vmem:[#allocation2 + $0x110] sm:$0xff]  ;;  %v5226_v31 = vcombine.low %v74_v17, %v90_v20 }
  0x2b   :  { %9564 = vst [vmem:[#allocation11_spill] sm:$0xff] %v5173_v4  ;;  %9565 = vst [vmem:[#allocation12_spill] sm:$0xff] %v5175_v5  ;;  %490 = vmatprep.subr.bf16.mxu0 %v5173_v4  ;;  %4954 = vmatprep.subr.bf16.mxu1 %v5173_v4  ;;  %v68_v12 = vld [vmem:[%s9461_s0 + $0x60] sm:$0xff]  ;;  %v105_v16 = vld [vmem:[#allocation2 + $0x108] sm:$0xff]  ;;  %v5204_v18 = vpack.c.bf16 %v57_v11, %v56_v10  ;;  %v4572_v32 = vcombine.low %v106_v24, %v106_v24 }
  0x2c   :  { %9566 = vst [vmem:[#allocation13_spill] sm:$0xff] %v5177_v6  ;;  %491 = vmatpush1.bf16.msra.mxu0 %v5175_v5  ;;  %4956 = vmatpush1.bf16.msra.mxu1 %v5175_v5  ;;  %v5200_v14 = vsel %vm393_vm0, %v4568_v7, 0  ;;  %9568 = vst [vmem:[#allocation15_spill] sm:$0xff] %v5202_v15  ;;  %v5206_v19 = vpack.c.bf16 %v69_v13, %v68_v12  ;;  %v4570_v22 = vcombine.low %v105_v16, %v105_v16  ;;  %v58_v26 = vld [vmem:[%s9461_s0 + $0x10] sm:$0xff]  ;;  %v59_v27 = vld [vmem:[%s9461_s0 + $0x18] sm:$0xff] }
  0x2d   :  { %4600 = vmatprep.subr.msk.bf16.mxu0 %vm393_vm0, %v5177_v6  ;;  %4955 = vmatprep.subr.msk.bf16.mxu1 %vm393_vm0, %v5177_v6  ;;  %9567 = vst [vmem:[#allocation14_spill] sm:$0xff] %v5200_v14  ;;  %9570 = vst [vmem:[#allocation17_spill] sm:$0xff] %v5210_v21  ;;  %v5215_v25 = vcombine.high %v105_v16, %v105_v16  ;;  %v70_v28 = vld [vmem:[%s9461_s0 + $0x70] sm:$0xff]  ;;  %v75_v29 = vld [vmem:[#allocation2 + $0x18] sm:$0xff]  ;;  %v5236_v34 = vcombine.high %v106_v24, %v106_v24  ;;  %v5250_v38 = vsel %vm393_vm0, %v4572_v32, 0 }
  0x2e   :  { %9569 = vst [vmem:[#allocation16_spill] sm:$0xff] %v5206_v19  ;;  %9571 = vst [vmem:[#allocation18_spill] sm:$0xff] %v5212_v23  ;;  %v91_v30 = vld [vmem:[#allocation2 + $0x98] sm:$0xff]  ;;  %v5241_v35 = vsel %vm393_vm0, %v4570_v22, 0  ;;  %v76_v36 = vld [vmem:[#allocation2 + $0x20] sm:$0xff]  ;;  %v5252_v40 = vpack.c.bf16 %v59_v27, %v58_v26 }
  0x2f   :  { %9572 = vst [vmem:[#allocation19_spill] sm:$0xff] %v5215_v25  ;;  %9573 = vst [vmem:[#allocation20_spill] sm:$0xff] %v5226_v31  ;;  %v71_v33 = vld [vmem:[%s9461_s0 + $0x78] sm:$0xff]  ;;  %v5246_v37 = vcombine.high %v75_v29, %v91_v30  ;;  %v92_v39 = vld [vmem:[#allocation2 + $0xa0] sm:$0xff]  ;;  %v5278_v47 = vcombine.low %v75_v29, %v91_v30 }
  0x30   :  { %493 = vmatpush1.bf16.msra.mxu0 %v5200_v14  ;;  %4957 = vmatpush1.bf16.msra.mxu1 %v5200_v14  ;;  %9574 = vst [vmem:[#allocation21_spill] sm:$0xff] %v5236_v34  ;;  %9575 = vst [vmem:[#allocation22_spill] sm:$0xff] %v5241_v35  ;;  %v5254_v41 = vpack.c.bf16 %v71_v33, %v70_v28  ;;  %v5260_v42 = vcombine.high %v76_v36, %v92_v39  ;;  %v60_v43 = vld [vmem:[%s9461_s0 + $0x20] sm:$0xff]  ;;  %v61_v44 = vld [vmem:[%s9461_s0 + $0x28] sm:$0xff] }
  0x31   :  { %603 = vmatprep.subr.bf16.mxu1 %v5202_v15  ;;  %716 = vmatprep.subr.bf16.mxu0 %v5212_v23  ;;  %9576 = vst [vmem:[#allocation23_spill] sm:$0xff] %v5246_v37  ;;  %9577 = vst [vmem:[#allocation24_spill] sm:$0xff] %v5250_v38  ;;  %v107_v45 = vld [vmem:[#allocation2 + $0x118] sm:$0xff]  ;;  %v5276_v46 = vpack.c.bf16 %v61_v44, %v60_v43  ;;  %v5280_v48 = vld [vmem:[#allocation2 + $0x28] sm:$0xff]  ;;  %v5346_v1 = vcombine.low %v76_v36, %v92_v39 }
  0x32   :  { %9578 = vst [vmem:[#allocation25_spill] sm:$0xff] %v5254_v41  ;;  %9579 = vst [vmem:[#allocation26_spill] sm:$0xff] %v5260_v42  ;;  %v5282_v49 = vld [vmem:[#allocation2 + $0xa8] sm:$0xff]  ;;  %v5284_v50 = vcombine.high %v107_v45, %v107_v45  ;;  %v4574_v51 = vcombine.low %v107_v45, %v107_v45  ;;  %v62_v52 = vld [vmem:[%s9461_s0 + $0x30] sm:$0xff] }
  0x33   :  { %4601 = vmatmul.mubr.msk.bf16.vlgmr.msra.gmra.mrb[0].mxu0 %vm368_vm1, %v5204_v18  ;;  %4607 = vmatmul.mubr.msk.bf16.vlgmr.msra.gmra.mrb[0].mxu1 %vm368_vm1, %v5206_v19  ;;  %9580 = vst [vmem:[#allocation27_spill] sm:$0xff] %v5276_v46  ;;  %9581 = vst [vmem:[#allocation28_spill] sm:$0xff] %v5278_v47  ;;  %v63_v53 = vld [vmem:[%s9461_s0 + $0x38] sm:$0xff]  ;;  %v5306_v55 = vcombine.high %v5280_v48, %v5282_v49  ;;  %v64_v57 = vld [vmem:[%s9461_s0 + $0x40] sm:$0xff]  ;;  %v5386_v12 = vcombine.low %v5280_v48, %v5282_v49 }
  0x34   :  { %604 = vmatpush1.bf16.msra.mxu1 %v5210_v21  ;;  %532 = vmatprep.mubr.bf16.mxu0 %v9474_v0  ;;  %9582 = vst [vmem:[#allocation29_spill] sm:$0xff] %v5284_v50  ;;  %v5302_v54 = vsel %vm393_vm0, %v4574_v51, 0  ;;  %v5308_v56 = vpack.c.bf16 %v63_v53, %v62_v52  ;;  %v65_v58 = vld [vmem:[%s9461_s0 + $0x48] sm:$0xff]  ;;  %v66_v60 = vld [vmem:[%s9461_s0 + $0x50] sm:$0xff]  ;;  %v67_v61 = vld [vmem:[%s9461_s0 + $0x58] sm:$0xff]  ;;  %s5103_s0 = smov 112  }
  0x35   :  { %592 = vmatprep.mubr.bf16.mxu1 %v9474_v0  ;;  %4609 = vmatprep.subr.msk.bf16.mxu1 %vm393_vm0, %v5215_v25  ;;  %9583 = vst [vmem:[#allocation30_spill] sm:$0xff] %v5302_v54  ;;  %9584 = vst [vmem:[#allocation31_spill] sm:$0xff] %v5306_v55  ;;  %v5324_v59 = vpack.c.bf16 %v65_v58, %v64_v57  ;;  %v5338_v62 = vpack.c.bf16 %v67_v61, %v66_v60  ;;  %v108_v63 = vld [vmem:[#allocation2 + $0x120] sm:$0xff]  ;;  %v78_v7 = vld [vmem:[#allocation2 + $0x30] sm:$0xff] }
  0x36   :  { %717 = vmatpush1.bf16.msra.mxu0 %v5226_v31  ;;  %9585 = vst [vmem:[#allocation32_spill] sm:$0xff] %v5308_v56  ;;  %9586 = vst [vmem:[#allocation33_spill] sm:$0xff] %v5346_v1  ;;  %v5348_v2 = vcombine.high %v108_v63, %v108_v63  ;;  %v4576_v3 = vcombine.low %v108_v63, %v108_v63  ;;  %v94_v8 = vld [vmem:[#allocation2 + $0xb0] sm:$0xff]  ;;  %v109_v11 = vld [vmem:[#allocation2 + $0x128] sm:$0xff]  ;;  %2786 = vrot.lane.b32.xlu0 %v5204_v18, %s5103_s0 }
  0x37   :  { %4618 = vmatprep.subr.msk.bf16.mxu0 %vm393_vm0, %v5236_v34  ;;  %v5362_v10 = vcombine.high %v78_v7, %v94_v8  ;;  %9590 = vst [vmem:[#allocation37_spill] sm:$0xff] %v5386_v12  ;;  %v5388_v13 = vcombine.high %v109_v11, %v109_v11  ;;  %v4578_v16 = vcombine.low %v109_v11, %v109_v11  ;;  %v79_v17 = vld [vmem:[#allocation2 + $0x38] sm:$0xff]  ;;  %v110_v26 = vld [vmem:[#allocation2 + $0x130] sm:$0xff]  ;;  %v80_v30 = vld [vmem:[#allocation2 + $0x40] sm:$0xff] }
  0x38   :  { %606 = vmatpush1.bf16.msra.mxu1 %v5241_v35  ;;  %9587 = vst [vmem:[#allocation34_spill] sm:$0xff] %v5348_v2  ;;  %v5360_v9 = vsel %vm393_vm0, %v4576_v3, 0  ;;  %v95_v20 = vld [vmem:[#allocation2 + $0xb8] sm:$0xff]  ;;  %v5424_v27 = vcombine.low %v78_v7, %v94_v8  ;;  %v5426_v28 = vcombine.high %v110_v26, %v110_v26  ;;  %v4580_v29 = vcombine.low %v110_v26, %v110_v26  ;;  %v96_v32 = vld [vmem:[#allocation2 + $0xc0] sm:$0xff]  ;;  %v81_v48 = vld [vmem:[#allocation2 + $0x48] sm:$0xff] }
  0x39   :  { %829 = vmatprep.subr.bf16.mxu1 %v5246_v37  ;;  %9588 = vst [vmem:[#allocation35_spill] sm:$0xff] %v5360_v9  ;;  %9589 = vst [vmem:[#allocation36_spill] sm:$0xff] %v5362_v10  ;;  %v5400_v22 = vsel %vm393_vm0, %v4578_v16, 0  ;;  %v5402_v24 = vcombine.high %v79_v17, %v95_v20  ;;  %v4553_v36 = vcombine.high %v80_v30, %v96_v32  ;;  %v111_v39 = vld [vmem:[#allocation2 + $0x138] sm:$0xff]  ;;  %v97_v49 = vld [vmem:[#allocation2 + $0xc8] sm:$0xff]  ;;  %2790 = vrot.lane.b32.xlu1 %v5276_v46, %s5103_s0 }
  0x3a   :  { %719 = vmatpush1.bf16.msra.mxu0 %v5250_v38  ;;  %9591 = vst [vmem:[#allocation38_spill] sm:$0xff] %v5388_v13  ;;  %9592 = vst [vmem:[#allocation39_spill] sm:$0xff] %v5400_v22  ;;  %v5438_v33 = vsel %vm393_vm0, %v4580_v29, 0  ;;  %v5459_v43 = vcombine.low %v79_v17, %v95_v20  ;;  %v5461_v44 = vcombine.high %v111_v39, %v111_v39  ;;  %v112_v53 = vld [vmem:[#allocation2 + $0x140] sm:$0xff]  ;;  %v5498_v61 = vld [vmem:[#allocation2 + $0x50] sm:$0xff]  ;;  %2788 = vrot.lane.b32.xlu0 %v5252_v40, %s5103_s0 }
  0x3b   :  { %4602 = vmatmul.mubr.msk.bf16.gmra.mrb[4].mxu0 %vm368_vm1, %v5252_v40  ;;  %4608 = vmatmul.mubr.msk.bf16.gmra.mrb[4].mxu1 %vm368_vm1, %v5254_v41  ;;  %9593 = vst [vmem:[#allocation40_spill] sm:$0xff] %v5402_v24  ;;  %9594 = vst [vmem:[#allocation41_spill] sm:$0xff] %v5424_v27  ;;  %v4582_v45 = vcombine.low %v111_v39, %v111_v39  ;;  %v4555_v52 = vcombine.high %v81_v48, %v97_v49  ;;  %v5500_v63 = vld [vmem:[#allocation2 + $0xd0] sm:$0xff]  ;;  %v113_v8 = vld [vmem:[#allocation2 + $0x148] sm:$0xff] }
  0x3c   :  { %542 = vmatprep.mubr.bf16.mxu0 %v9474_v0  ;;  %635 = vmatprep.mubr.bf16.mxu1 %v9474_v0  ;;  %9595 = vst [vmem:[#allocation42_spill] sm:$0xff] %v5426_v28  ;;  %9596 = vst [vmem:[#allocation43_spill] sm:$0xff] %v5438_v33  ;;  %v4552_v57 = vcombine.low %v80_v30, %v96_v32  ;;  %v4585_v58 = vcombine.high %v112_v53, %v112_v53  ;;  %v5526_v20 = vld [vmem:[#allocation2 + $0x58] sm:$0xff] }
  0x3d   :  { %942 = vmatprep.subr.bf16.mxu0 %v5260_v42  ;;  %9597 = vst [vmem:[#allocation44_spill] sm:$0xff] %v5459_v43  ;;  %9598 = vst [vmem:[#allocation45_spill] sm:$0xff] %v5461_v44  ;;  %v5473_v51 = vsel %vm393_vm0, %v4582_v45, 0  ;;  %v4584_v60 = vcombine.low %v112_v53, %v112_v53  ;;  %v4557_v7 = vcombine.high %v5498_v61, %v5500_v63  ;;  %v5528_v26 = vld [vmem:[#allocation2 + $0xd8] sm:$0xff]  ;;  %2792 = vrot.lane.b32.xlu1 %v5308_v56, %s5103_s0 }
  0x3e   :  { %9599 = vst [vmem:[#allocation46_spill] sm:$0xff] %v5473_v51  ;;  %v4554_v11 = vcombine.low %v81_v48, %v97_v49  ;;  %v4587_v16 = vcombine.high %v113_v8, %v113_v8  ;;  %v4586_v17 = vcombine.low %v113_v8, %v113_v8  ;;  %v4559_v30 = vcombine.high %v5526_v20, %v5528_v26 }
  0x3f   :  { %v443_v3 = vsel %vm393_vm0, %v4584_v60, 0  ;;  %2794 = vrot.lane.b32.xlu0 %v5324_v59, %s5103_s0 }
  0x40   :  { %v449_v29 = vsel %vm393_vm0, %v4586_v17, 0 }
  0x41   :  { %2796 = vrot.lane.b32.xlu1 %v5338_v62, %s5103_s0 }
  0x43   :  { %4603 = vmatmul.mubr.msk.bf16.gmra.mrb[8].mxu0 %vm368_vm1, %v5276_v46  ;;  %4610 = vmatmul.mubr.msk.bf16.vlgmr.msra.gmra.mrb[8].mxu1 %vm368_vm1, %v5204_v18 }
  0x44   :  { %830 = vmatpush1.bf16.msra.mxu1 %v5278_v47  ;;  %552 = vmatprep.mubr.bf16.mxu0 %v9474_v0 }
  0x45   :  { %645 = vmatprep.mubr.bf16.mxu1 %v9474_v0  ;;  %4627 = vmatprep.subr.msk.bf16.mxu1 %vm393_vm0, %v5284_v50 }
  0x46   :  { %2798 = vrot.lane.b32.xlu0 %v5206_v19, %s5103_s0  ;;  %2800 = vrot.lane.b32.xlu1 %v5254_v41, %s5103_s0 }
  0x48   :  { %832 = vmatpush1.bf16.msra.mxu1 %v5302_v54 }
  0x49   :  { %1055 = vmatprep.subr.bf16.mxu1 %v5306_v55  ;;  %v5646_v55 = vld [vmem:[#allocation2 + $0xe0] sm:$0xff] }
  0x4a   :  { %9606 = vst [vmem:[#allocation52_spill] sm:$0xff] %v5646_v55 }
  0x4b   :  { %4604 = vmatmul.mubr.msk.bf16.gmra.mrb[12].mxu0 %vm368_vm1, %v5308_v56  ;;  %4611 = vmatmul.mubr.msk.bf16.gmra.mrb[12].mxu1 %vm368_vm1, %v5252_v40 }
  0x4c   :  { %562 = vmatprep.mubr.bf16.mxu0 %v9474_v0  ;;  %655 = vmatprep.mubr.bf16.mxu1 %v9474_v0 }
  0x53   :  { %4605 = vmatmul.mubr.msk.bf16.gmra.mrb[16].mxu0 %vm368_vm1, %v5324_v59  ;;  %4612 = vmatmul.mubr.msk.bf16.gmra.mrb[16].mxu1 %vm368_vm1, %v5276_v46 }
  0x54   :  { %572 = vmatprep.mubr.bf16.mxu0 %v9474_v0  ;;  %665 = vmatprep.mubr.bf16.mxu1 %v9474_v0 }
  0x5b   :  { %4606 = vmatmul.mubr.msk.bf16.gmra.mrb[20].mxu0 %vm368_vm1, %v5338_v62  ;;  %4613 = vmatmul.mubr.msk.bf16.gmra.mrb[20].mxu1 %vm368_vm1, %v5308_v56 }
  0x5c   :  { %675 = vmatprep.mubr.bf16.mxu1 %v9474_v0  ;;  %748 = vmatprep.mubr.bf16.mxu0 %v9474_v0 }
  0x63   :  { %4614 = vmatmul.mubr.msk.bf16.gmra.mrb[24].mxu1 %vm368_vm1, %v5324_v59  ;;  %4619 = vmatmul.mubr.msk.bf16.vlgmr.msra.gmra.mrb[24].mxu0 %vm368_vm1, %v5204_v18 }
  0x64   :  { %685 = vmatprep.mubr.bf16.mxu1 %v9474_v0  ;;  %758 = vmatprep.mubr.bf16.mxu0 %v9474_v0 }
  0x65   :  { %943 = vmatpush1.bf16.msra.mxu0 %v5346_v1 }
  0x66   :  { %4636 = vmatprep.subr.msk.bf16.mxu0 %vm393_vm0, %v5348_v2 }
  0x69   :  { %945 = vmatpush1.bf16.msra.mxu0 %v5360_v9  ;;  %v5644_v9 = vld [vmem:[#allocation2 + $0x60] sm:$0xff] }
  0x6a   :  { %1168 = vmatprep.subr.bf16.mxu0 %v5362_v10  ;;  %v114_v10 = vld [vmem:[#allocation2 + $0x150] sm:$0xff]  ;;  %9605 = vst [vmem:[#allocation51_spill] sm:$0xff] %v5644_v9  ;;  %v4561_v47 = vcombine.high %v5644_v9, %v5646_v55 }
  0x6b   :  { %4615 = vmatmul.mubr.msk.bf16.gmra.mrb[28].mxu1 %vm368_vm1, %v5338_v62  ;;  %4620 = vmatmul.mubr.msk.bf16.gmra.mrb[28].mxu0 %vm368_vm1, %v5252_v40  ;;  %v4589_v42 = vcombine.high %v114_v10, %v114_v10  ;;  %v4588_v38 = vcombine.low %v114_v10, %v114_v10 }
  0x6c   :  { %695 = vmatprep.mubr.bf16.mxu1 %v9474_v0  ;;  %768 = vmatprep.mubr.bf16.mxu0 %v9474_v0 }
  0x6d   :  { %v455_v10 = vsel %vm393_vm0, %v4588_v38, 0 }
  0x73   :  { %4616 = vmatmul.mubr.msk.bf16.gmra.mrb[32].mxu1 %vm368_vm1, %v5206_v19  ;;  %4621 = vmatmul.mubr.msk.bf16.gmra.mrb[32].mxu0 %vm368_vm1, %v5276_v46 }
  0x74   :  { %705 = vmatprep.mubr.bf16.mxu1 %v9474_v0  ;;  %778 = vmatprep.mubr.bf16.mxu0 %v9474_v0 }
  0x7b   :  { %4617 = vmatmul.mubr.msk.bf16.gmra.mrb[36].mxu1 %vm368_vm1, %v5254_v41  ;;  %4622 = vmatmul.mubr.msk.bf16.gmra.mrb[36].mxu0 %vm368_vm1, %v5308_v56 }
  0x7c   :  { %788 = vmatprep.mubr.bf16.mxu0 %v9474_v0  ;;  %861 = vmatprep.mubr.bf16.mxu1 %v9474_v0 }
  0x83   :  { %4623 = vmatmul.mubr.msk.bf16.gmra.mrb[40].mxu0 %vm368_vm1, %v5324_v59  ;;  %4628 = vmatmul.mubr.msk.bf16.vlgmr.msra.gmra.mrb[40].mxu1 %vm368_vm1, %v5204_v18 }
  0x84   :  { %1056 = vmatpush1.bf16.msra.mxu1 %v5386_v12  ;;  %798 = vmatprep.mubr.bf16.mxu0 %v9474_v0 }
  0x85   :  { %871 = vmatprep.mubr.bf16.mxu1 %v9474_v0  ;;  %4645 = vmatprep.subr.msk.bf16.mxu1 %vm393_vm0, %v5388_v13  ;;  %v4556_v13 = vcombine.low %v5498_v61, %v5500_v63 }
  0x88   :  { %1058 = vmatpush1.bf16.msra.mxu1 %v5400_v22 }
  0x89   :  { %1281 = vmatprep.subr.bf16.mxu1 %v5402_v24 }
  0x8b   :  { %4624 = vmatmul.mubr.msk.bf16.gmra.mrb[44].mxu0 %vm368_vm1, %v5338_v62  ;;  %4629 = vmatmul.mubr.msk.bf16.gmra.mrb[44].mxu1 %vm368_vm1, %v5252_v40 }
  0x8c   :  { %808 = vmatprep.mubr.bf16.mxu0 %v9474_v0  ;;  %881 = vmatprep.mubr.bf16.mxu1 %v9474_v0 }
  0x93   :  { %4625 = vmatmul.mubr.msk.bf16.gmra.mrb[48].mxu0 %vm368_vm1, %v5206_v19  ;;  %4630 = vmatmul.mubr.msk.bf16.gmra.mrb[48].mxu1 %vm368_vm1, %v5276_v46 }
  0x94   :  { %818 = vmatprep.mubr.bf16.mxu0 %v9474_v0  ;;  %891 = vmatprep.mubr.bf16.mxu1 %v9474_v0 }
  0x9b   :  { %4626 = vmatmul.mubr.msk.bf16.gmra.mrb[52].mxu0 %vm368_vm1, %v5254_v41  ;;  %4631 = vmatmul.mubr.msk.bf16.gmra.mrb[52].mxu1 %vm368_vm1, %v5308_v56 }
  0x9c   :  { %901 = vmatprep.mubr.bf16.mxu1 %v9474_v0  ;;  %974 = vmatprep.mubr.bf16.mxu0 %v9474_v0 }
  0xa3   :  { %4632 = vmatmul.mubr.msk.bf16.gmra.mrb[56].mxu1 %vm368_vm1, %v5324_v59  ;;  %4637 = vmatmul.mubr.msk.bf16.vlgmr.msra.gmra.mrb[56].mxu0 %vm368_vm1, %v5204_v18 }
  0xa4   :  { %911 = vmatprep.mubr.bf16.mxu1 %v9474_v0  ;;  %984 = vmatprep.mubr.bf16.mxu0 %v9474_v0 }
  0xa5   :  { %1169 = vmatpush1.bf16.msra.mxu0 %v5424_v27 }
  0xa6   :  { %4654 = vmatprep.subr.msk.bf16.mxu0 %vm393_vm0, %v5426_v28 }
  0xa9   :  { %1171 = vmatpush1.bf16.msra.mxu0 %v5438_v33 }
  0xaa   :  { %1394 = vmatprep.subr.bf16.mxu0 %v4553_v36 }
  0xab   :  { %4633 = vmatmul.mubr.msk.bf16.gmra.mrb[60].mxu1 %vm368_vm1, %v5338_v62  ;;  %4638 = vmatmul.mubr.msk.bf16.gmra.mrb[60].mxu0 %vm368_vm1, %v5252_v40 }
  0xac   :  { %921 = vmatprep.mubr.bf16.mxu1 %v9474_v0  ;;  %994 = vmatprep.mubr.bf16.mxu0 %v9474_v0 }
  0xb3   :  { %4634 = vmatmul.mubr.msk.bf16.gmra.mrb[64].mxu1 %vm368_vm1, %v5206_v19  ;;  %4639 = vmatmul.mubr.msk.bf16.gmra.mrb[64].mxu0 %vm368_vm1, %v5276_v46 }
  0xb4   :  { %931 = vmatprep.mubr.bf16.mxu1 %v9474_v0  ;;  %1004 = vmatprep.mubr.bf16.mxu0 %v9474_v0 }
  0xbb   :  { %4635 = vmatmul.mubr.msk.bf16.gmra.mrb[68].mxu1 %vm368_vm1, %v5254_v41  ;;  %4640 = vmatmul.mubr.msk.bf16.gmra.mrb[68].mxu0 %vm368_vm1, %v5308_v56 }
  0xbc   :  { %1014 = vmatprep.mubr.bf16.mxu0 %v9474_v0  ;;  %1087 = vmatprep.mubr.bf16.mxu1 %v9474_v0 }
  0xc3   :  { %4641 = vmatmul.mubr.msk.bf16.gmra.mrb[72].mxu0 %vm368_vm1, %v5324_v59  ;;  %4646 = vmatmul.mubr.msk.bf16.vlgmr.msra.gmra.mrb[72].mxu1 %vm368_vm1, %v5204_v18 }
  0xc4   :  { %1282 = vmatpush1.bf16.msra.mxu1 %v5459_v43  ;;  %1024 = vmatprep.mubr.bf16.mxu0 %v9474_v0  ;;  %v9602_v43 = vmov 0  }
  0xc5   :  { %1097 = vmatprep.mubr.bf16.mxu1 %v9474_v0  ;;  %4663 = vmatprep.subr.msk.bf16.mxu1 %vm393_vm0, %v5461_v44 }
  0xc8   :  { %1284 = vmatpush1.bf16.msra.mxu1 %v5473_v51 }
  0xc9   :  { %1507 = vmatprep.subr.bf16.mxu1 %v4555_v52 }
  0xcb   :  { %4642 = vmatmul.mubr.msk.bf16.gmra.mrb[76].mxu0 %vm368_vm1, %v5338_v62  ;;  %4647 = vmatmul.mubr.msk.bf16.gmra.mrb[76].mxu1 %vm368_vm1, %v5252_v40 }
  0xcc   :  { %1034 = vmatprep.mubr.bf16.mxu0 %v9474_v0  ;;  %1107 = vmatprep.mubr.bf16.mxu1 %v9474_v0 }
  0xd3   :  { %4643 = vmatmul.mubr.msk.bf16.gmra.mrb[80].mxu0 %vm368_vm1, %v5206_v19  ;;  %4648 = vmatmul.mubr.msk.bf16.gmra.mrb[80].mxu1 %vm368_vm1, %v5276_v46 }
  0xd4   :  { %1044 = vmatprep.mubr.bf16.mxu0 %v9474_v0  ;;  %1117 = vmatprep.mubr.bf16.mxu1 %v9474_v0 }
  0xdb   :  { %4644 = vmatmul.mubr.msk.bf16.gmra.mrb[84].mxu0 %vm368_vm1, %v5254_v41  ;;  %4649 = vmatmul.mubr.msk.bf16.gmra.mrb[84].mxu1 %vm368_vm1, %v5308_v56 }
  0xdc   :  { %1127 = vmatprep.mubr.bf16.mxu1 %v9474_v0  ;;  %1200 = vmatprep.mubr.bf16.mxu0 %v9474_v0 }
  0xe3   :  { %4650 = vmatmul.mubr.msk.bf16.gmra.mrb[88].mxu1 %vm368_vm1, %v5324_v59  ;;  %4655 = vmatmul.mubr.msk.bf16.vlgmr.msra.gmra.mrb[88].mxu0 %vm368_vm1, %v5204_v18 }
  0xe4   :  { %1137 = vmatprep.mubr.bf16.mxu1 %v9474_v0  ;;  %1210 = vmatprep.mubr.bf16.mxu0 %v9474_v0 }
  0xe5   :  { %1395 = vmatpush1.bf16.msra.mxu0 %v4552_v57 }
  0xe6   :  { %4672 = vmatprep.subr.msk.bf16.mxu0 %vm393_vm0, %v4585_v58 }
  0xe9   :  { %1397 = vmatpush1.bf16.msra.mxu0 %v443_v3 }
  0xea   :  { %1620 = vmatprep.subr.bf16.mxu0 %v4557_v7 }
  0xeb   :  { %4651 = vmatmul.mubr.msk.bf16.gmra.mrb[92].mxu1 %vm368_vm1, %v5338_v62  ;;  %4656 = vmatmul.mubr.msk.bf16.gmra.mrb[92].mxu0 %vm368_vm1, %v5252_v40 }
  0xec   :  { %1147 = vmatprep.mubr.bf16.mxu1 %v9474_v0  ;;  %1220 = vmatprep.mubr.bf16.mxu0 %v9474_v0 }
  0xf3   :  { %4652 = vmatmul.mubr.msk.bf16.gmra.mrb[96].mxu1 %vm368_vm1, %v5206_v19  ;;  %4657 = vmatmul.mubr.msk.bf16.gmra.mrb[96].mxu0 %vm368_vm1, %v5276_v46 }
  0xf4   :  { %1157 = vmatprep.mubr.bf16.mxu1 %v9474_v0  ;;  %1230 = vmatprep.mubr.bf16.mxu0 %v9474_v0 }
  0xfb   :  { %4653 = vmatmul.mubr.msk.bf16.gmra.mrb[100].mxu1 %vm368_vm1, %v5254_v41  ;;  %4658 = vmatmul.mubr.msk.bf16.gmra.mrb[100].mxu0 %vm368_vm1, %v5308_v56 }
  0xfc   :  { %1240 = vmatprep.mubr.bf16.mxu0 %v9474_v0  ;;  %1313 = vmatprep.mubr.bf16.mxu1 %v9474_v0 }
 0x103   :  { %4659 = vmatmul.mubr.msk.bf16.gmra.mrb[104].mxu0 %vm368_vm1, %v5324_v59  ;;  %4664 = vmatmul.mubr.msk.bf16.vlgmr.msra.gmra.mrb[104].mxu1 %vm368_vm1, %v5204_v18 }
 0x104   :  { %1508 = vmatpush1.bf16.msra.mxu1 %v4554_v11  ;;  %1250 = vmatprep.mubr.bf16.mxu0 %v9474_v0 }
 0x105   :  { %1323 = vmatprep.mubr.bf16.mxu1 %v9474_v0  ;;  %4681 = vmatprep.subr.msk.bf16.mxu1 %vm393_vm0, %v4587_v16 }
 0x106   :  { %v5540_v32 = vpop.f32.mrb[0].mxu1  ;;  %v5542_v36 = vpop.f32.mrb[0].mxu0 }
 0x107   :  { %v5544_v39 = vpop.f32.mrb[1].mxu1  ;;  %v5546_v45 = vpop.f32.mrb[1].mxu0 }
 0x108   :  { %v5548_v48 = vpop.f32.mrb[2].mxu1  ;;  %v5550_v49 = vpop.f32.mrb[2].mxu0  ;;  %1510 = vmatpush1.bf16.msra.mxu1 %v449_v29 }
 0x109   :  { %v5552_v52 = vpop.f32.mrb[3].mxu1  ;;  %v5554_v53 = vpop.f32.mrb[3].mxu0  ;;  %1733 = vmatprep.subr.bf16.mxu1 %v4559_v30 }
 0x10b   :  { %4660 = vmatmul.mubr.msk.bf16.gmra.mrb[108].mxu0 %vm368_vm1, %v5338_v62  ;;  %4665 = vmatmul.mubr.msk.bf16.gmra.mrb[108].mxu1 %vm368_vm1, %v5252_v40 }
 0x10c   :  { %1260 = vmatprep.mubr.bf16.mxu0 %v9474_v0  ;;  %1333 = vmatprep.mubr.bf16.mxu1 %v9474_v0 }
 0x10e   :  { %v5562_v57 = vpop.f32.mrb[4].mxu1  ;;  %v5564_v58 = vpop.f32.mrb[4].mxu0 }
 0x10f   :  { %v5566_v60 = vpop.f32.mrb[5].mxu1  ;;  %v5568_v3 = vpop.f32.mrb[5].mxu0 }
 0x110   :  { %v5570_v7 = vpop.f32.mrb[6].mxu1  ;;  %v5572_v8 = vpop.f32.mrb[6].mxu0 }
 0x111   :  { %9600 = vst [vmem:[#allocation47_spill] sm:$0xff] %v5570_v7  ;;  %v5574_v11 = vpop.f32.mrb[7].mxu1  ;;  %v5576_v16 = vpop.f32.mrb[7].mxu0 }
 0x112   :  { %9601 = vst [vmem:[#allocation48_spill] sm:$0xff] %v5574_v11 }
 0x113   :  { %4661 = vmatmul.mubr.msk.bf16.gmra.mrb[112].mxu0 %vm368_vm1, %v5206_v19  ;;  %4666 = vmatmul.mubr.msk.bf16.gmra.mrb[112].mxu1 %vm368_vm1, %v5276_v46 }
 0x114   :  { %1270 = vmatprep.mubr.bf16.mxu0 %v9474_v0  ;;  %1343 = vmatprep.mubr.bf16.mxu1 %v9474_v0 }
 0x116   :  { %v5584_v17 = vpop.f32.mrb[8].mxu1  ;;  %v5586_v29 = vpop.f32.mrb[8].mxu0 }
 0x117   :  { %v5590_v51 = vpop.f32.mrb[9].mxu1  ;;  %v5592_v44 = vpop.f32.mrb[9].mxu0  ;;  %v9609_v9 = vmax.f32 %v5542_v36, %v5584_v17 }
 0x118   :  { %v5596_v33 = vpop.f32.mrb[10].mxu1  ;;  %v5598_v28 = vpop.f32.mrb[10].mxu0  ;;  %v9610_v11 = vmax.f32 %v5546_v45, %v5590_v51 }
 0x119   :  { %v5602_v27 = vpop.f32.mrb[11].mxu1  ;;  %v5604_v24 = vpop.f32.mrb[11].mxu0 }
 0x11a   :  { %v9612_v51 = vmax.f32 %v5554_v53, %v5602_v27  ;;  %v4558_v53 = vcombine.low %v5526_v20, %v5528_v26  ;;  %v5810_v26 = vld [vmem:[#allocation2 + $0x68] sm:$0xff] }
 0x11b   :  { %4662 = vmatmul.mubr.msk.bf16.gmra.mrb[116].mxu0 %vm368_vm1, %v5254_v41  ;;  %4667 = vmatmul.mubr.msk.bf16.gmra.mrb[116].mxu1 %vm368_vm1, %v5308_v56  ;;  %9617 = vst [vmem:[#allocation55_spill] sm:$0xff] %v5810_v26 }
 0x11c   :  { %1353 = vmatprep.mubr.bf16.mxu1 %v9602_v43  ;;  %1426 = vmatprep.mubr.bf16.mxu0 %v9602_v43 }
 0x11e   :  { %v5614_v22 = vpop.f32.mrb[12].mxu1  ;;  %v5616_v0 = vpop.f32.mrb[12].mxu0 }
 0x11f   :  { %v5620_v12 = vpop.f32.mrb[13].mxu1  ;;  %v5622_v30 = vpop.f32.mrb[13].mxu0 }
 0x120   :  { %v5626_v2 = vpop.f32.mrb[14].mxu1  ;;  %v5628_v1 = vpop.f32.mrb[14].mxu0 }
 0x121   :  { %9603 = vst [vmem:[#allocation49_spill] sm:$0xff] %v5628_v1  ;;  %v5632_v54 = vpop.f32.mrb[15].mxu1  ;;  %v5634_v50 = vpop.f32.mrb[15].mxu0 }
 0x122   :  { %9604 = vst [vmem:[#allocation50_spill] sm:$0xff] %v5634_v50 }
 0x123   :  { %4668 = vmatmul.mubr.msk.bf16.gmra.mrb[120].mxu1 %vm368_vm1, %v5324_v59  ;;  %4673 = vmatmul.mubr.msk.bf16.vlgmr.msra.gmra.mrb[120].mxu0 %vm368_vm1, %v5204_v18 }
 0x124   :  { %1363 = vmatprep.mubr.bf16.mxu1 %v9602_v43  ;;  %1436 = vmatprep.mubr.bf16.mxu0 %v9602_v43 }
 0x125   :  { %1621 = vmatpush1.bf16.msra.mxu0 %v4556_v13 }
 0x126   :  { %v5650_v61 = vpop.f32.mrb[16].mxu1  ;;  %v5652_v63 = vpop.f32.mrb[16].mxu0  ;;  %4690 = vmatprep.subr.msk.bf16.mxu0 %vm393_vm0, %v4589_v42 }
 0x127   :  { %v5660_v31 = vpop.f32.mrb[17].mxu1  ;;  %v5662_v37 = vpop.f32.mrb[17].mxu0 }
 0x128   :  { %v5666_v35 = vpop.f32.mrb[18].mxu1  ;;  %v5668_v25 = vpop.f32.mrb[18].mxu0 }
 0x129   :  { %v5672_v42 = vpop.f32.mrb[19].mxu1  ;;  %v5674_v21 = vpop.f32.mrb[19].mxu0  ;;  %1623 = vmatpush1.bf16.msra.mxu0 %v455_v10 }
 0x12a   :  { %1846 = vmatprep.subr.bf16.mxu0 %v4561_v47 }
 0x12b   :  { %4669 = vmatmul.mubr.msk.bf16.gmra.mrb[124].mxu1 %vm368_vm1, %v5338_v62  ;;  %4674 = vmatmul.mubr.msk.bf16.gmra.mrb[124].mxu0 %vm368_vm1, %v5252_v40 }
 0x12c   :  { %1373 = vmatprep.mubr.bf16.mxu1 %v9602_v43  ;;  %1446 = vmatprep.mubr.bf16.mxu0 %v9602_v43 }
 0x12e   :  { %v5684_v38 = vpop.f32.mrb[20].mxu1  ;;  %v5686_v13 = vpop.f32.mrb[20].mxu0 }
 0x12f   :  { %v5690_v23 = vpop.f32.mrb[21].mxu1  ;;  %v5692_v47 = vpop.f32.mrb[21].mxu0 }
 0x130   :  { %v5696_v14 = vpop.f32.mrb[22].mxu1  ;;  %v5698_v6 = vpop.f32.mrb[22].mxu0 }
 0x131   :  { %9607 = vst [vmem:[#allocation53_spill] sm:$0xff] %v5696_v14  ;;  %v5706_v5 = vpop.f32.mrb[23].mxu1  ;;  %v5708_v15 = vpop.f32.mrb[23].mxu0 }
 0x132   :  { %9608 = vst [vmem:[#allocation54_spill] sm:$0xff] %v5706_v5 }
 0x133   :  { %4670 = vmatmul.mubr.msk.bf16.gmra.mrb[128].mxu1 %vm368_vm1, %v5206_v19  ;;  %4675 = vmatmul.mubr.msk.bf16.gmra.mrb[128].mxu0 %vm368_vm1, %v5276_v46 }
 0x134   :  { %1383 = vmatprep.mubr.bf16.mxu1 %v9602_v43  ;;  %1456 = vmatprep.mubr.bf16.mxu0 %v9602_v43 }
 0x136   :  { %v5722_v10 = vpop.f32.mrb[24].mxu1  ;;  %v750_v4 = vpop.f32.mrb[24].mxu0 }
 0x137   :  { %v5729_v55 = vmax.f32 %v9609_v9, %v750_v4  ;;  %v5731_v46 = vpop.f32.mrb[25].mxu1  ;;  %v752_v5 = vpop.f32.mrb[25].mxu0  ;;  %v9611_v4 = vmax.f32 %v5550_v49, %v5596_v33  ;;  %v115_v49 = vld [vmem:[#allocation2 + $0x158] sm:$0xff] }
 0x138   :  { %v5738_v14 = vmax.f32 %v9610_v11, %v752_v5  ;;  %v5740_v1 = vpop.f32.mrb[26].mxu1  ;;  %v754_v7 = vpop.f32.mrb[26].mxu0  ;;  %v9614_v5 = vmax.f32 %v5568_v3, %v5620_v12  ;;  %v4591_v12 = vcombine.high %v115_v49, %v115_v49  ;;  %v4590_v3 = vcombine.low %v115_v49, %v115_v49 }
 0x139   :  { %v5747_v9 = vmax.f32 %v9611_v4, %v754_v7  ;;  %v5749_v36 = vpop.f32.mrb[27].mxu1  ;;  %v756_v17 = vpop.f32.mrb[27].mxu0  ;;  %v9613_v7 = vmax.f32 %v5564_v58, %v5614_v22  ;;  %v9615_v58 = vmax.f32 %v5572_v8, %v5626_v2  ;;  %v5812_v22 = vld [vmem:[#allocation2 + $0xe8] sm:$0xff]  ;;  %v9619_v49 = vmax.f32 %v5586_v29, %v5650_v61  ;;  %v9635_v29 = vld [vmem:[#allocation27_spill] sm:$0xff] }
 0x13a   :  { %v5760_v45 = vmax.f32 %v9612_v51, %v756_v17  ;;  %9618 = vst [vmem:[#allocation56_spill] sm:$0xff] %v5812_v22  ;;  %v9621_v61 = vmax.f32 %v5598_v28, %v5666_v35 }
 0x13b   :  { %4671 = vmatmul.mubr.msk.bf16.gmra.mrb[132].mxu1 %vm368_vm1, %v5254_v41  ;;  %4676 = vmatmul.mubr.msk.bf16.gmra.mrb[132].mxu0 %vm368_vm1, %v5308_v56 }
 0x13c   :  { %1466 = vmatprep.mubr.bf16.mxu0 %v9602_v43  ;;  %1539 = vmatprep.mubr.bf16.mxu1 %v9602_v43 }
 0x13e   :  { %v5772_v33 = vpop.f32.mrb[28].mxu1  ;;  %v760_v27 = vpop.f32.mrb[28].mxu0 }
 0x13f   :  { %v5779_v11 = vmax.f32 %v9613_v7, %v760_v27  ;;  %v5781_v4 = vpop.f32.mrb[29].mxu1  ;;  %v762_v17 = vpop.f32.mrb[29].mxu0 }
 0x140   :  { %v5788_v34 = vmax.f32 %v9614_v5, %v762_v17  ;;  %v5790_v50 = vpop.f32.mrb[30].mxu1  ;;  %v764_v56 = vpop.f32.mrb[30].mxu0  ;;  %v9616_v17 = vmax.f32 %v5576_v16, %v5632_v54  ;;  %v461_v54 = vsel %vm393_vm0, %v4590_v3, 0  ;;  %v9620_v3 = vmax.f32 %v5592_v44, %v5660_v31 }
 0x141   :  { %v5799_v27 = vmax.f32 %v9615_v58, %v764_v56  ;;  %v5801_v7 = vpop.f32.mrb[31].mxu1  ;;  %v766_v51 = vpop.f32.mrb[31].mxu0  ;;  %v4563_v56 = vcombine.high %v5810_v26, %v5812_v22  ;;  %v9622_v44 = vmax.f32 %v5604_v24, %v5672_v42  ;;  %v9623_v24 = vmax.f32 %v5616_v0, %v5684_v38  ;;  %v9627_v0 = vld [vmem:[#allocation49_spill] sm:$0xff] }
 0x142   :  { %v5808_v20 = vmax.f32 %v9616_v17, %v766_v51  ;;  %v9628_v38 = vld [vmem:[#allocation53_spill] sm:$0xff] }
 0x143   :  { %4677 = vmatmul.mubr.msk.bf16.gmra.mrb[136].mxu0 %vm368_vm1, %v5324_v59  ;;  %4682 = vmatmul.mubr.msk.bf16.vlgmr.msra.gmra.mrb[136].mxu1 %vm368_vm1, %v5204_v18 }
 0x144   :  { %1734 = vmatpush1.bf16.msra.mxu1 %v4558_v53  ;;  %1476 = vmatprep.mubr.bf16.mxu0 %v9602_v43 }
 0x145   :  { %1549 = vmatprep.mubr.bf16.mxu1 %v9602_v43  ;;  %4699 = vmatprep.subr.msk.bf16.mxu1 %vm393_vm0, %v4591_v12 }
 0x146   :  { %v5824_v2 = vpop.f32.mrb[32].mxu1  ;;  %v770_v8 = vpop.f32.mrb[32].mxu0 }
 0x147   :  { %v5831_v53 = vmax.f32 %v9619_v49, %v770_v8  ;;  %v5833_v51 = vpop.f32.mrb[33].mxu1  ;;  %v772_v58 = vpop.f32.mrb[33].mxu0 }
 0x148   :  { %v5840_v17 = vmax.f32 %v9620_v3, %v772_v58  ;;  %v5842_v5 = vpop.f32.mrb[34].mxu1  ;;  %v774_v26 = vpop.f32.mrb[34].mxu0  ;;  %1736 = vmatpush1.bf16.msra.mxu1 %v461_v54  ;;  %v9625_v3 = vmax.f32 %v5622_v30, %v5690_v23  ;;  %v9631_v23 = vld [vmem:[#allocation50_spill] sm:$0xff] }
 0x149   :  { %v5849_v8 = vmax.f32 %v9621_v61, %v774_v26  ;;  %v5851_v49 = vpop.f32.mrb[35].mxu1  ;;  %v776_v12 = vpop.f32.mrb[35].mxu0  ;;  %1959 = vmatprep.subr.bf16.mxu1 %v4563_v56  ;;  %v9626_v26 = vld [vmem:[#allocation47_spill] sm:$0xff]  ;;  %v9632_v30 = vld [vmem:[#allocation54_spill] sm:$0xff] }
 0x14a   :  { %v5858_v58 = vmax.f32 %v9622_v44, %v776_v12  ;;  %v9630_v12 = vld [vmem:[#allocation48_spill] sm:$0xff] }
 0x14b   :  { %4678 = vmatmul.mubr.msk.bf16.gmra.mrb[140].mxu0 %vm368_vm1, %v5338_v62  ;;  %4683 = vmatmul.mubr.msk.bf16.gmra.mrb[140].mxu1 %vm368_vm1, %v5252_v40 }
 0x14c   :  { %1486 = vmatprep.mubr.bf16.mxu0 %v9602_v43  ;;  %1559 = vmatprep.mubr.bf16.mxu1 %v9602_v43 }
 0x14e   :  { %v5866_v35 = vpop.f32.mrb[36].mxu1  ;;  %v780_v28 = vpop.f32.mrb[36].mxu0 }
 0x14f   :  { %v5873_v42 = vmax.f32 %v9623_v24, %v780_v28  ;;  %v5875_v54 = vpop.f32.mrb[37].mxu1  ;;  %v782_v56 = vpop.f32.mrb[37].mxu0  ;;  %v9629_v28 = vmax.f32 %v9627_v0, %v9628_v38  ;;  %v9636_v38 = vmax.f32 %v5652_v63, %v5722_v10  ;;  %v9638_v63 = vmax.f32 %v5668_v25, %v5740_v1  ;;  %v9640_v25 = vld [vmem:[#allocation32_spill] sm:$0xff] }
 0x150   :  { %9624 = vst [vmem:[#allocation57_spill] sm:$0xff] %v5875_v54  ;;  %v5882_v61 = vmax.f32 %v9625_v3, %v782_v56  ;;  %v5884_v44 = vpop.f32.mrb[38].mxu1  ;;  %v784_v31 = vpop.f32.mrb[38].mxu0  ;;  %v9633_v56 = vmax.f32 %v9631_v23, %v9632_v30 }
 0x151   :  { %v5891_v24 = vmax.f32 %v9629_v28, %v784_v31  ;;  %v5893_v16 = vpop.f32.mrb[39].mxu1  ;;  %v786_v22 = vpop.f32.mrb[39].mxu0 }
 0x152   :  { %v5900_v3 = vmax.f32 %v9633_v56, %v786_v22  ;;  %v9637_v56 = vmax.f32 %v5662_v37, %v5731_v46  ;;  %v9639_v37 = vmax.f32 %v5674_v21, %v5749_v36  ;;  %v9641_v21 = vmax.f32 %v5686_v13, %v5772_v33 }
 0x153   :  { %4679 = vmatmul.mubr.msk.bf16.gmra.mrb[144].mxu0 %vm368_vm1, %v5206_v19  ;;  %4684 = vmatmul.mubr.msk.bf16.gmra.mrb[144].mxu1 %vm368_vm1, %v9635_v29  ;;  %v9645_v13 = vmax.f32 %v5698_v6, %v5790_v50 }
 0x154   :  { %9634 = vst [vmem:[#allocation47_spill] sm:$0xff] %v5900_v3  ;;  %1496 = vmatprep.mubr.bf16.mxu0 %v9602_v43  ;;  %1569 = vmatprep.mubr.bf16.mxu1 %v9602_v43 }
 0x156   :  { %v790_v31 = vpop.f32.mrb[40].mxu0  ;;  %v5908_v0 = vpop.f32.mrb[40].mxu1 }
 0x157   :  { %v5913_v28 = vmax.f32 %v9636_v38, %v790_v31  ;;  %v792_v23 = vpop.f32.mrb[41].mxu0  ;;  %v5917_v30 = vpop.f32.mrb[41].mxu1 }
 0x158   :  { %v5922_v54 = vmax.f32 %v9637_v56, %v792_v23  ;;  %v794_v19 = vpop.f32.mrb[42].mxu0  ;;  %v5926_v3 = vpop.f32.mrb[42].mxu1  ;;  %v9644_v23 = vmax.f32 %v5692_v47, %v5781_v4  ;;  %v9646_v47 = vld [vmem:[#allocation52_spill] sm:$0xff]  ;;  %v9647_v4 = vld [vmem:[#allocation51_spill] sm:$0xff] }
 0x159   :  { %v5931_v10 = vmax.f32 %v9638_v63, %v794_v19  ;;  %v796_v38 = vpop.f32.mrb[43].mxu0  ;;  %v5935_v22 = vpop.f32.mrb[43].mxu1 }
 0x15a   :  { %v5940_v46 = vmax.f32 %v9639_v37, %v796_v38  ;;  %v116_v37 = vld [vmem:[#allocation2 + $0x160] sm:$0xff] }
 0x15b   :  { %4680 = vmatmul.mubr.msk.bf16.gmra.mrb[148].mxu0 %vm368_vm1, %v5254_v41  ;;  %4685 = vmatmul.mubr.msk.bf16.gmra.mrb[148].mxu1 %vm368_vm1, %v9640_v25  ;;  %v4593_v6 = vcombine.high %v116_v37, %v116_v37  ;;  %v4592_v50 = vcombine.low %v116_v37, %v116_v37 }
 0x15c   :  { %1579 = vmatprep.mubr.bf16.mxu1 %v9602_v43  ;;  %1652 = vmatprep.mubr.bf16.mxu0 %v9602_v43 }
 0x15d   :  { %v467_v37 = vsel %vm393_vm0, %v4592_v50, 0 }
 0x15e   :  { %v800_v19 = vpop.f32.mrb[44].mxu0  ;;  %v5950_v1 = vpop.f32.mrb[44].mxu1 }
 0x15f   :  { %v5955_v36 = vmax.f32 %v9641_v21, %v800_v19  ;;  %v802_v63 = vpop.f32.mrb[45].mxu0  ;;  %v5959_v38 = vpop.f32.mrb[45].mxu1  ;;  %v9652_v19 = vmax.f32 %v5544_v39, %v5833_v51  ;;  %v9654_v39 = vmax.f32 %v5552_v52, %v5851_v49  ;;  %v9655_v52 = vmax.f32 %v5562_v57, %v5866_v35 }
 0x160   :  { %9643 = vst [vmem:[#allocation53_spill] sm:$0xff] %v5959_v38  ;;  %v5964_v31 = vmax.f32 %v9644_v23, %v802_v63  ;;  %v804_v25 = vpop.f32.mrb[46].mxu0  ;;  %v5968_v41 = vpop.f32.mrb[46].mxu1  ;;  %v4560_v23 = vcombine.low %v9647_v4, %v9646_v47  ;;  %v9648_v63 = vmax.f32 %v5708_v15, %v5801_v7  ;;  %v9651_v47 = vmax.f32 %v5540_v32, %v5824_v2 }
 0x161   :  { %9642 = vst [vmem:[#allocation49_spill] sm:$0xff] %v5955_v36  ;;  %v5973_v33 = vmax.f32 %v9645_v13, %v804_v25  ;;  %v806_v21 = vpop.f32.mrb[47].mxu0  ;;  %v5977_v56 = vpop.f32.mrb[47].mxu1  ;;  %v5992_v25 = vld [vmem:[#allocation2 + $0x70] sm:$0xff]  ;;  %v9653_v32 = vmax.f32 %v5548_v48, %v5842_v5  ;;  %v9658_v57 = vmax.f32 %v9626_v26, %v5884_v44  ;;  %v9662_v26 = vld [vmem:[#allocation27_spill] sm:$0xff] }
 0x162   :  { %v5984_v29 = vmax.f32 %v9648_v63, %v806_v21  ;;  %9649 = vst [vmem:[#allocation48_spill] sm:$0xff] %v5992_v25  ;;  %v5994_v13 = vld [vmem:[#allocation2 + $0xf0] sm:$0xff] }
 0x163   :  { %4686 = vmatmul.mubr.msk.bf16.gmra.mrb[152].mxu1 %vm368_vm1, %v5324_v59  ;;  %4691 = vmatmul.mubr.msk.bf16.vlgmr.msra.gmra.mrb[152].mxu0 %vm368_vm1, %v5204_v18  ;;  %9650 = vst [vmem:[#allocation50_spill] sm:$0xff] %v5994_v13  ;;  %v4565_v21 = vcombine.high %v5992_v25, %v5994_v13 }
 0x164   :  { %1589 = vmatprep.mubr.bf16.mxu1 %v9602_v43  ;;  %1662 = vmatprep.mubr.bf16.mxu0 %v9602_v43 }
 0x165   :  { %1847 = vmatpush1.bf16.msra.mxu0 %v4560_v23 }
 0x166   :  { %v810_v15 = vpop.f32.mrb[48].mxu0  ;;  %v5998_v7 = vpop.f32.mrb[48].mxu1  ;;  %4708 = vmatprep.subr.msk.bf16.mxu0 %vm393_vm0, %v4593_v6 }
 0x167   :  { %v6007_v4 = vmax.f32 %v9651_v47, %v810_v15  ;;  %v812_v38 = vpop.f32.mrb[49].mxu0  ;;  %v6011_v23 = vpop.f32.mrb[49].mxu1 }
 0x168   :  { %v6016_v6 = vmax.f32 %v9652_v19, %v812_v38  ;;  %v814_v25 = vpop.f32.mrb[50].mxu0  ;;  %v6020_v13 = vpop.f32.mrb[50].mxu1 }
 0x169   :  { %v6025_v2 = vmax.f32 %v9653_v32, %v814_v25  ;;  %v816_v47 = vpop.f32.mrb[51].mxu0  ;;  %v6029_v63 = vpop.f32.mrb[51].mxu1  ;;  %1849 = vmatpush1.bf16.msra.mxu0 %v467_v37 }
 0x16a   :  { %v6034_v51 = vmax.f32 %v9654_v39, %v816_v47  ;;  %2072 = vmatprep.subr.bf16.mxu0 %v4565_v21  ;;  %v9656_v21 = vld [vmem:[#allocation57_spill] sm:$0xff]  ;;  %v9661_v39 = vld [vmem:[#allocation16_spill] sm:$0xff] }
 0x16b   :  { %4687 = vmatmul.mubr.msk.bf16.gmra.mrb[156].mxu1 %vm368_vm1, %v5338_v62  ;;  %4692 = vmatmul.mubr.msk.bf16.gmra.mrb[156].mxu0 %vm368_vm1, %v5252_v40  ;;  %v9657_v32 = vmax.f32 %v5566_v60, %v9656_v21  ;;  %v9659_v60 = vmax.f32 %v9630_v12, %v5893_v16  ;;  %v9660_v21 = vld [vmem:[#allocation47_spill] sm:$0xff]  ;;  %v9663_v12 = vmax.f32 %v5729_v55, %v5908_v0  ;;  %v9673_v16 = vld [vmem:[#allocation53_spill] sm:$0xff] }
 0x16c   :  { %1599 = vmatprep.mubr.bf16.mxu1 %v9602_v43  ;;  %1672 = vmatprep.mubr.bf16.mxu0 %v9602_v43  ;;  %v9665_v55 = vmax.f32 %v5747_v9, %v5926_v3 }
 0x16e   :  { %v820_v48 = vpop.f32.mrb[52].mxu0  ;;  %v6044_v5 = vpop.f32.mrb[52].mxu1 }
 0x16f   :  { %v6049_v49 = vmax.f32 %v9655_v52, %v820_v48  ;;  %v822_v25 = vpop.f32.mrb[53].mxu0  ;;  %v6053_v37 = vpop.f32.mrb[53].mxu1  ;;  %v9664_v48 = vmax.f32 %v5738_v14, %v5917_v30  ;;  %v9667_v14 = vmax.f32 %v5760_v45, %v5935_v22  ;;  %v9672_v45 = vmax.f32 %v5779_v11, %v5950_v1  ;;  %v6168_v11 = vld [vmem:[#allocation2 + $0xf8] sm:$0xff] }
 0x170   :  { %v6058_v47 = vmax.f32 %v9657_v32, %v822_v25  ;;  %v824_v38 = vpop.f32.mrb[54].mxu0  ;;  %v6062_v15 = vpop.f32.mrb[54].mxu1  ;;  %v9677_v1 = vmax.f32 %v5799_v27, %v5968_v41  ;;  %9680 = vst [vmem:[#allocation47_spill] sm:$0xff] %v6168_v11 }
 0x171   :  { %v6067_v35 = vmax.f32 %v9658_v57, %v824_v38  ;;  %v826_v52 = vpop.f32.mrb[55].mxu0  ;;  %v6071_v19 = vpop.f32.mrb[55].mxu1 }
 0x172   :  { %v6076_v25 = vmax.f32 %v9659_v60, %v826_v52 }
 0x173   :  { %4688 = vmatmul.mubr.msk.bf16.gmra.mrb[160].mxu1 %vm368_vm1, %v9661_v39  ;;  %4693 = vmatmul.mubr.msk.bf16.gmra.mrb[160].mxu0 %vm368_vm1, %v9662_v26 }
 0x174   :  { %1609 = vmatprep.mubr.bf16.mxu1 %v9602_v43  ;;  %1682 = vmatprep.mubr.bf16.mxu0 %v9602_v43 }
 0x176   :  { %v6086_v44 = vpop.f32.mrb[56].mxu1  ;;  %v976_v38 = vpop.f32.mrb[56].mxu0 }
 0x177   :  { %v6093_v57 = vmax.f32 %v9663_v12, %v976_v38  ;;  %v6095_v52 = vpop.f32.mrb[57].mxu1  ;;  %v978_v60 = vpop.f32.mrb[57].mxu0 }
 0x178   :  { %v6102_v50 = vmax.f32 %v9664_v48, %v978_v60  ;;  %v6104_v26 = vpop.f32.mrb[58].mxu1  ;;  %v980_v39 = vpop.f32.mrb[58].mxu0  ;;  %v9669_v48 = vld [vmem:[#allocation25_spill] sm:$0xff]  ;;  %v9670_v60 = vld [vmem:[#allocation32_spill] sm:$0xff] }
 0x179   :  { %v6111_v0 = vmax.f32 %v9665_v55, %v980_v39  ;;  %v6113_v38 = vpop.f32.mrb[59].mxu1  ;;  %v982_v12 = vpop.f32.mrb[59].mxu0  ;;  %v117_v39 = vld [vmem:[#allocation2 + $0x168] sm:$0xff] }
 0x17a   :  { %9666 = vst [vmem:[#allocation54_spill] sm:$0xff] %v6113_v38  ;;  %v6120_v30 = vmax.f32 %v9667_v14, %v982_v12  ;;  %v9675_v55 = vld [vmem:[#allocation56_spill] sm:$0xff] }
 0x17b   :  { %4689 = vmatmul.mubr.msk.bf16.gmra.mrb[164].mxu1 %vm368_vm1, %v9669_v48  ;;  %4694 = vmatmul.mubr.msk.bf16.gmra.mrb[164].mxu0 %vm368_vm1, %v9670_v60  ;;  %v9674_v60 = vmax.f32 %v5788_v34, %v9673_v16  ;;  %v4595_v34 = vcombine.high %v117_v39, %v117_v39  ;;  %v4594_v16 = vcombine.low %v117_v39, %v117_v39 }
 0x17c   :  { %9668 = vst [vmem:[#allocation52_spill] sm:$0xff] %v6120_v30  ;;  %1692 = vmatprep.mubr.bf16.mxu0 %v9602_v43  ;;  %1765 = vmatprep.mubr.bf16.mxu1 %v9602_v43 }
 0x17d   :  { %v473_v41 = vsel %vm393_vm0, %v4594_v16, 0  ;;  %v9682_v16 = vmax.f32 %v5840_v17, %v6011_v23  ;;  %v9684_v23 = vmax.f32 %v5858_v58, %v6029_v63  ;;  %v9685_v58 = vmax.f32 %v5873_v42, %v6044_v5 }
 0x17e   :  { %v6128_v9 = vpop.f32.mrb[60].mxu1  ;;  %v986_v3 = vpop.f32.mrb[60].mxu0  ;;  %v9687_v42 = vmax.f32 %v5891_v24, %v6062_v15 }
 0x17f   :  { %9671 = vst [vmem:[#allocation51_spill] sm:$0xff] %v6128_v9  ;;  %v6135_v22 = vmax.f32 %v9672_v45, %v986_v3  ;;  %v6137_v12 = vpop.f32.mrb[61].mxu1  ;;  %v988_v14 = vpop.f32.mrb[61].mxu0  ;;  %v9676_v9 = vld [vmem:[#allocation55_spill] sm:$0xff] }
 0x180   :  { %v6144_v48 = vmax.f32 %v9674_v60, %v988_v14  ;;  %v6146_v30 = vpop.f32.mrb[62].mxu1  ;;  %v990_v38 = vpop.f32.mrb[62].mxu0  ;;  %v4562_v36 = vcombine.low %v9676_v9, %v9675_v55  ;;  %v9678_v14 = vmax.f32 %v5808_v20, %v5977_v56  ;;  %v6166_v55 = vld [vmem:[#allocation2 + $0x78] sm:$0xff] }
 0x181   :  { %v6155_v3 = vmax.f32 %v9677_v1, %v990_v38  ;;  %v6157_v45 = vpop.f32.mrb[63].mxu1  ;;  %v992_v32 = vpop.f32.mrb[63].mxu0  ;;  %9679 = vst [vmem:[#allocation57_spill] sm:$0xff] %v6166_v55  ;;  %v4567_v27 = vcombine.high %v6166_v55, %v6168_v11  ;;  %v9700_v11 = vld [vmem:[#allocation25_spill] sm:$0xff] }
 0x182   :  { %v6164_v9 = vmax.f32 %v9678_v14, %v992_v32 }
 0x183   :  { %4695 = vmatmul.mubr.msk.bf16.gmra.mrb[168].mxu0 %vm368_vm1, %v5324_v59  ;;  %4700 = vmatmul.mubr.msk.bf16.vlgmr.msra.gmra.mrb[168].mxu1 %vm368_vm1, %v5204_v18 }
 0x184   :  { %1960 = vmatpush1.bf16.msra.mxu1 %v4562_v36  ;;  %1702 = vmatprep.mubr.bf16.mxu0 %v9602_v43  ;;  %v9681_v36 = vmax.f32 %v5831_v53, %v5998_v7  ;;  %v9683_v7 = vmax.f32 %v5849_v8, %v6020_v13 }
 0x185   :  { %1775 = vmatprep.mubr.bf16.mxu1 %v9602_v43  ;;  %4717 = vmatprep.subr.msk.bf16.mxu1 %vm393_vm0, %v4595_v34 }
 0x186   :  { %v6180_v20 = vpop.f32.mrb[64].mxu1  ;;  %v996_v56 = vpop.f32.mrb[64].mxu0 }
 0x187   :  { %v6187_v38 = vmax.f32 %v9681_v36, %v996_v56  ;;  %v6189_v39 = vpop.f32.mrb[65].mxu1  ;;  %v998_v1 = vpop.f32.mrb[65].mxu0 }
 0x188   :  { %v6196_v14 = vmax.f32 %v9682_v16, %v998_v1  ;;  %v6198_v60 = vpop.f32.mrb[66].mxu1  ;;  %v1000_v55 = vpop.f32.mrb[66].mxu0  ;;  %1962 = vmatpush1.bf16.msra.mxu1 %v473_v41  ;;  %v9686_v16 = vmax.f32 %v5882_v61, %v6053_v37  ;;  %v9688_v61 = vmax.f32 %v9660_v21, %v6071_v19 }
 0x189   :  { %v6205_v56 = vmax.f32 %v9683_v7, %v1000_v55  ;;  %v6207_v36 = vpop.f32.mrb[67].mxu1  ;;  %v1002_v34 = vpop.f32.mrb[67].mxu0  ;;  %2185 = vmatprep.subr.bf16.mxu1 %v4567_v27 }
 0x18a   :  { %v6214_v1 = vmax.f32 %v9684_v23, %v1002_v34 }
 0x18b   :  { %4696 = vmatmul.mubr.msk.bf16.gmra.mrb[172].mxu0 %vm368_vm1, %v5338_v62  ;;  %4701 = vmatmul.mubr.msk.bf16.gmra.mrb[172].mxu1 %vm368_vm1, %v5252_v40 }
 0x18c   :  { %1712 = vmatprep.mubr.bf16.mxu0 %v9602_v43  ;;  %1785 = vmatprep.mubr.bf16.mxu1 %v9602_v43 }
 0x18e   :  { %v6222_v8 = vpop.f32.mrb[68].mxu1  ;;  %v1006_v13 = vpop.f32.mrb[68].mxu0 }
 0x18f   :  { %v6229_v63 = vmax.f32 %v9685_v58, %v1006_v13  ;;  %v6231_v41 = vpop.f32.mrb[69].mxu1  ;;  %v1008_v27 = vpop.f32.mrb[69].mxu0 }
 0x190   :  { %v6238_v7 = vmax.f32 %v9686_v16, %v1008_v27  ;;  %v6240_v23 = vpop.f32.mrb[70].mxu1  ;;  %v1010_v17 = vpop.f32.mrb[70].mxu0  ;;  %v9689_v27 = vld [vmem:[#allocation16_spill] sm:$0xff]  ;;  %v9690_v16 = vld [vmem:[#allocation27_spill] sm:$0xff] }
 0x191   :  { %v6247_v5 = vmax.f32 %v9687_v42, %v1010_v17  ;;  %v6249_v13 = vpop.f32.mrb[71].mxu1  ;;  %v1012_v58 = vpop.f32.mrb[71].mxu0  ;;  %v9691_v17 = vmax.f32 %v5913_v28, %v6086_v44  ;;  %v9694_v28 = vmax.f32 %v5931_v10, %v6104_v26  ;;  %v9701_v10 = vld [vmem:[#allocation32_spill] sm:$0xff] }
 0x192   :  { %v6256_v37 = vmax.f32 %v9688_v61, %v1012_v58  ;;  %v9692_v61 = vmax.f32 %v5922_v54, %v6095_v52  ;;  %v9696_v54 = vld [vmem:[#allocation54_spill] sm:$0xff] }
 0x193   :  { %4697 = vmatmul.mubr.msk.bf16.gmra.mrb[176].mxu0 %vm368_vm1, %v9689_v27  ;;  %4702 = vmatmul.mubr.msk.bf16.gmra.mrb[176].mxu1 %vm368_vm1, %v9690_v16  ;;  %v9697_v52 = vmax.f32 %v5940_v46, %v9696_v54  ;;  %v9703_v46 = vld [vmem:[#allocation51_spill] sm:$0xff] }
 0x194   :  { %1722 = vmatprep.mubr.bf16.mxu0 %v9602_v43  ;;  %1795 = vmatprep.mubr.bf16.mxu1 %v9602_v43 }
 0x196   :  { %v1016_v24 = vpop.f32.mrb[72].mxu0  ;;  %v6264_v15 = vpop.f32.mrb[72].mxu1 }
 0x197   :  { %v6269_v42 = vmax.f32 %v9691_v17, %v1016_v24  ;;  %v1018_v21 = vpop.f32.mrb[73].mxu0  ;;  %v6273_v58 = vpop.f32.mrb[73].mxu1 }
 0x198   :  { %v6278_v34 = vmax.f32 %v9692_v61, %v1018_v21  ;;  %v1020_v53 = vpop.f32.mrb[74].mxu0  ;;  %v6282_v32 = vpop.f32.mrb[74].mxu1 }
 0x199   :  { %9693 = vst [vmem:[#allocation53_spill] sm:$0xff] %v6282_v32  ;;  %v6287_v44 = vmax.f32 %v9694_v28, %v1020_v53  ;;  %v1022_v17 = vpop.f32.mrb[75].mxu0  ;;  %v6291_v19 = vpop.f32.mrb[75].mxu1  ;;  %v9702_v28 = vld [vmem:[#allocation49_spill] sm:$0xff] }
 0x19a   :  { %9695 = vst [vmem:[#allocation56_spill] sm:$0xff] %v6291_v19  ;;  %v6296_v21 = vmax.f32 %v9697_v52, %v1022_v17  ;;  %v9704_v17 = vmax.f32 %v9702_v28, %v9703_v46 }
 0x19b   :  { %4698 = vmatmul.mubr.msk.bf16.gmra.mrb[180].mxu0 %vm368_vm1, %v9700_v11  ;;  %4703 = vmatmul.mubr.msk.bf16.gmra.mrb[180].mxu1 %vm368_vm1, %v9701_v10  ;;  %v118_v11 = vld [vmem:[#allocation2 + $0x170] sm:$0xff]  ;;  %v9707_v10 = vmax.f32 %v5964_v31, %v6137_v12  ;;  %v9709_v31 = vld [vmem:[#allocation50_spill] sm:$0xff]  ;;  %v9710_v12 = vld [vmem:[#allocation48_spill] sm:$0xff] }
 0x19c   :  { %9698 = vst [vmem:[#allocation55_spill] sm:$0xff] %v6296_v21  ;;  %1805 = vmatprep.mubr.bf16.mxu1 %v9602_v43  ;;  %1878 = vmatprep.mubr.bf16.mxu0 %v9602_v43 }
 0x19e   :  { %v1026_v26 = vpop.f32.mrb[76].mxu0  ;;  %v6306_v53 = vpop.f32.mrb[76].mxu1 }
 0x19f   :  { %v6311_v54 = vmax.f32 %v9704_v17, %v1026_v26  ;;  %v1028_v55 = vpop.f32.mrb[77].mxu0  ;;  %v6315_v24 = vpop.f32.mrb[77].mxu1  ;;  %v9708_v26 = vmax.f32 %v5973_v33, %v6146_v30  ;;  %v4597_v33 = vcombine.high %v118_v11, %v118_v11  ;;  %v4596_v30 = vcombine.low %v118_v11, %v118_v11 }
 0x1a0   :  { %9706 = vst [vmem:[#allocation27_spill] sm:$0xff] %v6315_v24  ;;  %v6320_v19 = vmax.f32 %v9707_v10, %v1028_v55  ;;  %v1030_v21 = vpop.f32.mrb[78].mxu0  ;;  %v6324_v32 = vpop.f32.mrb[78].mxu1  ;;  %v4564_v55 = vcombine.low %v9710_v12, %v9709_v31  ;;  %v9711_v10 = vmax.f32 %v5984_v29, %v6157_v45  ;;  %v9712_v11 = vmax.f32 %v6007_v4, %v6180_v20 }
 0x1a1   :  { %9705 = vst [vmem:[#allocation16_spill] sm:$0xff] %v6311_v54  ;;  %v6329_v28 = vmax.f32 %v9708_v26, %v1030_v21  ;;  %v1032_v17 = vpop.f32.mrb[79].mxu0  ;;  %v6333_v52 = vpop.f32.mrb[79].mxu1  ;;  %v479_v45 = vsel %vm393_vm0, %v4596_v30, 0  ;;  %v9714_v4 = vmax.f32 %v6025_v2, %v6198_v60 }
 0x1a2   :  { %v6340_v61 = vmax.f32 %v9711_v10, %v1032_v17 }
 0x1a3   :  { %4704 = vmatmul.mubr.msk.bf16.gmra.mrb[184].mxu1 %vm368_vm1, %v5324_v59  ;;  %4709 = vmatmul.mubr.msk.bf16.vlgmr.msra.gmra.mrb[184].mxu0 %vm368_vm1, %v5204_v18 }
 0x1a4   :  { %1815 = vmatprep.mubr.bf16.mxu1 %v9602_v43  ;;  %1888 = vmatprep.mubr.bf16.mxu0 %v9602_v43 }
 0x1a5   :  { %2073 = vmatpush1.bf16.msra.mxu0 %v4564_v55  ;;  %v9713_v55 = vmax.f32 %v6016_v6, %v6189_v39  ;;  %v9715_v6 = vmax.f32 %v6034_v51, %v6207_v36  ;;  %v9717_v51 = vmax.f32 %v6049_v49, %v6222_v8  ;;  %v9719_v49 = vmax.f32 %v6067_v35, %v6240_v23 }
 0x1a6   :  { %v1036_v21 = vpop.f32.mrb[80].mxu0  ;;  %v6350_v29 = vpop.f32.mrb[80].mxu1  ;;  %4726 = vmatprep.subr.msk.bf16.mxu0 %vm393_vm0, %v4597_v33 }
 0x1a7   :  { %v6357_v26 = vmax.f32 %v9712_v11, %v1036_v21  ;;  %v1038_v31 = vpop.f32.mrb[81].mxu0  ;;  %v6361_v12 = vpop.f32.mrb[81].mxu1 }
 0x1a8   :  { %v6366_v10 = vmax.f32 %v9713_v55, %v1038_v31  ;;  %v1040_v30 = vpop.f32.mrb[82].mxu0  ;;  %v6370_v24 = vpop.f32.mrb[82].mxu1  ;;  %v9716_v55 = vld [vmem:[#allocation11_spill] sm:$0xff] }
 0x1a9   :  { %v6375_v20 = vmax.f32 %v9714_v4, %v1040_v30  ;;  %v1042_v11 = vpop.f32.mrb[83].mxu0  ;;  %v6379_v17 = vpop.f32.mrb[83].mxu1  ;;  %2075 = vmatpush1.bf16.msra.mxu0 %v479_v45 }
 0x1aa   :  { %v6384_v39 = vmax.f32 %v9715_v6, %v1042_v11  ;;  %2826 = vmatprep.subr.bf16.mxu0 %v9716_v55  ;;  %v9718_v11 = vmax.f32 %v6058_v47, %v6231_v41  ;;  %v9720_v47 = vmax.f32 %v6076_v25, %v6249_v13  ;;  %v9721_v13 = vmax.f32 %v6093_v57, %v6264_v15  ;;  %v9724_v57 = vld [vmem:[#allocation53_spill] sm:$0xff]  ;;  %v9733_v25 = vld [vmem:[#allocation32_spill] sm:$0xff] }
 0x1ab   :  { %4705 = vmatmul.mubr.msk.bf16.gmra.mrb[188].mxu1 %vm368_vm1, %v5338_v62  ;;  %4710 = vmatmul.mubr.msk.bf16.gmra.mrb[188].mxu0 %vm368_vm1, %v5252_v40  ;;  %v9725_v15 = vmax.f32 %v6111_v0, %v9724_v57  ;;  %v119_v57 = vld [vmem:[#allocation2 + $0x178] sm:$0xff] }
 0x1ac   :  { %1825 = vmatprep.mubr.bf16.mxu1 %v9602_v43  ;;  %1898 = vmatprep.mubr.bf16.mxu0 %v9602_v43 }
 0x1ae   :  { %v1046_v2 = vpop.f32.mrb[84].mxu0  ;;  %v6395_v60 = vpop.f32.mrb[84].mxu1 }
 0x1af   :  { %v6400_v36 = vmax.f32 %v9717_v51, %v1046_v2  ;;  %v1048_v30 = vpop.f32.mrb[85].mxu0  ;;  %v6404_v4 = vpop.f32.mrb[85].mxu1 }
 0x1b0   :  { %v6409_v6 = vmax.f32 %v9718_v11, %v1048_v30  ;;  %v1050_v31 = vpop.f32.mrb[86].mxu0  ;;  %v6413_v21 = vpop.f32.mrb[86].mxu1 }
 0x1b1   :  { %v6418_v8 = vmax.f32 %v9719_v49, %v1050_v31  ;;  %v1052_v51 = vpop.f32.mrb[87].mxu0  ;;  %v6422_v45 = vpop.f32.mrb[87].mxu1 }
 0x1b2   :  { %v6427_v41 = vmax.f32 %v9720_v47, %v1052_v51  ;;  %v9722_v47 = vmax.f32 %v6102_v50, %v6273_v58  ;;  %v9728_v50 = vld [vmem:[#allocation52_spill] sm:$0xff] }
 0x1b3   :  { %4706 = vmatmul.mubr.msk.bf16.gmra.mrb[192].mxu1 %vm368_vm1, %v9689_v27  ;;  %4711 = vmatmul.mubr.msk.bf16.gmra.mrb[192].mxu0 %vm368_vm1, %v9690_v16  ;;  %v9729_v58 = vld [vmem:[#allocation56_spill] sm:$0xff] }
 0x1b4   :  { %1835 = vmatprep.mubr.bf16.mxu1 %v9602_v43  ;;  %1908 = vmatprep.mubr.bf16.mxu0 %v9602_v43 }
 0x1b6   :  { %v6437_v35 = vpop.f32.mrb[88].mxu1  ;;  %v1202_v23 = vpop.f32.mrb[88].mxu0 }
 0x1b7   :  { %v6444_v31 = vmax.f32 %v9721_v13, %v1202_v23  ;;  %v6446_v11 = vpop.f32.mrb[89].mxu1  ;;  %v1204_v49 = vpop.f32.mrb[89].mxu0 }
 0x1b8   :  { %v6453_v30 = vmax.f32 %v9722_v47, %v1204_v49  ;;  %v6455_v2 = vpop.f32.mrb[90].mxu1  ;;  %v1206_v55 = vpop.f32.mrb[90].mxu0  ;;  %v9730_v49 = vmax.f32 %v9728_v50, %v9729_v58 }
 0x1b9   :  { %v6462_v23 = vmax.f32 %v9725_v15, %v1206_v55  ;;  %v6464_v13 = vpop.f32.mrb[91].mxu1  ;;  %v1208_v33 = vpop.f32.mrb[91].mxu0  ;;  %v9738_v15 = vld [vmem:[#allocation47_spill] sm:$0xff] }
 0x1ba   :  { %9723 = vst [vmem:[#allocation54_spill] sm:$0xff] %v6453_v30  ;;  %9726 = vst [vmem:[#allocation49_spill] sm:$0xff] %v6464_v13  ;;  %v6471_v47 = vmax.f32 %v9730_v49, %v1208_v33  ;;  %v9732_v30 = vld [vmem:[#allocation25_spill] sm:$0xff]  ;;  %v9735_v33 = vmax.f32 %v6135_v22, %v6306_v53  ;;  %v9740_v53 = vmax.f32 %v6155_v3, %v6324_v32 }
 0x1bb   :  { %4707 = vmatmul.mubr.msk.bf16.gmra.mrb[196].mxu1 %vm368_vm1, %v9732_v30  ;;  %4712 = vmatmul.mubr.msk.bf16.gmra.mrb[196].mxu0 %vm368_vm1, %v9733_v25  ;;  %v9736_v25 = vld [vmem:[#allocation27_spill] sm:$0xff]  ;;  %v9761_v22 = vld [vmem:[#allocation25_spill] sm:$0xff] }
 0x1bc   :  { %9731 = vst [vmem:[#allocation51_spill] sm:$0xff] %v6471_v47  ;;  %1918 = vmatprep.mubr.bf16.mxu0 %v9602_v43  ;;  %1991 = vmatprep.mubr.bf16.mxu1 %v9602_v43  ;;  %v9737_v30 = vmax.f32 %v6144_v48, %v9736_v25  ;;  %v4599_v48 = vcombine.high %v119_v57, %v119_v57 }
 0x1be   :  { %v6479_v0 = vpop.f32.mrb[92].mxu1  ;;  %v1212_v55 = vpop.f32.mrb[92].mxu0 }
 0x1bf   :  { %9734 = vst [vmem:[#allocation50_spill] sm:$0xff] %v6479_v0  ;;  %v6486_v50 = vmax.f32 %v9735_v33, %v1212_v55  ;;  %v6488_v58 = vpop.f32.mrb[93].mxu1  ;;  %v1214_v49 = vpop.f32.mrb[93].mxu0  ;;  %v9739_v0 = vld [vmem:[#allocation57_spill] sm:$0xff] }
 0x1c0   :  { %v6495_v47 = vmax.f32 %v9737_v30, %v1214_v49  ;;  %v6497_v13 = vpop.f32.mrb[94].mxu1  ;;  %v1216_v51 = vpop.f32.mrb[94].mxu0  ;;  %v4566_v54 = vcombine.low %v9739_v0, %v9738_v15  ;;  %v4598_v30 = vcombine.low %v119_v57, %v119_v57  ;;  %v9741_v49 = vmax.f32 %v6164_v9, %v6333_v52  ;;  %v9745_v52 = vld [vmem:[#allocation15_spill] sm:$0xff] }
 0x1c1   :  { %v6506_v55 = vmax.f32 %v9740_v53, %v1216_v51  ;;  %v6508_v33 = vpop.f32.mrb[95].mxu1  ;;  %v1218_v46 = vpop.f32.mrb[95].mxu0  ;;  %v9743_v53 = vmax.f32 %v6196_v14, %v6361_v12  ;;  %v9746_v12 = vmax.f32 %v6214_v1, %v6379_v17  ;;  %v9747_v1 = vmax.f32 %v6229_v63, %v6395_v60 }
 0x1c2   :  { %v6515_v0 = vmax.f32 %v9741_v49, %v1218_v46  ;;  %v485_v3 = vsel %vm393_vm0, %v4598_v30, 0  ;;  %v9742_v46 = vmax.f32 %v6187_v38, %v6350_v29  ;;  %v9744_v29 = vmax.f32 %v6205_v56, %v6370_v24 }
 0x1c3   :  { %4713 = vmatmul.mubr.msk.bf16.gmra.mrb[200].mxu0 %vm368_vm1, %v5324_v59  ;;  %4718 = vmatmul.mubr.msk.bf16.vlgmr.msra.gmra.mrb[200].mxu1 %vm368_vm1, %v5204_v18  ;;  %v9749_v63 = vmax.f32 %v6247_v5, %v6413_v21 }
 0x1c4   :  { %2186 = vmatpush1.bf16.msra.mxu1 %v4566_v54  ;;  %1928 = vmatprep.mubr.bf16.mxu0 %v9602_v43 }
 0x1c5   :  { %2001 = vmatprep.mubr.bf16.mxu1 %v9602_v43  ;;  %4735 = vmatprep.subr.msk.bf16.mxu1 %vm393_vm0, %v4599_v48 }
 0x1c6   :  { %v6525_v32 = vpop.f32.mrb[96].mxu1  ;;  %v1222_v9 = vpop.f32.mrb[96].mxu0 }
 0x1c7   :  { %v6532_v51 = vmax.f32 %v9742_v46, %v1222_v9  ;;  %v6534_v54 = vpop.f32.mrb[97].mxu1  ;;  %v1224_v57 = vpop.f32.mrb[97].mxu0 }
 0x1c8   :  { %v6541_v48 = vmax.f32 %v9743_v53, %v1224_v57  ;;  %v6543_v30 = vpop.f32.mrb[98].mxu1  ;;  %v1226_v49 = vpop.f32.mrb[98].mxu0  ;;  %2188 = vmatpush1.bf16.msra.mxu1 %v485_v3 }
 0x1c9   :  { %v6550_v9 = vmax.f32 %v9744_v29, %v1226_v49  ;;  %v6552_v46 = vpop.f32.mrb[99].mxu1  ;;  %v1228_v15 = vpop.f32.mrb[99].mxu0  ;;  %2939 = vmatprep.subr.bf16.mxu1 %v9745_v52  ;;  %v9748_v49 = vmax.f32 %v6238_v7, %v6404_v4  ;;  %v9750_v7 = vmax.f32 %v6256_v37, %v6422_v45 }
 0x1ca   :  { %v6560_v3 = vmax.f32 %v9746_v12, %v1228_v15 }
 0x1cb   :  { %4714 = vmatmul.mubr.msk.bf16.gmra.mrb[204].mxu0 %vm368_vm1, %v5338_v62  ;;  %4719 = vmatmul.mubr.msk.bf16.gmra.mrb[204].mxu1 %vm368_vm1, %v5252_v40 }
 0x1cc   :  { %1938 = vmatprep.mubr.bf16.mxu0 %v9602_v43  ;;  %2011 = vmatprep.mubr.bf16.mxu1 %v9602_v43 }
 0x1ce   :  { %v6568_v56 = vpop.f32.mrb[100].mxu1  ;;  %v1232_v24 = vpop.f32.mrb[100].mxu0 }
 0x1cf   :  { %v6575_v17 = vmax.f32 %v9747_v1, %v1232_v24  ;;  %v6577_v57 = vpop.f32.mrb[101].mxu1  ;;  %v1234_v15 = vpop.f32.mrb[101].mxu0 }
 0x1d0   :  { %v6584_v29 = vmax.f32 %v9748_v49, %v1234_v15  ;;  %v6586_v12 = vpop.f32.mrb[102].mxu1  ;;  %v1236_v14 = vpop.f32.mrb[102].mxu0 }
 0x1d1   :  { %v6593_v60 = vmax.f32 %v9749_v63, %v1236_v14  ;;  %v6595_v24 = vpop.f32.mrb[103].mxu1  ;;  %v1238_v1 = vpop.f32.mrb[103].mxu0  ;;  %v9751_v14 = vmax.f32 %v6269_v42, %v6437_v35  ;;  %v9752_v63 = vmax.f32 %v6278_v34, %v6446_v11  ;;  %v9754_v42 = vmax.f32 %v6287_v44, %v6455_v2  ;;  %v9756_v34 = vld [vmem:[#allocation55_spill] sm:$0xff]  ;;  %v9757_v11 = vld [vmem:[#allocation49_spill] sm:$0xff]  ;;  %v9762_v44 = vld [vmem:[#allocation32_spill] sm:$0xff] }
 0x1d2   :  { %v6602_v4 = vmax.f32 %v9750_v7, %v1238_v1  ;;  %v9753_v7 = vld [vmem:[#allocation54_spill] sm:$0xff] }
 0x1d3   :  { %4715 = vmatmul.mubr.msk.bf16.gmra.mrb[208].mxu0 %vm368_vm1, %v9689_v27  ;;  %4720 = vmatmul.mubr.msk.bf16.gmra.mrb[208].mxu1 %vm368_vm1, %v9690_v16 }
 0x1d4   :  { %1948 = vmatprep.mubr.bf16.mxu0 %v9602_v43  ;;  %2021 = vmatprep.mubr.bf16.mxu1 %v9602_v43 }
 0x1d6   :  { %v1242_v5 = vpop.f32.mrb[104].mxu0  ;;  %v6610_v21 = vpop.f32.mrb[104].mxu1 }
 0x1d7   :  { %v6615_v15 = vmax.f32 %v9751_v14, %v1242_v5  ;;  %v1244_v45 = vpop.f32.mrb[105].mxu0  ;;  %v6619_v49 = vpop.f32.mrb[105].mxu1 }
 0x1d8   :  { %v6624_v1 = vmax.f32 %v9752_v63, %v1244_v45  ;;  %v1246_v52 = vpop.f32.mrb[106].mxu0  ;;  %v6628_v38 = vpop.f32.mrb[106].mxu1  ;;  %v9758_v45 = vmax.f32 %v9756_v34, %v9757_v11  ;;  %v9764_v34 = vld [vmem:[#allocation50_spill] sm:$0xff] }
 0x1d9   :  { %v6633_v35 = vmax.f32 %v9754_v42, %v1246_v52  ;;  %v1248_v14 = vpop.f32.mrb[107].mxu0  ;;  %v6637_v37 = vpop.f32.mrb[107].mxu1  ;;  %v9763_v42 = vld [vmem:[#allocation16_spill] sm:$0xff] }
 0x1da   :  { %9755 = vst [vmem:[#allocation48_spill] sm:$0xff] %v6637_v37  ;;  %v6642_v63 = vmax.f32 %v9758_v45, %v1248_v14  ;;  %v9765_v14 = vmax.f32 %v9763_v42, %v9764_v34  ;;  %v9776_v34 = vld [vmem:[#allocation18_spill] sm:$0xff] }
 0x1db   :  { %4716 = vmatmul.mubr.msk.bf16.gmra.mrb[212].mxu0 %vm368_vm1, %v9761_v22  ;;  %4721 = vmatmul.mubr.msk.bf16.gmra.mrb[212].mxu1 %vm368_vm1, %v9762_v44  ;;  %v9766_v44 = vmax.f32 %v6320_v19, %v6488_v58  ;;  %v9768_v19 = vmax.f32 %v6340_v61, %v6508_v33  ;;  %v9770_v61 = vld [vmem:[#allocation13_spill] sm:$0xff]  ;;  %v9771_v33 = vmax.f32 %v6357_v26, %v6525_v32 }
 0x1dc   :  { %9759 = vst [vmem:[#allocation11_spill] sm:$0xff] %v6642_v63  ;;  %2031 = vmatprep.mubr.bf16.mxu1 %v9602_v43  ;;  %2104 = vmatprep.mubr.bf16.mxu0 %v9602_v43  ;;  %v9773_v26 = vmax.f32 %v6375_v20, %v6543_v30 }
 0x1de   :  { %v1252_v2 = vpop.f32.mrb[108].mxu0  ;;  %v6652_v52 = vpop.f32.mrb[108].mxu1 }
 0x1df   :  { %v6657_v11 = vmax.f32 %v9765_v14, %v1252_v2  ;;  %v1254_v25 = vpop.f32.mrb[109].mxu0  ;;  %v6661_v5 = vpop.f32.mrb[109].mxu1  ;;  %v9767_v2 = vmax.f32 %v6329_v28, %v6497_v13  ;;  %v9769_v28 = vld [vmem:[#allocation12_spill] sm:$0xff] }
 0x1e0   :  { %v6666_v22 = vmax.f32 %v9766_v44, %v1254_v25  ;;  %v1256_v53 = vpop.f32.mrb[110].mxu0  ;;  %v6670_v63 = vpop.f32.mrb[110].mxu1 }
 0x1e1   :  { %v6675_v42 = vmax.f32 %v9767_v2, %v1256_v53  ;;  %v1258_v14 = vpop.f32.mrb[111].mxu0  ;;  %v6679_v45 = vpop.f32.mrb[111].mxu1 }
 0x1e2   :  { %v6684_v58 = vmax.f32 %v9768_v19, %v1258_v14 }
 0x1e3   :  { %4722 = vmatmul.mubr.msk.bf16.gmra.mrb[216].mxu1 %vm368_vm1, %v5324_v59  ;;  %4727 = vmatmul.mubr.msk.bf16.vlgmr.msra.gmra.mrb[216].mxu0 %vm368_vm1, %v5204_v18 }
 0x1e4   :  { %2041 = vmatprep.mubr.bf16.mxu1 %v9602_v43  ;;  %2114 = vmatprep.mubr.bf16.mxu0 %v9602_v43 }
 0x1e5   :  { %2827 = vmatpush1.bf16.msra.mxu0 %v9769_v28  ;;  %v9772_v28 = vmax.f32 %v6366_v10, %v6534_v54  ;;  %v9774_v10 = vld [vmem:[#allocation14_spill] sm:$0xff]  ;;  %v9775_v54 = vmax.f32 %v6384_v39, %v6552_v46  ;;  %v9777_v39 = vmax.f32 %v6400_v36, %v6568_v56  ;;  %v9779_v36 = vmax.f32 %v6418_v8, %v6586_v12 }
 0x1e6   :  { %v1262_v13 = vpop.f32.mrb[112].mxu0  ;;  %v6695_v53 = vpop.f32.mrb[112].mxu1  ;;  %4744 = vmatprep.subr.msk.bf16.mxu0 %vm393_vm0, %v9770_v61 }
 0x1e7   :  { %v6702_v44 = vmax.f32 %v9771_v33, %v1262_v13  ;;  %v1264_v14 = vpop.f32.mrb[113].mxu0  ;;  %v6706_v19 = vpop.f32.mrb[113].mxu1 }
 0x1e8   :  { %v6711_v25 = vmax.f32 %v9772_v28, %v1264_v14  ;;  %v1266_v61 = vpop.f32.mrb[114].mxu0  ;;  %v6715_v37 = vpop.f32.mrb[114].mxu1 }
 0x1e9   :  { %v6720_v32 = vmax.f32 %v9773_v26, %v1266_v61  ;;  %v1268_v33 = vpop.f32.mrb[115].mxu0  ;;  %v6724_v2 = vpop.f32.mrb[115].mxu1  ;;  %2829 = vmatpush1.bf16.msra.mxu0 %v9774_v10 }
 0x1ea   :  { %v6730_v14 = vmax.f32 %v9775_v54, %v1268_v33  ;;  %3052 = vmatprep.subr.bf16.mxu0 %v9776_v34  ;;  %v9778_v33 = vmax.f32 %v6409_v6, %v6577_v57  ;;  %v9780_v6 = vmax.f32 %v6427_v41, %v6595_v24  ;;  %v9781_v24 = vmax.f32 %v6444_v31, %v6610_v21  ;;  %v9792_v41 = vld [vmem:[#allocation32_spill] sm:$0xff] }
 0x1eb   :  { %4723 = vmatmul.mubr.msk.bf16.gmra.mrb[220].mxu1 %vm368_vm1, %v5338_v62  ;;  %4728 = vmatmul.mubr.msk.bf16.gmra.mrb[220].mxu0 %vm368_vm1, %v5252_v40  ;;  %v9785_v31 = vmax.f32 %v6462_v23, %v6628_v38 }
 0x1ec   :  { %2051 = vmatprep.mubr.bf16.mxu1 %v9602_v43  ;;  %2124 = vmatprep.mubr.bf16.mxu0 %v9602_v43 }
 0x1ee   :  { %v1272_v20 = vpop.f32.mrb[116].mxu0  ;;  %v6741_v30 = vpop.f32.mrb[116].mxu1 }
 0x1ef   :  { %v6746_v46 = vmax.f32 %v9777_v39, %v1272_v20  ;;  %v1274_v61 = vpop.f32.mrb[117].mxu0  ;;  %v6750_v26 = vpop.f32.mrb[117].mxu1 }
 0x1f0   :  { %v6755_v10 = vmax.f32 %v9778_v33, %v1274_v61  ;;  %v1276_v28 = vpop.f32.mrb[118].mxu0  ;;  %v6759_v13 = vpop.f32.mrb[118].mxu1 }
 0x1f1   :  { %v6764_v56 = vmax.f32 %v9779_v36, %v1276_v28  ;;  %v1278_v39 = vpop.f32.mrb[119].mxu0  ;;  %v6768_v34 = vpop.f32.mrb[119].mxu1 }
 0x1f2   :  { %v6773_v57 = vmax.f32 %v9780_v6, %v1278_v39  ;;  %v9783_v6 = vmax.f32 %v9753_v7, %v6619_v49  ;;  %v9786_v39 = vld [vmem:[#allocation11_spill] sm:$0xff]  ;;  %v9788_v7 = vld [vmem:[#allocation48_spill] sm:$0xff] }
 0x1f3   :  { %4724 = vmatmul.mubr.msk.bf16.gmra.mrb[224].mxu1 %vm368_vm1, %v9689_v27  ;;  %4729 = vmatmul.mubr.msk.bf16.gmra.mrb[224].mxu0 %vm368_vm1, %v9690_v16  ;;  %v9787_v49 = vld [vmem:[#allocation51_spill] sm:$0xff] }
 0x1f4   :  { %2061 = vmatprep.mubr.bf16.mxu1 %v9602_v43  ;;  %2134 = vmatprep.mubr.bf16.mxu0 %v9602_v43 }
 0x1f6   :  { %v6783_v8 = vpop.f32.mrb[120].mxu1  ;;  %v1428_v12 = vpop.f32.mrb[120].mxu0 }
 0x1f7   :  { %v6790_v28 = vmax.f32 %v9781_v24, %v1428_v12  ;;  %v6792_v33 = vpop.f32.mrb[121].mxu1  ;;  %v1430_v36 = vpop.f32.mrb[121].mxu0 }
 0x1f8   :  { %9782 = vst [vmem:[#allocation53_spill] sm:$0xff] %v6792_v33  ;;  %v6799_v61 = vmax.f32 %v9783_v6, %v1430_v36  ;;  %v6801_v20 = vpop.f32.mrb[122].mxu1  ;;  %v1432_v54 = vpop.f32.mrb[122].mxu0  ;;  %v9789_v36 = vmax.f32 %v9787_v49, %v9788_v7  ;;  %v9794_v33 = vmax.f32 %v6495_v47, %v6661_v5  ;;  %v9796_v47 = vmax.f32 %v6515_v0, %v6679_v45  ;;  %v9801_v45 = vld [vmem:[#allocation22_spill] sm:$0xff] }
 0x1f9   :  { %v6808_v21 = vmax.f32 %v9785_v31, %v1432_v54  ;;  %v6810_v12 = vpop.f32.mrb[123].mxu1  ;;  %v1434_v24 = vpop.f32.mrb[123].mxu0  ;;  %v9793_v31 = vmax.f32 %v6486_v50, %v6652_v52  ;;  %v9795_v50 = vmax.f32 %v6506_v55, %v6670_v63  ;;  %v9797_v55 = vld [vmem:[#allocation17_spill] sm:$0xff]  ;;  %v9798_v63 = vld [vmem:[#allocation19_spill] sm:$0xff] }
 0x1fa   :  { %9784 = vst [vmem:[#allocation52_spill] sm:$0xff] %v6799_v61  ;;  %v6817_v6 = vmax.f32 %v9789_v36, %v1434_v24  ;;  %v9791_v61 = vld [vmem:[#allocation25_spill] sm:$0xff]  ;;  %v9803_v54 = vld [vmem:[#allocation23_spill] sm:$0xff] }
 0x1fb   :  { %4725 = vmatmul.mubr.msk.bf16.gmra.mrb[228].mxu1 %vm368_vm1, %v9791_v61  ;;  %4730 = vmatmul.mubr.msk.bf16.gmra.mrb[228].mxu0 %vm368_vm1, %v9792_v41 }
 0x1fc   :  { %9790 = vst [vmem:[#allocation56_spill] sm:$0xff] %v6817_v6  ;;  %2144 = vmatprep.mubr.bf16.mxu0 %v9602_v43  ;;  %2217 = vmatprep.mubr.bf16.mxu1 %v9602_v43 }
 0x1fe   :  { %v6825_v23 = vpop.f32.mrb[124].mxu1  ;;  %v1438_v38 = vpop.f32.mrb[124].mxu0 }
 0x1ff   :  { %v6832_v24 = vmax.f32 %v9793_v31, %v1438_v38  ;;  %v6834_v49 = vpop.f32.mrb[125].mxu1  ;;  %v1440_v7 = vpop.f32.mrb[125].mxu0 }
 0x200   :  { %v6841_v41 = vmax.f32 %v9794_v33, %v1440_v7  ;;  %v6843_v61 = vpop.f32.mrb[126].mxu1  ;;  %v1442_v6 = vpop.f32.mrb[126].mxu0 }
 0x201   :  { %v6850_v52 = vmax.f32 %v9795_v50, %v1442_v6  ;;  %v6852_v38 = vpop.f32.mrb[127].mxu1  ;;  %v1444_v31 = vpop.f32.mrb[127].mxu0  ;;  %v9799_v6 = vmax.f32 %v6532_v51, %v6695_v53  ;;  %v9802_v53 = vmax.f32 %v6550_v9, %v6715_v37 }
 0x202   :  { %v6859_v5 = vmax.f32 %v9796_v47, %v1444_v31  ;;  %v9800_v47 = vmax.f32 %v6541_v48, %v6706_v19  ;;  %v9804_v19 = vmax.f32 %v6560_v3, %v6724_v2  ;;  %v9805_v3 = vmax.f32 %v6575_v17, %v6741_v30 }
 0x203   :  { %4731 = vmatmul.mubr.msk.bf16.gmra.mrb[232].mxu0 %vm368_vm1, %v5324_v59  ;;  %4736 = vmatmul.mubr.msk.bf16.vlgmr.msra.gmra.mrb[232].mxu1 %vm368_vm1, %v5204_v18  ;;  %v9807_v17 = vmax.f32 %v6593_v60, %v6759_v13 }
 0x204   :  { %2940 = vmatpush1.bf16.msra.mxu1 %v9797_v55  ;;  %2154 = vmatprep.mubr.bf16.mxu0 %v9602_v43 }
 0x205   :  { %2227 = vmatprep.mubr.bf16.mxu1 %v9602_v43  ;;  %4753 = vmatprep.subr.msk.bf16.mxu1 %vm393_vm0, %v9798_v63 }
 0x206   :  { %v6870_v33 = vpop.f32.mrb[128].mxu1  ;;  %v1448_v0 = vpop.f32.mrb[128].mxu0 }
 0x207   :  { %v6877_v7 = vmax.f32 %v9799_v6, %v1448_v0  ;;  %v6879_v18 = vpop.f32.mrb[129].mxu1  ;;  %v1450_v50 = vpop.f32.mrb[129].mxu0 }
 0x208   :  { %v6886_v55 = vmax.f32 %v9800_v47, %v1450_v50  ;;  %v6888_v63 = vpop.f32.mrb[130].mxu1  ;;  %v1452_v36 = vpop.f32.mrb[130].mxu0  ;;  %2942 = vmatpush1.bf16.msra.mxu1 %v9801_v45 }
 0x209   :  { %v6896_v0 = vmax.f32 %v9802_v53, %v1452_v36  ;;  %v6898_v6 = vpop.f32.mrb[131].mxu1  ;;  %v1454_v31 = vpop.f32.mrb[131].mxu0  ;;  %3165 = vmatprep.subr.bf16.mxu1 %v9803_v54 }
 0x20a   :  { %v6906_v45 = vmax.f32 %v9804_v19, %v1454_v31  ;;  %v9806_v31 = vmax.f32 %v6584_v29, %v6750_v26  ;;  %v9808_v29 = vmax.f32 %v6602_v4, %v6768_v34 }
 0x20b   :  { %4732 = vmatmul.mubr.msk.bf16.gmra.mrb[236].mxu0 %vm368_vm1, %v5338_v62  ;;  %4737 = vmatmul.mubr.msk.bf16.gmra.mrb[236].mxu1 %vm368_vm1, %v5252_v40  ;;  %v9817_v40 = vld [vmem:[#allocation25_spill] sm:$0xff] }
 0x20c   :  { %2164 = vmatprep.mubr.bf16.mxu0 %v9602_v43  ;;  %2237 = vmatprep.mubr.bf16.mxu1 %v9602_v43 }
 0x20e   :  { %v6914_v9 = vpop.f32.mrb[132].mxu1  ;;  %v1458_v37 = vpop.f32.mrb[132].mxu0 }
 0x20f   :  { %v6921_v2 = vmax.f32 %v9805_v3, %v1458_v37  ;;  %v6923_v36 = vpop.f32.mrb[133].mxu1  ;;  %v1460_v50 = vpop.f32.mrb[133].mxu0 }
 0x210   :  { %v6930_v47 = vmax.f32 %v9806_v31, %v1460_v50  ;;  %v6932_v53 = vpop.f32.mrb[134].mxu1  ;;  %v1462_v19 = vpop.f32.mrb[134].mxu0  ;;  %v9809_v50 = vmax.f32 %v6615_v15, %v6783_v8  ;;  %v9813_v15 = vmax.f32 %v6633_v35, %v6801_v20  ;;  %v9818_v35 = vld [vmem:[#allocation32_spill] sm:$0xff] }
 0x211   :  { %v6939_v30 = vmax.f32 %v9807_v17, %v1462_v19  ;;  %v6941_v37 = vpop.f32.mrb[135].mxu1  ;;  %v1464_v3 = vpop.f32.mrb[135].mxu0 }
 0x212   :  { %v6948_v26 = vmax.f32 %v9808_v29, %v1464_v3  ;;  %v9812_v29 = vld [vmem:[#allocation52_spill] sm:$0xff]  ;;  %v6998_v20 = vpop.permute.xlu0 %2786 }
 0x213   :  { %4733 = vmatmul.mubr.msk.bf16.gmra.mrb[240].mxu0 %vm368_vm1, %v9689_v27  ;;  %4738 = vmatmul.mubr.msk.bf16.gmra.mrb[240].mxu1 %vm368_vm1, %v9690_v16  ;;  %v9810_v16 = vld [vmem:[#allocation53_spill] sm:$0xff]  ;;  %9819 = vst [vmem:[#allocation47_spill] sm:$0xff] %v6998_v20 }
 0x214   :  { %2174 = vmatprep.mubr.bf16.mxu0 %v9602_v43  ;;  %2247 = vmatprep.mubr.bf16.mxu1 %v9602_v43  ;;  %v9811_v17 = vmax.f32 %v6624_v1, %v9810_v16  ;;  %v9815_v1 = vmax.f32 %v9786_v39, %v6810_v12  ;;  %v9816_v16 = vld [vmem:[#allocation56_spill] sm:$0xff]  ;;  %v9820_v39 = vmax.f32 %v6657_v11, %v6825_v23 }
 0x215   :  { %v9822_v11 = vmax.f32 %v6675_v42, %v6843_v61  ;;  %v9824_v61 = vld [vmem:[#allocation20_spill] sm:$0xff] }
 0x216   :  { %v1468_v60 = vpop.f32.mrb[136].mxu0  ;;  %v6956_v13 = vpop.f32.mrb[136].mxu1 }
 0x217   :  { %v6961_v31 = vmax.f32 %v9809_v50, %v1468_v60  ;;  %v1470_v34 = vpop.f32.mrb[137].mxu0  ;;  %v6965_v19 = vpop.f32.mrb[137].mxu1 }
 0x218   :  { %v6970_v3 = vmax.f32 %v9811_v17, %v1470_v34  ;;  %v1472_v54 = vpop.f32.mrb[138].mxu0  ;;  %v6974_v48 = vpop.f32.mrb[138].mxu1 }
 0x219   :  { %v6979_v8 = vmax.f32 %v9813_v15, %v1472_v54  ;;  %v1474_v50 = vpop.f32.mrb[139].mxu0  ;;  %v6983_v4 = vpop.f32.mrb[139].mxu1 }
 0x21a   :  { %9814 = vst [vmem:[#allocation27_spill] sm:$0xff] %v6983_v4  ;;  %v6988_v34 = vmax.f32 %v9815_v1, %v1474_v50  ;;  %v7042_v42 = vpop.permute.xlu0 %2788 }
 0x21b   :  { %4734 = vmatmul.mubr.msk.bf16.gmra.mrb[244].mxu0 %vm368_vm1, %v9817_v40  ;;  %4739 = vmatmul.mubr.msk.bf16.gmra.mrb[244].mxu1 %vm368_vm1, %v9818_v35  ;;  %v9821_v35 = vmax.f32 %v6666_v22, %v6834_v49  ;;  %v9823_v22 = vmax.f32 %v6684_v58, %v6852_v38 }
 0x21c   :  { %2257 = vmatprep.mubr.bf16.mxu1 %v9602_v43  ;;  %2858 = vmatprep.mubr.bf16.mxu0 %v9602_v43 }
 0x21e   :  { %v1478_v54 = vpop.f32.mrb[140].mxu0  ;;  %v7000_v15 = vpop.f32.mrb[140].mxu1 }
 0x21f   :  { %v7005_v12 = vmax.f32 %v9820_v39, %v1478_v54  ;;  %v1480_v1 = vpop.f32.mrb[141].mxu0  ;;  %v7009_v17 = vpop.f32.mrb[141].mxu1  ;;  %v9831_v54 = vld [vmem:[#allocation26_spill] sm:$0xff] }
 0x220   :  { %v7014_v60 = vmax.f32 %v9821_v35, %v1480_v1  ;;  %v1482_v40 = vpop.f32.mrb[142].mxu0  ;;  %v7018_v4 = vpop.f32.mrb[142].mxu1 }
 0x221   :  { %v7023_v23 = vmax.f32 %v9822_v11, %v1482_v40  ;;  %v1484_v39 = vpop.f32.mrb[143].mxu0  ;;  %v7027_v50 = vpop.f32.mrb[143].mxu1  ;;  %v9825_v40 = vld [vmem:[#allocation21_spill] sm:$0xff] }
 0x222   :  { %v7032_v49 = vmax.f32 %v9823_v22, %v1484_v39 }
 0x223   :  { %4740 = vmatmul.mubr.msk.bf16.gmra.mrb[248].mxu1 %vm368_vm1, %v5324_v59  ;;  %4745 = vmatmul.mubr.msk.bf16.vlgmr.msra.gmra.mrb[248].mxu0 %vm368_vm1, %v6998_v20  ;;  %v9826_v59 = vmax.f32 %v6702_v44, %v6870_v33  ;;  %v9828_v44 = vmax.f32 %v6720_v32, %v6888_v63  ;;  %v7091_v32 = vpop.permute.xlu1 %2790 }
 0x224   :  { %2267 = vmatprep.mubr.bf16.mxu1 %v9602_v43  ;;  %2868 = vmatprep.mubr.bf16.mxu0 %v9602_v43  ;;  %9832 = vst [vmem:[#allocation57_spill] sm:$0xff] %v7091_v32 }
 0x225   :  { %3053 = vmatpush1.bf16.msra.mxu0 %v9824_v61  ;;  %v9827_v61 = vmax.f32 %v6711_v25, %v6879_v18  ;;  %v9829_v25 = vld [vmem:[#allocation24_spill] sm:$0xff]  ;;  %v9830_v18 = vmax.f32 %v6730_v14, %v6898_v6  ;;  %v9833_v6 = vmax.f32 %v6746_v46, %v6914_v9  ;;  %v9835_v46 = vmax.f32 %v6764_v56, %v6932_v53 }
 0x226   :  { %v1488_v58 = vpop.f32.mrb[144].mxu0  ;;  %v7045_v38 = vpop.f32.mrb[144].mxu1  ;;  %4762 = vmatprep.subr.msk.bf16.mxu0 %vm393_vm0, %v9825_v40 }
 0x227   :  { %v7052_v35 = vmax.f32 %v9826_v59, %v1488_v58  ;;  %v1490_v39 = vpop.f32.mrb[145].mxu0  ;;  %v7056_v22 = vpop.f32.mrb[145].mxu1 }
 0x228   :  { %v7061_v1 = vmax.f32 %v9827_v61, %v1490_v39  ;;  %v1492_v40 = vpop.f32.mrb[146].mxu0  ;;  %v7065_v51 = vpop.f32.mrb[146].mxu1 }
 0x229   :  { %v7070_v33 = vmax.f32 %v9828_v44, %v1492_v40  ;;  %v1494_v59 = vpop.f32.mrb[147].mxu0  ;;  %v7074_v11 = vpop.f32.mrb[147].mxu1  ;;  %3055 = vmatpush1.bf16.msra.mxu0 %v9829_v25 }
 0x22a   :  { %v7080_v39 = vmax.f32 %v9830_v18, %v1494_v59  ;;  %3278 = vmatprep.subr.bf16.mxu0 %v9831_v54  ;;  %v9834_v59 = vmax.f32 %v6755_v10, %v6923_v36  ;;  %v9836_v10 = vmax.f32 %v6773_v57, %v6941_v37  ;;  %v7135_v56 = vpop.permute.xlu1 %2792 }
 0x22b   :  { %4741 = vmatmul.mubr.msk.bf16.gmra.mrb[252].mxu1 %vm368_vm1, %v5338_v62  ;;  %4746 = vmatmul.mubr.msk.bf16.gmra.mrb[252].mxu0 %vm368_vm1, %v7042_v42  ;;  %9837 = vst [vmem:[#allocation15_spill] sm:$0xff] %v7135_v56 }
 0x22c   :  { %2277 = vmatprep.mubr.bf16.mxu1 %v9602_v43  ;;  %2878 = vmatprep.mubr.bf16.mxu0 %v9602_v43 }
 0x22e   :  { %v1498_v14 = vpop.f32.mrb[148].mxu0  ;;  %v7093_v63 = vpop.f32.mrb[148].mxu1 }
 0x22f   :  { %v7098_v40 = vmax.f32 %v9833_v6, %v1498_v14  ;;  %v1500_v54 = vpop.f32.mrb[149].mxu0  ;;  %v7102_v44 = vpop.f32.mrb[149].mxu1 }
 0x230   :  { %v7107_v25 = vmax.f32 %v9834_v59, %v1500_v54  ;;  %v1502_v61 = vpop.f32.mrb[150].mxu0  ;;  %v7111_v58 = vpop.f32.mrb[150].mxu1 }
 0x231   :  { %v7116_v9 = vmax.f32 %v9835_v46, %v1502_v61  ;;  %v1504_v6 = vpop.f32.mrb[151].mxu0  ;;  %v7120_v62 = vpop.f32.mrb[151].mxu1  ;;  %v9838_v61 = vmax.f32 %v6790_v28, %v6956_v13  ;;  %v9840_v28 = vmax.f32 %v6808_v21, %v6974_v48 }
 0x232   :  { %v7125_v36 = vmax.f32 %v9836_v10, %v1504_v6  ;;  %v9839_v10 = vmax.f32 %v9812_v29, %v6965_v19  ;;  %v9841_v19 = vld [vmem:[#allocation27_spill] sm:$0xff]  ;;  %v7179_v21 = vpop.permute.xlu0 %2794  ;;  %v9847_v6 = vmax.f32 %v6841_v41, %v7009_v17  ;;  %v9849_v41 = vmax.f32 %v6859_v5, %v7027_v50 }
 0x233   :  { %4742 = vmatmul.mubr.msk.bf16.gmra.mrb[0].mxu1 %vm368_vm1, %v9689_v27  ;;  %4747 = vmatmul.mubr.msk.bf16.gmra.mrb[0].mxu0 %vm368_vm1, %v7091_v32  ;;  %v9842_v29 = vmax.f32 %v9816_v16, %v9841_v19  ;;  %9845 = vst [vmem:[#allocation55_spill] sm:$0xff] %v7179_v21 }
 0x234   :  { %2287 = vmatprep.mubr.bf16.mxu1 %v9602_v43  ;;  %2888 = vmatprep.mubr.bf16.mxu0 %v9602_v43 }
 0x236   :  { %v7137_v53 = vpop.f32.mrb[152].mxu1  ;;  %v1654_v57 = vpop.f32.mrb[152].mxu0 }
 0x237   :  { %v7144_v59 = vmax.f32 %v9838_v61, %v1654_v57  ;;  %v7146_v27 = vpop.f32.mrb[153].mxu1  ;;  %v1656_v46 = vpop.f32.mrb[153].mxu0 }
 0x238   :  { %v7153_v54 = vmax.f32 %v9839_v10, %v1656_v46  ;;  %v7155_v14 = vpop.f32.mrb[154].mxu1  ;;  %v1658_v18 = vpop.f32.mrb[154].mxu0  ;;  %v9844_v10 = vld [vmem:[#allocation25_spill] sm:$0xff] }
 0x239   :  { %v7162_v13 = vmax.f32 %v9840_v28, %v1658_v18  ;;  %v7164_v57 = vpop.f32.mrb[155].mxu1  ;;  %v1660_v61 = vpop.f32.mrb[155].mxu0  ;;  %v9846_v28 = vmax.f32 %v6832_v24, %v7000_v15  ;;  %v9848_v24 = vmax.f32 %v6850_v52, %v7018_v4  ;;  %v9850_v52 = vld [vmem:[#allocation28_spill] sm:$0xff] }
 0x23a   :  { %v7171_v46 = vmax.f32 %v9842_v29, %v1660_v61  ;;  %v7223_v4 = vpop.permute.xlu1 %2796 }
 0x23b   :  { %4743 = vmatmul.mubr.msk.bf16.gmra.mrb[4].mxu1 %vm368_vm1, %v9844_v10  ;;  %4748 = vmatmul.mubr.msk.bf16.gmra.mrb[4].mxu0 %vm368_vm1, %v7135_v56 }
 0x23c   :  { %9843 = vst [vmem:[#allocation54_spill] sm:$0xff] %v7171_v46  ;;  %2898 = vmatprep.mubr.bf16.mxu0 %v9602_v43  ;;  %2971 = vmatprep.mubr.bf16.mxu1 %v9602_v43 }
 0x23e   :  { %v7181_v48 = vpop.f32.mrb[156].mxu1  ;;  %v1664_v18 = vpop.f32.mrb[156].mxu0 }
 0x23f   :  { %v7188_v61 = vmax.f32 %v9846_v28, %v1664_v18  ;;  %v7190_v19 = vpop.f32.mrb[157].mxu1  ;;  %v1666_v29 = vpop.f32.mrb[157].mxu0 }
 0x240   :  { %v7197_v37 = vmax.f32 %v9847_v6, %v1666_v29  ;;  %v7199_v56 = vpop.f32.mrb[158].mxu1  ;;  %v1668_v46 = vpop.f32.mrb[158].mxu0  ;;  %v9851_v6 = vld [vmem:[#allocation29_spill] sm:$0xff]  ;;  %v9852_v29 = vmax.f32 %v6877_v7, %v7045_v38  ;;  %v9856_v38 = vmax.f32 %v6896_v0, %v7065_v51 }
 0x241   :  { %v7206_v15 = vmax.f32 %v9848_v24, %v1668_v46  ;;  %v7208_v18 = vpop.f32.mrb[159].mxu1  ;;  %v1670_v28 = vpop.f32.mrb[159].mxu0  ;;  %v9855_v46 = vld [vmem:[#allocation30_spill] sm:$0xff] }
 0x242   :  { %v7215_v17 = vmax.f32 %v9849_v41, %v1670_v28  ;;  %v7272_v51 = vpop.permute.xlu0 %2798 }
 0x243   :  { %4749 = vmatmul.mubr.msk.bf16.gmra.mrb[8].mxu0 %vm368_vm1, %v7179_v21  ;;  %4754 = vmatmul.mubr.msk.bf16.vlgmr.msra.gmra.mrb[8].mxu1 %vm368_vm1, %v6998_v20 }
 0x244   :  { %3166 = vmatpush1.bf16.msra.mxu1 %v9850_v52  ;;  %2908 = vmatprep.mubr.bf16.mxu0 %v9602_v43 }
 0x245   :  { %2981 = vmatprep.mubr.bf16.mxu1 %v9602_v43  ;;  %4771 = vmatprep.subr.msk.bf16.mxu1 %vm393_vm0, %v9851_v6  ;;  %v9854_v6 = vmax.f32 %v6886_v55, %v7056_v22  ;;  %v9858_v22 = vmax.f32 %v6906_v45, %v7074_v11  ;;  %v9859_v11 = vmax.f32 %v6921_v2, %v7093_v63 }
 0x246   :  { %v7228_v5 = vpop.f32.mrb[160].mxu1  ;;  %v1674_v50 = vpop.f32.mrb[160].mxu0  ;;  %v9861_v2 = vmax.f32 %v6939_v30, %v7111_v58 }
 0x247   :  { %v7235_v24 = vmax.f32 %v9852_v29, %v1674_v50  ;;  %v7237_v28 = vpop.f32.mrb[161].mxu1  ;;  %v1676_v41 = vpop.f32.mrb[161].mxu0 }
 0x248   :  { %9853 = vst [vmem:[#allocation49_spill] sm:$0xff] %v7237_v28  ;;  %v7244_v10 = vmax.f32 %v9854_v6, %v1676_v41  ;;  %v7246_v16 = vpop.f32.mrb[162].mxu1  ;;  %v1678_v20 = vpop.f32.mrb[162].mxu0  ;;  %3168 = vmatpush1.bf16.msra.mxu1 %v9855_v46  ;;  %v9857_v28 = vld [vmem:[#allocation31_spill] sm:$0xff] }
 0x249   :  { %v7254_v50 = vmax.f32 %v9856_v38, %v1678_v20  ;;  %v7256_v29 = vpop.f32.mrb[163].mxu1  ;;  %v1680_v52 = vpop.f32.mrb[163].mxu0  ;;  %3391 = vmatprep.subr.bf16.mxu1 %v9857_v28  ;;  %v9860_v38 = vmax.f32 %v6930_v47, %v7102_v44  ;;  %v9862_v47 = vmax.f32 %v6948_v26, %v7120_v62  ;;  %v9864_v26 = vmax.f32 %v6961_v31, %v7137_v53 }
 0x24a   :  { %v7264_v46 = vmax.f32 %v9858_v22, %v1680_v52  ;;  %v7316_v30 = vpop.permute.xlu1 %2800  ;;  %v9866_v31 = vmax.f32 %v6979_v8, %v7155_v14  ;;  %v9869_v8 = vld [vmem:[#allocation15_spill] sm:$0xff] }
 0x24b   :  { %4750 = vmatmul.mubr.msk.bf16.gmra.mrb[12].mxu0 %vm368_vm1, %v7223_v4  ;;  %4755 = vmatmul.mubr.msk.bf16.gmra.mrb[12].mxu1 %vm368_vm1, %v7042_v42  ;;  %9863 = vst [vmem:[#allocation16_spill] sm:$0xff] %v7316_v30 }
 0x24c   :  { %2918 = vmatprep.mubr.bf16.mxu0 %v9602_v43  ;;  %2991 = vmatprep.mubr.bf16.mxu1 %v9602_v43 }
 0x24e   :  { %v7274_v0 = vpop.f32.mrb[164].mxu1  ;;  %v1684_v20 = vpop.f32.mrb[164].mxu0 }
 0x24f   :  { %v7281_v28 = vmax.f32 %v9859_v11, %v1684_v20  ;;  %v7283_v41 = vpop.f32.mrb[165].mxu1  ;;  %v1686_v52 = vpop.f32.mrb[165].mxu0 }
 0x250   :  { %v7290_v22 = vmax.f32 %v9860_v38, %v1686_v52  ;;  %v7292_v55 = vpop.f32.mrb[166].mxu1  ;;  %v1688_v7 = vpop.f32.mrb[166].mxu0 }
 0x251   :  { %v7299_v63 = vmax.f32 %v9861_v2, %v1688_v7  ;;  %v7301_v20 = vpop.f32.mrb[167].mxu1  ;;  %v1690_v11 = vpop.f32.mrb[167].mxu0 }
 0x252   :  { %v7308_v44 = vmax.f32 %v9862_v47, %v1690_v11  ;;  %v9865_v11 = vmax.f32 %v6970_v3, %v7146_v27  ;;  %v9867_v3 = vmax.f32 %v6988_v34, %v7164_v57  ;;  %v9870_v34 = vmax.f32 %v7005_v12, %v7181_v48 }
 0x253   :  { %4751 = vmatmul.mubr.msk.bf16.gmra.mrb[16].mxu0 %vm368_vm1, %v7272_v51  ;;  %4756 = vmatmul.mubr.msk.bf16.gmra.mrb[16].mxu1 %vm368_vm1, %v7091_v32  ;;  %v9872_v12 = vmax.f32 %v7023_v23, %v7199_v56  ;;  %v9874_v23 = vld [vmem:[#allocation47_spill] sm:$0xff]  ;;  %v9875_v56 = vld [vmem:[#allocation33_spill] sm:$0xff] }
 0x254   :  { %2928 = vmatprep.mubr.bf16.mxu0 %v9602_v43  ;;  %3001 = vmatprep.mubr.bf16.mxu1 %v9602_v43 }
 0x256   :  { %v1694_v58 = vpop.f32.mrb[168].mxu0  ;;  %v7318_v7 = vpop.f32.mrb[168].mxu1 }
 0x257   :  { %v7323_v62 = vmax.f32 %v9864_v26, %v1694_v58  ;;  %v1696_v38 = vpop.f32.mrb[169].mxu0  ;;  %v7327_v2 = vpop.f32.mrb[169].mxu1 }
 0x258   :  { %v7332_v47 = vmax.f32 %v9865_v11, %v1696_v38  ;;  %v1698_v45 = vpop.f32.mrb[170].mxu0  ;;  %v7336_v32 = vpop.f32.mrb[170].mxu1  ;;  %v9868_v38 = vld [vmem:[#allocation54_spill] sm:$0xff]  ;;  %v9871_v11 = vmax.f32 %v7014_v60, %v7190_v19  ;;  %v9873_v60 = vmax.f32 %v7032_v49, %v7208_v18  ;;  %v9877_v18 = vmax.f32 %v7052_v35, %v7228_v5 }
 0x259   :  { %v7341_v53 = vmax.f32 %v9866_v31, %v1698_v45  ;;  %v1700_v26 = vpop.f32.mrb[171].mxu0  ;;  %v7345_v52 = vpop.f32.mrb[171].mxu1  ;;  %v9876_v49 = vld [vmem:[#allocation34_spill] sm:$0xff]  ;;  %v9880_v35 = vmax.f32 %v7070_v33, %v7246_v16 }
 0x25a   :  { %v7350_v27 = vmax.f32 %v9867_v3, %v1700_v26 }
 0x25b   :  { %4752 = vmatmul.mubr.msk.bf16.gmra.mrb[20].mxu0 %vm368_vm1, %v7316_v30  ;;  %4757 = vmatmul.mubr.msk.bf16.gmra.mrb[20].mxu1 %vm368_vm1, %v9869_v8 }
 0x25c   :  { %3011 = vmatprep.mubr.bf16.mxu1 %v9602_v43  ;;  %3084 = vmatprep.mubr.bf16.mxu0 %v9602_v43 }
 0x25e   :  { %v1704_v14 = vpop.f32.mrb[172].mxu0  ;;  %v7360_v45 = vpop.f32.mrb[172].mxu1 }
 0x25f   :  { %v7365_v57 = vmax.f32 %v9870_v34, %v1704_v14  ;;  %v1706_v26 = vpop.f32.mrb[173].mxu0  ;;  %v7369_v3 = vpop.f32.mrb[173].mxu1  ;;  %v9878_v14 = vld [vmem:[#allocation49_spill] sm:$0xff] }
 0x260   :  { %v7374_v58 = vmax.f32 %v9871_v11, %v1706_v26  ;;  %v1708_v8 = vpop.f32.mrb[174].mxu0  ;;  %v7378_v30 = vpop.f32.mrb[174].mxu1 }
 0x261   :  { %v7383_v48 = vmax.f32 %v9872_v12, %v1708_v8  ;;  %v1710_v34 = vpop.f32.mrb[175].mxu0  ;;  %v7387_v31 = vpop.f32.mrb[175].mxu1 }
 0x262   :  { %v7392_v19 = vmax.f32 %v9873_v60, %v1710_v34 }
 0x263   :  { %4758 = vmatmul.mubr.msk.bf16.gmra.mrb[24].mxu1 %vm368_vm1, %v7179_v21  ;;  %4763 = vmatmul.mubr.msk.bf16.vlgmr.msra.gmra.mrb[24].mxu0 %vm368_vm1, %v9874_v23  ;;  %v9883_v23 = vld [vmem:[#allocation36_spill] sm:$0xff] }
 0x264   :  { %3021 = vmatprep.mubr.bf16.mxu1 %v9602_v43  ;;  %3094 = vmatprep.mubr.bf16.mxu0 %v9602_v43 }
 0x265   :  { %3279 = vmatpush1.bf16.msra.mxu0 %v9875_v56  ;;  %v9879_v56 = vmax.f32 %v7061_v1, %v9878_v14  ;;  %v9881_v1 = vld [vmem:[#allocation35_spill] sm:$0xff]  ;;  %v9882_v14 = vmax.f32 %v7080_v39, %v7256_v29  ;;  %v9884_v39 = vmax.f32 %v7098_v40, %v7274_v0  ;;  %v9886_v40 = vmax.f32 %v7116_v9, %v7292_v55  ;;  %v9888_v9 = vld [vmem:[#allocation57_spill] sm:$0xff] }
 0x266   :  { %v1714_v8 = vpop.f32.mrb[176].mxu0  ;;  %v7403_v26 = vpop.f32.mrb[176].mxu1  ;;  %4780 = vmatprep.subr.msk.bf16.mxu0 %vm393_vm0, %v9876_v49 }
 0x267   :  { %v7410_v12 = vmax.f32 %v9877_v18, %v1714_v8  ;;  %v1716_v60 = vpop.f32.mrb[177].mxu0  ;;  %v7414_v11 = vpop.f32.mrb[177].mxu1 }
 0x268   :  { %v7419_v6 = vmax.f32 %v9879_v56, %v1716_v60  ;;  %v1718_v49 = vpop.f32.mrb[178].mxu0  ;;  %v7423_v21 = vpop.f32.mrb[178].mxu1 }
 0x269   :  { %v7428_v5 = vmax.f32 %v9880_v35, %v1718_v49  ;;  %v1720_v18 = vpop.f32.mrb[179].mxu0  ;;  %v7432_v34 = vpop.f32.mrb[179].mxu1  ;;  %3281 = vmatpush1.bf16.msra.mxu0 %v9881_v1 }
 0x26a   :  { %v7438_v60 = vmax.f32 %v9882_v14, %v1720_v18  ;;  %3504 = vmatprep.subr.bf16.mxu0 %v9883_v23  ;;  %v9885_v18 = vmax.f32 %v7107_v25, %v7283_v41  ;;  %v9887_v25 = vmax.f32 %v7125_v36, %v7301_v20  ;;  %v9889_v20 = vmax.f32 %v7144_v59, %v7318_v7 }
 0x26b   :  { %4759 = vmatmul.mubr.msk.bf16.gmra.mrb[28].mxu1 %vm368_vm1, %v7223_v4  ;;  %4764 = vmatmul.mubr.msk.bf16.gmra.mrb[28].mxu0 %vm368_vm1, %v7042_v42  ;;  %v9891_v59 = vmax.f32 %v7162_v13, %v7336_v32 }
 0x26c   :  { %3031 = vmatprep.mubr.bf16.mxu1 %v9602_v43  ;;  %3104 = vmatprep.mubr.bf16.mxu0 %v9602_v43 }
 0x26e   :  { %v1724_v33 = vpop.f32.mrb[180].mxu0  ;;  %v7449_v16 = vpop.f32.mrb[180].mxu1 }
 0x26f   :  { %v7454_v29 = vmax.f32 %v9884_v39, %v1724_v33  ;;  %v1726_v49 = vpop.f32.mrb[181].mxu0  ;;  %v7458_v35 = vpop.f32.mrb[181].mxu1 }
 0x270   :  { %v7463_v1 = vmax.f32 %v9885_v18, %v1726_v49  ;;  %v1728_v56 = vpop.f32.mrb[182].mxu0  ;;  %v7467_v8 = vpop.f32.mrb[182].mxu1  ;;  %v9890_v49 = vmax.f32 %v7153_v54, %v7327_v2  ;;  %v9892_v54 = vmax.f32 %v9868_v38, %v7345_v52  ;;  %v9895_v52 = vmax.f32 %v7188_v61, %v7360_v45 }
 0x271   :  { %v7472_v0 = vmax.f32 %v9886_v40, %v1728_v56  ;;  %v1730_v39 = vpop.f32.mrb[183].mxu0  ;;  %v7476_v23 = vpop.f32.mrb[183].mxu1  ;;  %v9897_v61 = vmax.f32 %v7206_v15, %v7378_v30  ;;  %v9901_v15 = vld [vmem:[#allocation37_spill] sm:$0xff]  ;;  %v9902_v30 = vld [vmem:[#allocation38_spill] sm:$0xff] }
 0x272   :  { %v7481_v41 = vmax.f32 %v9887_v25, %v1730_v39  ;;  %v9896_v25 = vmax.f32 %v7197_v37, %v7369_v3  ;;  %v9898_v37 = vmax.f32 %v7215_v17, %v7387_v31  ;;  %v9906_v31 = vld [vmem:[#allocation39_spill] sm:$0xff] }
 0x273   :  { %4760 = vmatmul.mubr.msk.bf16.gmra.mrb[32].mxu1 %vm368_vm1, %v7272_v51  ;;  %4765 = vmatmul.mubr.msk.bf16.gmra.mrb[32].mxu0 %vm368_vm1, %v9888_v9 }
 0x274   :  { %3041 = vmatprep.mubr.bf16.mxu1 %v9602_v43  ;;  %3114 = vmatprep.mubr.bf16.mxu0 %v9602_v43 }
 0x276   :  { %v7491_v55 = vpop.f32.mrb[184].mxu1  ;;  %v1880_v56 = vpop.f32.mrb[184].mxu0 }
 0x277   :  { %v7498_v18 = vmax.f32 %v9889_v20, %v1880_v56  ;;  %v7500_v40 = vpop.f32.mrb[185].mxu1  ;;  %v1882_v39 = vpop.f32.mrb[185].mxu0 }
 0x278   :  { %v7507_v33 = vmax.f32 %v9890_v49, %v1882_v39  ;;  %v7509_v14 = vpop.f32.mrb[186].mxu1  ;;  %v1884_v9 = vpop.f32.mrb[186].mxu0  ;;  %v9893_v49 = vld [vmem:[#allocation16_spill] sm:$0xff]  ;;  %v9894_v39 = vld [vmem:[#allocation15_spill] sm:$0xff] }
 0x279   :  { %v7516_v7 = vmax.f32 %v9891_v59, %v1884_v9  ;;  %v7518_v56 = vpop.f32.mrb[187].mxu1  ;;  %v1886_v20 = vpop.f32.mrb[187].mxu0 }
 0x27a   :  { %v7525_v2 = vmax.f32 %v9892_v54, %v1886_v20 }
 0x27b   :  { %4761 = vmatmul.mubr.msk.bf16.gmra.mrb[36].mxu1 %vm368_vm1, %v9893_v49  ;;  %4766 = vmatmul.mubr.msk.bf16.gmra.mrb[36].mxu0 %vm368_vm1, %v9894_v39 }
 0x27c   :  { %3124 = vmatprep.mubr.bf16.mxu0 %v9602_v43  ;;  %3197 = vmatprep.mubr.bf16.mxu1 %v9602_v43 }
 0x27e   :  { %v7533_v32 = vpop.f32.mrb[188].mxu1  ;;  %v1890_v13 = vpop.f32.mrb[188].mxu0 }
 0x27f   :  { %v7540_v38 = vmax.f32 %v9895_v52, %v1890_v13  ;;  %v7542_v59 = vpop.f32.mrb[189].mxu1  ;;  %v1892_v20 = vpop.f32.mrb[189].mxu0 }
 0x280   :  { %v7549_v36 = vmax.f32 %v9896_v25, %v1892_v20  ;;  %v7551_v39 = vpop.f32.mrb[190].mxu1  ;;  %v1894_v49 = vpop.f32.mrb[190].mxu0  ;;  %v9899_v25 = vld [vmem:[#allocation55_spill] sm:$0xff] }
 0x281   :  { %v7558_v45 = vmax.f32 %v9897_v61, %v1894_v49  ;;  %v7560_v13 = vpop.f32.mrb[191].mxu1  ;;  %v1896_v52 = vpop.f32.mrb[191].mxu0  ;;  %v9900_v20 = vld [vmem:[#allocation47_spill] sm:$0xff]  ;;  %v9903_v61 = vmax.f32 %v7235_v24, %v7403_v26  ;;  %v9907_v26 = vmax.f32 %v7254_v50, %v7423_v21 }
 0x282   :  { %v7567_v3 = vmax.f32 %v9898_v37, %v1896_v52 }
 0x283   :  { %4767 = vmatmul.mubr.msk.bf16.gmra.mrb[40].mxu0 %vm368_vm1, %v9899_v25  ;;  %4772 = vmatmul.mubr.msk.bf16.vlgmr.msra.gmra.mrb[40].mxu1 %vm368_vm1, %v9900_v20 }
 0x284   :  { %3392 = vmatpush1.bf16.msra.mxu1 %v9901_v15  ;;  %3134 = vmatprep.mubr.bf16.mxu0 %v9602_v43 }
 0x285   :  { %3207 = vmatprep.mubr.bf16.mxu1 %v9602_v43  ;;  %4789 = vmatprep.subr.msk.bf16.mxu1 %vm393_vm0, %v9902_v30  ;;  %v9905_v30 = vmax.f32 %v7244_v10, %v7414_v11  ;;  %v9909_v11 = vmax.f32 %v7264_v46, %v7432_v34  ;;  %v9910_v46 = vmax.f32 %v7281_v28, %v7449_v16 }
 0x286   :  { %v7578_v49 = vpop.f32.mrb[192].mxu1  ;;  %v1900_v17 = vpop.f32.mrb[192].mxu0  ;;  %v9912_v28 = vmax.f32 %v7299_v63, %v7467_v8 }
 0x287   :  { %v7585_v52 = vmax.f32 %v9903_v61, %v1900_v17  ;;  %v7587_v37 = vpop.f32.mrb[193].mxu1  ;;  %v1902_v15 = vpop.f32.mrb[193].mxu0 }
 0x288   :  { %9904 = vst [vmem:[#allocation50_spill] sm:$0xff] %v7587_v37  ;;  %v7594_v9 = vmax.f32 %v9905_v30, %v1902_v15  ;;  %v7596_v20 = vpop.f32.mrb[194].mxu1  ;;  %v1904_v25 = vpop.f32.mrb[194].mxu0  ;;  %3394 = vmatpush1.bf16.msra.mxu1 %v9906_v31  ;;  %v9908_v37 = vld [vmem:[#allocation40_spill] sm:$0xff]  ;;  %v9911_v30 = vmax.f32 %v7290_v22, %v7458_v35  ;;  %v9913_v22 = vmax.f32 %v7308_v44, %v7476_v23 }
 0x289   :  { %v7604_v17 = vmax.f32 %v9907_v26, %v1904_v25  ;;  %v7606_v61 = vpop.f32.mrb[195].mxu1  ;;  %v1906_v54 = vpop.f32.mrb[195].mxu0  ;;  %3617 = vmatprep.subr.bf16.mxu1 %v9908_v37 }
 0x28a   :  { %v7614_v31 = vmax.f32 %v9909_v11, %v1906_v54 }
 0x28b   :  { %4768 = vmatmul.mubr.msk.bf16.gmra.mrb[44].mxu0 %vm368_vm1, %v7223_v4  ;;  %4773 = vmatmul.mubr.msk.bf16.gmra.mrb[44].mxu1 %vm368_vm1, %v7042_v42 }
 0x28c   :  { %3144 = vmatprep.mubr.bf16.mxu0 %v9602_v43  ;;  %3217 = vmatprep.mubr.bf16.mxu1 %v9602_v43 }
 0x28e   :  { %v7622_v21 = vpop.f32.mrb[196].mxu1  ;;  %v1910_v50 = vpop.f32.mrb[196].mxu0 }
 0x28f   :  { %v7629_v34 = vmax.f32 %v9910_v46, %v1910_v50  ;;  %v7631_v54 = vpop.f32.mrb[197].mxu1  ;;  %v1912_v37 = vpop.f32.mrb[197].mxu0  ;;  %v9931_v15 = vld [vmem:[#allocation50_spill] sm:$0xff] }
 0x290   :  { %v7638_v26 = vmax.f32 %v9911_v30, %v1912_v37  ;;  %v7640_v11 = vpop.f32.mrb[198].mxu1  ;;  %v1914_v10 = vpop.f32.mrb[198].mxu0  ;;  %v9914_v37 = vld [vmem:[#allocation57_spill] sm:$0xff] }
 0x291   :  { %v7647_v16 = vmax.f32 %v9912_v28, %v1914_v10  ;;  %v7649_v50 = vpop.f32.mrb[199].mxu1  ;;  %v1916_v46 = vpop.f32.mrb[199].mxu0  ;;  %v9915_v10 = vmax.f32 %v7323_v62, %v7491_v55  ;;  %v9917_v62 = vmax.f32 %v7341_v53, %v7509_v14  ;;  %v9920_v53 = vld [vmem:[#allocation15_spill] sm:$0xff] }
 0x292   :  { %v7656_v35 = vmax.f32 %v9913_v22, %v1916_v46  ;;  %v9916_v46 = vmax.f32 %v7332_v47, %v7500_v40  ;;  %v9918_v47 = vmax.f32 %v7350_v27, %v7518_v56  ;;  %v9921_v27 = vmax.f32 %v7365_v57, %v7533_v32 }
 0x293   :  { %4769 = vmatmul.mubr.msk.bf16.gmra.mrb[48].mxu0 %vm368_vm1, %v7272_v51  ;;  %4774 = vmatmul.mubr.msk.bf16.gmra.mrb[48].mxu1 %vm368_vm1, %v9914_v37  ;;  %v9923_v57 = vmax.f32 %v7383_v48, %v7551_v39  ;;  %v9927_v48 = vld [vmem:[#allocation47_spill] sm:$0xff]  ;;  %v9928_v39 = vld [vmem:[#allocation41_spill] sm:$0xff] }
 0x294   :  { %3154 = vmatprep.mubr.bf16.mxu0 %v9602_v43  ;;  %3227 = vmatprep.mubr.bf16.mxu1 %v9602_v43 }
 0x296   :  { %v1920_v63 = vpop.f32.mrb[200].mxu0  ;;  %v7664_v8 = vpop.f32.mrb[200].mxu1 }
 0x297   :  { %v7669_v30 = vmax.f32 %v9915_v10, %v1920_v63  ;;  %v1922_v23 = vpop.f32.mrb[201].mxu0  ;;  %v7673_v28 = vpop.f32.mrb[201].mxu1 }
 0x298   :  { %v7678_v22 = vmax.f32 %v9916_v46, %v1922_v23  ;;  %v1924_v25 = vpop.f32.mrb[202].mxu0  ;;  %v7682_v24 = vpop.f32.mrb[202].mxu1  ;;  %v9919_v46 = vld [vmem:[#allocation16_spill] sm:$0xff]  ;;  %v9922_v23 = vmax.f32 %v7374_v58, %v7542_v59  ;;  %v9925_v58 = vmax.f32 %v7392_v19, %v7560_v13  ;;  %v9929_v19 = vld [vmem:[#allocation42_spill] sm:$0xff]  ;;  %v9930_v13 = vmax.f32 %v7410_v12, %v7578_v49 }
 0x299   :  { %v7687_v55 = vmax.f32 %v9917_v62, %v1924_v25  ;;  %v1926_v10 = vpop.f32.mrb[203].mxu0  ;;  %v7691_v44 = vpop.f32.mrb[203].mxu1  ;;  %v9933_v12 = vmax.f32 %v7428_v5, %v7596_v20 }
 0x29a   :  { %v7696_v40 = vmax.f32 %v9918_v47, %v1926_v10 }
 0x29b   :  { %4770 = vmatmul.mubr.msk.bf16.gmra.mrb[52].mxu0 %vm368_vm1, %v9919_v46  ;;  %4775 = vmatmul.mubr.msk.bf16.gmra.mrb[52].mxu1 %vm368_vm1, %v9920_v53 }
 0x29c   :  { %3237 = vmatprep.mubr.bf16.mxu1 %v9602_v43  ;;  %3310 = vmatprep.mubr.bf16.mxu0 %v9602_v43 }
 0x29e   :  { %v1930_v14 = vpop.f32.mrb[204].mxu0  ;;  %v7706_v25 = vpop.f32.mrb[204].mxu1 }
 0x29f   :  { %v7711_v56 = vmax.f32 %v9921_v27, %v1930_v14  ;;  %v1932_v10 = vpop.f32.mrb[205].mxu0  ;;  %v7715_v47 = vpop.f32.mrb[205].mxu1 }
 0x2a0   :  { %v7720_v63 = vmax.f32 %v9922_v23, %v1932_v10  ;;  %v1934_v53 = vpop.f32.mrb[206].mxu0  ;;  %v7724_v46 = vpop.f32.mrb[206].mxu1  ;;  %v9926_v10 = vld [vmem:[#allocation55_spill] sm:$0xff] }
 0x2a1   :  { %v7729_v32 = vmax.f32 %v9923_v57, %v1934_v53  ;;  %v1936_v27 = vpop.f32.mrb[207].mxu0  ;;  %v7733_v62 = vpop.f32.mrb[207].mxu1 }
 0x2a2   :  { %9924 = vst [vmem:[#allocation12_spill] sm:$0xff] %v7733_v62  ;;  %v7738_v59 = vmax.f32 %v9925_v58, %v1936_v27 }
 0x2a3   :  { %4776 = vmatmul.mubr.msk.bf16.gmra.mrb[56].mxu1 %vm368_vm1, %v9926_v10  ;;  %4781 = vmatmul.mubr.msk.bf16.vlgmr.msra.gmra.mrb[56].mxu0 %vm368_vm1, %v9927_v48 }
 0x2a4   :  { %3247 = vmatprep.mubr.bf16.mxu1 %v9602_v43  ;;  %3320 = vmatprep.mubr.bf16.mxu0 %v9602_v43 }
 0x2a5   :  { %3505 = vmatpush1.bf16.msra.mxu0 %v9928_v39  ;;  %v9932_v39 = vmax.f32 %v7419_v6, %v9931_v15  ;;  %v9934_v6 = vld [vmem:[#allocation43_spill] sm:$0xff]  ;;  %v9935_v15 = vmax.f32 %v7438_v60, %v7606_v61  ;;  %v9936_v60 = vmax.f32 %v7454_v29, %v7622_v21  ;;  %v9938_v29 = vmax.f32 %v7472_v0, %v7640_v11 }
 0x2a6   :  { %v1940_v53 = vpop.f32.mrb[208].mxu0  ;;  %v7749_v57 = vpop.f32.mrb[208].mxu1  ;;  %4798 = vmatprep.subr.msk.bf16.mxu0 %vm393_vm0, %v9929_v19 }
 0x2a7   :  { %v7756_v27 = vmax.f32 %v9930_v13, %v1940_v53  ;;  %v1942_v23 = vpop.f32.mrb[209].mxu0  ;;  %v7760_v14 = vpop.f32.mrb[209].mxu1 }
 0x2a8   :  { %v7765_v48 = vmax.f32 %v9932_v39, %v1942_v23  ;;  %v1944_v19 = vpop.f32.mrb[210].mxu0  ;;  %v7769_v62 = vpop.f32.mrb[210].mxu1 }
 0x2a9   :  { %v7774_v49 = vmax.f32 %v9933_v12, %v1944_v19  ;;  %v1946_v13 = vpop.f32.mrb[211].mxu0  ;;  %v7778_v58 = vpop.f32.mrb[211].mxu1  ;;  %3507 = vmatpush1.bf16.msra.mxu0 %v9934_v6  ;;  %v9937_v6 = vmax.f32 %v7463_v1, %v7631_v54  ;;  %v9939_v1 = vmax.f32 %v7481_v41, %v7649_v50  ;;  %v9940_v50 = vmax.f32 %v7498_v18, %v7664_v8 }
 0x2aa   :  { %v7784_v23 = vmax.f32 %v9935_v15, %v1946_v13  ;;  %v9942_v18 = vmax.f32 %v7516_v7, %v7682_v24 }
 0x2ab   :  { %4777 = vmatmul.mubr.msk.bf16.gmra.mrb[60].mxu1 %vm368_vm1, %v7223_v4  ;;  %4782 = vmatmul.mubr.msk.bf16.gmra.mrb[60].mxu0 %vm368_vm1, %v7042_v42 }
 0x2ac   :  { %3257 = vmatprep.mubr.bf16.mxu1 %v9602_v43  ;;  %3330 = vmatprep.mubr.bf16.mxu0 %v9602_v43 }
 0x2ae   :  { %v1950_v5 = vpop.f32.mrb[212].mxu0  ;;  %v7794_v20 = vpop.f32.mrb[212].mxu1 }
 0x2af   :  { %v7799_v61 = vmax.f32 %v9936_v60, %v1950_v5  ;;  %v1952_v12 = vpop.f32.mrb[213].mxu0  ;;  %v7803_v13 = vpop.f32.mrb[213].mxu1 }
 0x2b0   :  { %v7808_v15 = vmax.f32 %v9937_v6, %v1952_v12  ;;  %v1954_v53 = vpop.f32.mrb[214].mxu0  ;;  %v7812_v10 = vpop.f32.mrb[214].mxu1 }
 0x2b1   :  { %v7817_v21 = vmax.f32 %v9938_v29, %v1954_v53  ;;  %v1956_v60 = vpop.f32.mrb[215].mxu0  ;;  %v7821_v19 = vpop.f32.mrb[215].mxu1 }
 0x2b2   :  { %v7826_v54 = vmax.f32 %v9939_v1, %v1956_v60  ;;  %v9941_v1 = vmax.f32 %v7507_v33, %v7673_v28  ;;  %v9943_v33 = vmax.f32 %v7525_v2, %v7691_v44  ;;  %v9946_v2 = vmax.f32 %v7540_v38, %v7706_v25 }
 0x2b3   :  { %4778 = vmatmul.mubr.msk.bf16.gmra.mrb[64].mxu1 %vm368_vm1, %v7272_v51  ;;  %4783 = vmatmul.mubr.msk.bf16.gmra.mrb[64].mxu0 %vm368_vm1, %v9914_v37  ;;  %v9947_v60 = vmax.f32 %v7549_v36, %v7715_v47  ;;  %v9948_v38 = vmax.f32 %v7558_v45, %v7724_v46  ;;  %v9949_v36 = vld [vmem:[#allocation12_spill] sm:$0xff]  ;;  %v9955_v46 = vld [vmem:[#allocation45_spill] sm:$0xff] }
 0x2b4   :  { %3267 = vmatprep.mubr.bf16.mxu1 %v9602_v43  ;;  %3340 = vmatprep.mubr.bf16.mxu0 %v9602_v43  ;;  %v9950_v47 = vmax.f32 %v7567_v3, %v9949_v36  ;;  %v9954_v45 = vld [vmem:[#allocation44_spill] sm:$0xff] }
 0x2b6   :  { %v7836_v0 = vpop.f32.mrb[216].mxu1  ;;  %v2106_v11 = vpop.f32.mrb[216].mxu0 }
 0x2b7   :  { %v7843_v53 = vmax.f32 %v9940_v50, %v2106_v11  ;;  %v7845_v6 = vpop.f32.mrb[217].mxu1  ;;  %v2108_v29 = vpop.f32.mrb[217].mxu0 }
 0x2b8   :  { %v7852_v12 = vmax.f32 %v9941_v1, %v2108_v29  ;;  %v7854_v5 = vpop.f32.mrb[218].mxu1  ;;  %v2110_v39 = vpop.f32.mrb[218].mxu0  ;;  %v9944_v29 = vld [vmem:[#allocation16_spill] sm:$0xff]  ;;  %v9945_v1 = vld [vmem:[#allocation15_spill] sm:$0xff] }
 0x2b9   :  { %v7861_v8 = vmax.f32 %v9942_v18, %v2110_v39  ;;  %v7863_v11 = vpop.f32.mrb[219].mxu1  ;;  %v2112_v50 = vpop.f32.mrb[219].mxu0  ;;  %v9953_v39 = vld [vmem:[#allocation47_spill] sm:$0xff] }
 0x2ba   :  { %v7870_v28 = vmax.f32 %v9943_v33, %v2112_v50 }
 0x2bb   :  { %4779 = vmatmul.mubr.msk.bf16.gmra.mrb[68].mxu1 %vm368_vm1, %v9944_v29  ;;  %4784 = vmatmul.mubr.msk.bf16.gmra.mrb[68].mxu0 %vm368_vm1, %v9945_v1 }
 0x2bc   :  { %3350 = vmatprep.mubr.bf16.mxu0 %v9602_v43  ;;  %3423 = vmatprep.mubr.bf16.mxu1 %v9602_v43 }
 0x2be   :  { %v7878_v7 = vpop.f32.mrb[220].mxu1  ;;  %v2116_v24 = vpop.f32.mrb[220].mxu0 }
 0x2bf   :  { %v7885_v44 = vmax.f32 %v9946_v2, %v2116_v24  ;;  %v7887_v18 = vpop.f32.mrb[221].mxu1  ;;  %v2118_v50 = vpop.f32.mrb[221].mxu0 }
 0x2c0   :  { %v7894_v41 = vmax.f32 %v9947_v60, %v2118_v50  ;;  %v7896_v1 = vpop.f32.mrb[222].mxu1  ;;  %v2120_v29 = vpop.f32.mrb[222].mxu0  ;;  %v9952_v50 = vld [vmem:[#allocation55_spill] sm:$0xff] }
 0x2c1   :  { %v7903_v25 = vmax.f32 %v9948_v38, %v2120_v29  ;;  %v7905_v24 = vpop.f32.mrb[223].mxu1  ;;  %v2122_v2 = vpop.f32.mrb[223].mxu0  ;;  %v9958_v38 = vld [vmem:[#allocation46_spill] sm:$0xff] }
 0x2c2   :  { %v7912_v60 = vmax.f32 %v9950_v47, %v2122_v2  ;;  %v9956_v2 = vmax.f32 %v7585_v52, %v7749_v57  ;;  %v9959_v57 = vmax.f32 %v7604_v17, %v7769_v62 }
 0x2c3   :  { %4785 = vmatmul.mubr.msk.bf16.gmra.mrb[72].mxu0 %vm368_vm1, %v9952_v50  ;;  %4790 = vmatmul.mubr.msk.bf16.vlgmr.msra.gmra.mrb[72].mxu1 %vm368_vm1, %v9953_v39 }
 0x2c4   :  { %9951 = vst [vmem:[#allocation13_spill] sm:$0xff] %v7912_v60  ;;  %3618 = vmatpush1.bf16.msra.mxu1 %v9954_v45  ;;  %3360 = vmatprep.mubr.bf16.mxu0 %v9602_v43 }
 0x2c5   :  { %3433 = vmatprep.mubr.bf16.mxu1 %v9602_v43  ;;  %4807 = vmatprep.subr.msk.bf16.mxu1 %vm393_vm0, %v9955_v46  ;;  %v9957_v46 = vmax.f32 %v7594_v9, %v7760_v14  ;;  %v9960_v14 = vmax.f32 %v7614_v31, %v7778_v58  ;;  %v9961_v31 = vmax.f32 %v7629_v34, %v7794_v20 }
 0x2c6   :  { %v7923_v29 = vpop.f32.mrb[224].mxu1  ;;  %v2126_v3 = vpop.f32.mrb[224].mxu0  ;;  %v9963_v34 = vmax.f32 %v7647_v16, %v7812_v10 }
 0x2c7   :  { %v7930_v36 = vmax.f32 %v9956_v2, %v2126_v3  ;;  %v7932_v47 = vpop.f32.mrb[225].mxu1  ;;  %v2128_v45 = vpop.f32.mrb[225].mxu0 }
 0x2c8   :  { %v7939_v39 = vmax.f32 %v9957_v46, %v2128_v45  ;;  %v7941_v50 = vpop.f32.mrb[226].mxu1  ;;  %v2130_v60 = vpop.f32.mrb[226].mxu0  ;;  %3620 = vmatpush1.bf16.msra.mxu1 %v9958_v38 }
 0x2c9   :  { %v7949_v3 = vmax.f32 %v9959_v57, %v2130_v60  ;;  %v7951_v2 = vpop.f32.mrb[227].mxu1  ;;  %v2132_v33 = vpop.f32.mrb[227].mxu0  ;;  %v9962_v57 = vmax.f32 %v7638_v26, %v7803_v13  ;;  %v9964_v26 = vmax.f32 %v7656_v35, %v7821_v19 }
 0x2ca   :  { %v7958_v45 = vmax.f32 %v9960_v14, %v2132_v33 }
 0x2cb   :  { %4786 = vmatmul.mubr.msk.bf16.gmra.mrb[76].mxu0 %vm368_vm1, %v7223_v4  ;;  %4791 = vmatmul.mubr.msk.bf16.gmra.mrb[76].mxu1 %vm368_vm1, %v7042_v42 }
 0x2cc   :  { %3370 = vmatprep.mubr.bf16.mxu0 %v9602_v43  ;;  %3443 = vmatprep.mubr.bf16.mxu1 %v9602_v43 }
 0x2ce   :  { %v7966_v17 = vpop.f32.mrb[228].mxu1  ;;  %v2136_v62 = vpop.f32.mrb[228].mxu0 }
 0x2cf   :  { %v7973_v58 = vmax.f32 %v9961_v31, %v2136_v62  ;;  %v7975_v33 = vpop.f32.mrb[229].mxu1  ;;  %v2138_v38 = vpop.f32.mrb[229].mxu0 }
 0x2d0   :  { %v7982_v14 = vmax.f32 %v9962_v57, %v2138_v38  ;;  %v7984_v9 = vpop.f32.mrb[230].mxu1  ;;  %v2140_v52 = vpop.f32.mrb[230].mxu0 }
 0x2d1   :  { %v7991_v20 = vmax.f32 %v9963_v34, %v2140_v52  ;;  %v7993_v62 = vpop.f32.mrb[231].mxu1  ;;  %v2142_v31 = vpop.f32.mrb[231].mxu0  ;;  %v9965_v52 = vmax.f32 %v7669_v30, %v7836_v0  ;;  %v9966_v34 = vmax.f32 %v7678_v22, %v7845_v6  ;;  %v9967_v30 = vmax.f32 %v7687_v55, %v7854_v5  ;;  %v9970_v55 = vld [vmem:[#allocation15_spill] sm:$0xff] }
 0x2d2   :  { %v8000_v13 = vmax.f32 %v9964_v26, %v2142_v31  ;;  %v9968_v22 = vmax.f32 %v7696_v40, %v7863_v11  ;;  %v9971_v40 = vmax.f32 %v7711_v56, %v7878_v7  ;;  %v9973_v56 = vmax.f32 %v7729_v32, %v7896_v1  ;;  %v9977_v26 = vld [vmem:[#allocation55_spill] sm:$0xff] }
 0x2d3   :  { %4787 = vmatmul.mubr.msk.bf16.gmra.mrb[80].mxu0 %vm368_vm1, %v7272_v51  ;;  %4792 = vmatmul.mubr.msk.bf16.gmra.mrb[80].mxu1 %vm368_vm1, %v9914_v37  ;;  %v9978_v32 = vld [vmem:[#allocation47_spill] sm:$0xff] }
 0x2d4   :  { %3380 = vmatprep.mubr.bf16.mxu0 %v9602_v43  ;;  %3453 = vmatprep.mubr.bf16.mxu1 %v9602_v43 }
 0x2d6   :  { %v2146_v16 = vpop.f32.mrb[232].mxu0  ;;  %v8008_v10 = vpop.f32.mrb[232].mxu1 }
 0x2d7   :  { %v8013_v38 = vmax.f32 %v9965_v52, %v2146_v16  ;;  %v2148_v19 = vpop.f32.mrb[233].mxu0  ;;  %v8017_v57 = vpop.f32.mrb[233].mxu1 }
 0x2d8   :  { %v8022_v31 = vmax.f32 %v9966_v34, %v2148_v19  ;;  %v2150_v46 = vpop.f32.mrb[234].mxu0  ;;  %v8026_v60 = vpop.f32.mrb[234].mxu1  ;;  %v9969_v34 = vld [vmem:[#allocation16_spill] sm:$0xff]  ;;  %v9972_v19 = vmax.f32 %v7720_v63, %v7887_v18  ;;  %v9975_v63 = vmax.f32 %v7738_v59, %v7905_v24  ;;  %v9979_v59 = vmax.f32 %v7756_v27, %v7923_v29 }
 0x2d9   :  { %v8031_v0 = vmax.f32 %v9967_v30, %v2150_v46  ;;  %v2152_v52 = vpop.f32.mrb[235].mxu0  ;;  %v8035_v35 = vpop.f32.mrb[235].mxu1  ;;  %v9981_v27 = vmax.f32 %v7774_v49, %v7941_v50 }
 0x2da   :  { %v8040_v6 = vmax.f32 %v9968_v22, %v2152_v52 }
 0x2db   :  { %4788 = vmatmul.mubr.msk.bf16.gmra.mrb[84].mxu0 %vm368_vm1, %v9969_v34  ;;  %4793 = vmatmul.mubr.msk.bf16.gmra.mrb[84].mxu1 %vm368_vm1, %v9970_v55 }
 0x2dc   :  { %3463 = vmatprep.mubr.bf16.mxu1 %v9602_v43  ;;  %3536 = vmatprep.mubr.bf16.mxu0 %v9602_v43 }
 0x2de   :  { %v2156_v5 = vpop.f32.mrb[236].mxu0  ;;  %v8050_v46 = vpop.f32.mrb[236].mxu1 }
 0x2df   :  { %v8055_v11 = vmax.f32 %v9971_v40, %v2156_v5  ;;  %v2158_v52 = vpop.f32.mrb[237].mxu0  ;;  %v8059_v22 = vpop.f32.mrb[237].mxu1 }
 0x2e0   :  { %v8064_v16 = vmax.f32 %v9972_v19, %v2158_v52  ;;  %v2160_v55 = vpop.f32.mrb[238].mxu0  ;;  %v8068_v34 = vpop.f32.mrb[238].mxu1  ;;  %v9976_v19 = vld [vmem:[#allocation13_spill] sm:$0xff]  ;;  %v9980_v52 = vmax.f32 %v7765_v48, %v7932_v47  ;;  %v9982_v48 = vmax.f32 %v7784_v23, %v7951_v2  ;;  %v9983_v23 = vmax.f32 %v7799_v61, %v7966_v17 }
 0x2e1   :  { %v8073_v7 = vmax.f32 %v9973_v56, %v2160_v55  ;;  %v2162_v40 = vpop.f32.mrb[239].mxu0  ;;  %v8077_v30 = vpop.f32.mrb[239].mxu1  ;;  %v9985_v61 = vmax.f32 %v7817_v21, %v7984_v9 }
 0x2e2   :  { %9974 = vst [vmem:[#allocation14_spill] sm:$0xff] %v8077_v30  ;;  %v8082_v18 = vmax.f32 %v9975_v63, %v2162_v40 }
 0x2e3   :  { %4794 = vmatmul.mubr.msk.bf16.gmra.mrb[88].mxu1 %vm368_vm1, %v9977_v26  ;;  %4799 = vmatmul.mubr.msk.bf16.vlgmr.msra.gmra.mrb[88].mxu0 %vm368_vm1, %v9978_v32 }
 0x2e4   :  { %3473 = vmatprep.mubr.bf16.mxu1 %v9602_v43  ;;  %3546 = vmatprep.mubr.bf16.mxu0 %v9602_v43 }
 0x2e6   :  { %v2166_v1 = vpop.f32.mrb[240].mxu0  ;;  %v8092_v55 = vpop.f32.mrb[240].mxu1 }
 0x2e7   :  { %v8097_v24 = vmax.f32 %v9979_v59, %v2166_v1  ;;  %v2168_v40 = vpop.f32.mrb[241].mxu0  ;;  %v8101_v63 = vpop.f32.mrb[241].mxu1 }
 0x2e8   :  { %v8106_v5 = vmax.f32 %v9980_v52, %v2168_v40  ;;  %v2170_v26 = vpop.f32.mrb[242].mxu0  ;;  %v8110_v30 = vpop.f32.mrb[242].mxu1 }
 0x2e9   :  { %v8115_v29 = vmax.f32 %v9981_v27, %v2170_v26  ;;  %v2172_v59 = vpop.f32.mrb[243].mxu0  ;;  %v8119_v56 = vpop.f32.mrb[243].mxu1 }
 0x2ea   :  { %v8124_v47 = vmax.f32 %v9982_v48, %v2172_v59  ;;  %v9984_v59 = vmax.f32 %v7808_v15, %v7975_v33  ;;  %v9986_v15 = vmax.f32 %v7826_v54, %v7993_v62  ;;  %v9987_v62 = vmax.f32 %v7843_v53, %v8008_v10 }
 0x2eb   :  { %4795 = vmatmul.mubr.msk.bf16.gmra.mrb[92].mxu1 %vm368_vm1, %v7223_v4  ;;  %4800 = vmatmul.mubr.msk.bf16.gmra.mrb[92].mxu0 %vm368_vm1, %v7042_v42  ;;  %v9989_v53 = vmax.f32 %v7861_v8, %v8026_v60 }
 0x2ec   :  { %3483 = vmatprep.mubr.bf16.mxu1 %v9602_v43  ;;  %3556 = vmatprep.mubr.bf16.mxu0 %v9602_v43 }
 0x2ee   :  { %v2176_v49 = vpop.f32.mrb[244].mxu0  ;;  %v8134_v50 = vpop.f32.mrb[244].mxu1 }
 0x2ef   :  { %v8139_v2 = vmax.f32 %v9983_v23, %v2176_v49  ;;  %v2178_v40 = vpop.f32.mrb[245].mxu0  ;;  %v8143_v27 = vpop.f32.mrb[245].mxu1 }
 0x2f0   :  { %v8148_v48 = vmax.f32 %v9984_v59, %v2178_v40  ;;  %v2180_v1 = vpop.f32.mrb[246].mxu0  ;;  %v8152_v32 = vpop.f32.mrb[246].mxu1 }
 0x2f1   :  { %v8157_v17 = vmax.f32 %v9985_v61, %v2180_v1  ;;  %v2182_v23 = vpop.f32.mrb[247].mxu0  ;;  %v8161_v26 = vpop.f32.mrb[247].mxu1 }
 0x2f2   :  { %v8166_v33 = vmax.f32 %v9986_v15, %v2182_v23  ;;  %v9988_v15 = vmax.f32 %v7852_v12, %v8017_v57  ;;  %v9990_v12 = vmax.f32 %v7870_v28, %v8035_v35  ;;  %v9993_v28 = vmax.f32 %v7885_v44, %v8050_v46 }
 0x2f3   :  { %4796 = vmatmul.mubr.msk.bf16.gmra.mrb[96].mxu1 %vm368_vm1, %v7272_v51  ;;  %4801 = vmatmul.mubr.msk.bf16.gmra.mrb[96].mxu0 %vm368_vm1, %v9914_v37  ;;  %v9994_v23 = vmax.f32 %v7894_v41, %v8059_v22  ;;  %v9995_v44 = vmax.f32 %v7903_v25, %v8068_v34  ;;  %v9996_v41 = vld [vmem:[#allocation14_spill] sm:$0xff] }
 0x2f4   :  { %3493 = vmatprep.mubr.bf16.mxu1 %v9602_v43  ;;  %3566 = vmatprep.mubr.bf16.mxu0 %v9602_v43  ;;  %v9997_v22 = vmax.f32 %v9976_v19, %v9996_v41  ;;  %v10001_v19 = vmax.f32 %v7930_v36, %v8092_v55  ;;  %v10003_v36 = vmax.f32 %v7949_v3, %v8110_v30 }
 0x2f6   :  { %v8176_v21 = vpop.f32.mrb[248].mxu1  ;;  %v2860_v9 = vpop.f32.mrb[248].mxu0 }
 0x2f7   :  { %v8183_v1 = vmax.f32 %v9987_v62, %v2860_v9  ;;  %v8185_v59 = vpop.f32.mrb[249].mxu1  ;;  %v2862_v61 = vpop.f32.mrb[249].mxu0 }
 0x2f8   :  { %v8192_v40 = vmax.f32 %v9988_v15, %v2862_v61  ;;  %v8194_v49 = vpop.f32.mrb[250].mxu1  ;;  %v2864_v52 = vpop.f32.mrb[250].mxu0  ;;  %v9991_v61 = vld [vmem:[#allocation16_spill] sm:$0xff]  ;;  %v9992_v15 = vld [vmem:[#allocation15_spill] sm:$0xff] }
 0x2f9   :  { %v8201_v10 = vmax.f32 %v9989_v53, %v2864_v52  ;;  %v8203_v9 = vpop.f32.mrb[251].mxu1  ;;  %v2866_v62 = vpop.f32.mrb[251].mxu0  ;;  %v10000_v52 = vld [vmem:[#allocation47_spill] sm:$0xff] }
 0x2fa   :  { %v8210_v57 = vmax.f32 %v9990_v12, %v2866_v62 }
 0x2fb   :  { %4797 = vmatmul.mubr.msk.bf16.gmra.mrb[100].mxu1 %vm368_vm1, %v9991_v61  ;;  %4802 = vmatmul.mubr.msk.bf16.gmra.mrb[100].mxu0 %vm368_vm1, %v9992_v15 }
 0x2fc   :  { %3576 = vmatprep.mubr.bf16.mxu0 %v9602_v43  ;;  %3649 = vmatprep.mubr.bf16.mxu1 %v9602_v43 }
 0x2fe   :  { %v8218_v8 = vpop.f32.mrb[252].mxu1  ;;  %v2870_v60 = vpop.f32.mrb[252].mxu0 }
 0x2ff   :  { %v8225_v35 = vmax.f32 %v9993_v28, %v2870_v60  ;;  %v8227_v53 = vpop.f32.mrb[253].mxu1  ;;  %v2872_v62 = vpop.f32.mrb[253].mxu0 }
 0x300   :  { %v8234_v54 = vmax.f32 %v9994_v23, %v2872_v62  ;;  %v8236_v15 = vpop.f32.mrb[254].mxu1  ;;  %v2874_v61 = vpop.f32.mrb[254].mxu0  ;;  %v9999_v62 = vld [vmem:[#allocation55_spill] sm:$0xff] }
 0x301   :  { %v8243_v46 = vmax.f32 %v9995_v44, %v2874_v61  ;;  %v8245_v60 = vpop.f32.mrb[255].mxu1  ;;  %v2876_v28 = vpop.f32.mrb[255].mxu0 }
 0x302   :  { %v8252_v23 = vmax.f32 %v9997_v22, %v2876_v28  ;;  %v10002_v22 = vmax.f32 %v7939_v39, %v8101_v63  ;;  %v10004_v39 = vmax.f32 %v7958_v45, %v8119_v56  ;;  %v10005_v45 = vmax.f32 %v7973_v58, %v8134_v50 }
 0x303   :  { %4803 = vmatmul.mubr.msk.bf16.gmra.mrb[104].mxu0 %vm368_vm1, %v9999_v62  ;;  %4808 = vmatmul.mubr.msk.bf16.vlgmr.msra.gmra.mrb[104].mxu1 %vm368_vm1, %v10000_v52  ;;  %v10007_v58 = vmax.f32 %v7991_v20, %v8152_v32 }
 0x304   :  { %9998 = vst [vmem:[#allocation18_spill] sm:$0xff] %v8252_v23  ;;  %3586 = vmatprep.mubr.bf16.mxu0 %v9602_v43  ;;  %3659 = vmatprep.mubr.bf16.mxu1 %v9602_v43 }
 0x306   :  { %v8260_v25 = vpop.f32.mrb[0].mxu1  ;;  %v2880_v34 = vpop.f32.mrb[0].mxu0 }
 0x307   :  { %v8267_v44 = vmax.f32 %v10001_v19, %v2880_v34  ;;  %v8269_v28 = vpop.f32.mrb[1].mxu1  ;;  %v2882_v41 = vpop.f32.mrb[1].mxu0 }
 0x308   :  { %v8276_v12 = vmax.f32 %v10002_v22, %v2882_v41  ;;  %v8278_v62 = vpop.f32.mrb[2].mxu1  ;;  %v2884_v23 = vpop.f32.mrb[2].mxu0 }
 0x309   :  { %v8285_v55 = vmax.f32 %v10003_v36, %v2884_v23  ;;  %v8287_v34 = vpop.f32.mrb[3].mxu1  ;;  %v2886_v19 = vpop.f32.mrb[3].mxu0  ;;  %v10006_v36 = vmax.f32 %v7982_v14, %v8143_v27  ;;  %v10008_v14 = vmax.f32 %v8000_v13, %v8161_v26 }
 0x30a   :  { %v8294_v63 = vmax.f32 %v10004_v39, %v2886_v19 }
 0x30b   :  { %4804 = vmatmul.mubr.msk.bf16.gmra.mrb[108].mxu0 %vm368_vm1, %v7223_v4  ;;  %4809 = vmatmul.mubr.msk.bf16.gmra.mrb[108].mxu1 %vm368_vm1, %v7042_v42 }
 0x30c   :  { %3596 = vmatprep.mubr.bf16.mxu0 %v9602_v43  ;;  %3669 = vmatprep.mubr.bf16.mxu1 %v9602_v43 }
 0x30e   :  { %v8302_v3 = vpop.f32.mrb[4].mxu1  ;;  %v2890_v30 = vpop.f32.mrb[4].mxu0 }
 0x30f   :  { %v8309_v56 = vmax.f32 %v10005_v45, %v2890_v30  ;;  %v8311_v41 = vpop.f32.mrb[5].mxu1  ;;  %v2892_v22 = vpop.f32.mrb[5].mxu0 }
 0x310   :  { %v8318_v19 = vmax.f32 %v10006_v36, %v2892_v22  ;;  %v8320_v39 = vpop.f32.mrb[6].mxu1  ;;  %v2894_v52 = vpop.f32.mrb[6].mxu0 }
 0x311   :  { %v8327_v50 = vmax.f32 %v10007_v58, %v2894_v52  ;;  %v8329_v30 = vpop.f32.mrb[7].mxu1  ;;  %v2896_v45 = vpop.f32.mrb[7].mxu0  ;;  %v10009_v52 = vmax.f32 %v8013_v38, %v8176_v21  ;;  %v10011_v38 = vmax.f32 %v8031_v0, %v8194_v49  ;;  %v10014_v0 = vld [vmem:[#allocation15_spill] sm:$0xff] }
 0x312   :  { %v8336_v27 = vmax.f32 %v10008_v14, %v2896_v45 }
 0x313   :  { %4805 = vmatmul.mubr.msk.bf16.gmra.mrb[112].mxu0 %vm368_vm1, %v7272_v51  ;;  %4810 = vmatmul.mubr.msk.bf16.gmra.mrb[112].mxu1 %vm368_vm1, %v9914_v37  ;;  %v10010_v37 = vmax.f32 %v8022_v31, %v8185_v59  ;;  %v10012_v31 = vmax.f32 %v8040_v6, %v8203_v9 }
 0x314   :  { %3606 = vmatprep.mubr.bf16.mxu0 %v9602_v43  ;;  %3679 = vmatprep.mubr.bf16.mxu1 %v9602_v43 }
 0x316   :  { %v2900_v20 = vpop.f32.mrb[8].mxu0  ;;  %v8344_v32 = vpop.f32.mrb[8].mxu1 }
 0x317   :  { %v8349_v22 = vmax.f32 %v10009_v52, %v2900_v20  ;;  %v2902_v26 = vpop.f32.mrb[9].mxu0  ;;  %v8353_v36 = vpop.f32.mrb[9].mxu1 }
 0x318   :  { %v8358_v58 = vmax.f32 %v10010_v37, %v2902_v26  ;;  %v2904_v14 = vpop.f32.mrb[10].mxu0  ;;  %v8362_v42 = vpop.f32.mrb[10].mxu1  ;;  %v10013_v37 = vld [vmem:[#allocation16_spill] sm:$0xff]  ;;  %v10016_v26 = vmax.f32 %v8064_v16, %v8227_v53  ;;  %v10018_v16 = vmax.f32 %v8082_v18, %v8245_v60 }
 0x319   :  { %v8367_v21 = vmax.f32 %v10011_v38, %v2904_v14  ;;  %v2906_v52 = vpop.f32.mrb[11].mxu0  ;;  %v8371_v13 = vpop.f32.mrb[11].mxu1  ;;  %v10015_v38 = vmax.f32 %v8055_v11, %v8218_v8  ;;  %v10017_v11 = vmax.f32 %v8073_v7, %v8236_v15  ;;  %v5000_v7 = vld [vmem:[%s9464_s3 + $0x40] sm:$0xff]  }
 0x31a   :  { %v8376_v59 = vmax.f32 %v10012_v31, %v2906_v52  ;;  %v5001_v15 = vld [vmem:[%s9464_s3] sm:$0xff]   ;;  %4842 = vmatprep.subr.bf16.mxu0 %v5000_v7 }
 0x31b   :  { %4806 = vmatmul.mubr.msk.bf16.gmra.mrb[116].mxu0 %vm368_vm1, %v10013_v37  ;;  %4811 = vmatmul.mubr.msk.bf16.gmra.mrb[116].mxu1 %vm368_vm1, %v10014_v0 }
 0x31c   :  { %3689 = vmatprep.mubr.bf16.mxu1 %v9602_v43  ;;  %4843 = vmatpush3.bf16.msra.mxu0 %v5001_v15 }
 0x31e   :  { %v2910_v49 = vpop.f32.mrb[12].mxu0  ;;  %v8385_v14 = vpop.f32.mrb[12].mxu1 }
 0x31f   :  { %v8390_v6 = vmax.f32 %v10015_v38, %v2910_v49  ;;  %v2912_v52 = vpop.f32.mrb[13].mxu0  ;;  %v8394_v31 = vpop.f32.mrb[13].mxu1 }
 0x320   :  { %v8399_v0 = vmax.f32 %v10016_v26, %v2912_v52  ;;  %v2914_v45 = vpop.f32.mrb[14].mxu0  ;;  %v8403_v23 = vpop.f32.mrb[14].mxu1  ;;  %v10019_v26 = vld [vmem:[#allocation18_spill] sm:$0xff] }
 0x321   :  { %v8408_v8 = vmax.f32 %v10017_v11, %v2914_v45  ;;  %v2916_v38 = vpop.f32.mrb[15].mxu0  ;;  %v8412_v9 = vpop.f32.mrb[15].mxu1  ;;  %v10020_v45 = vld [vmem:[#allocation55_spill] sm:$0xff]  ;;  %v10021_v11 = vmax.f32 %v8097_v24, %v8260_v25  ;;  %v10023_v24 = vmax.f32 %v8115_v29, %v8278_v62  ;;  %v5002_v29 = vld [vmem:[%s9464_s3 + $0x48] sm:$0xff]  }
 0x322   :  { %v8417_v53 = vmax.f32 %v10018_v16, %v2916_v38  ;;  %v5003_v62 = vld [vmem:[%s9464_s3 + $0x8] sm:$0xff]   ;;  %4844 = vmatprep.subr.bf16.mxu0 %v5002_v29 }
 0x323   :  { %4812 = vmatmul.mubr.msk.bf16.gmra.mrb[120].mxu1 %vm368_vm1, %v10020_v45  ;;  %v10022_v45 = vmax.f32 %v8106_v5, %v8269_v28  ;;  %v10024_v5 = vmax.f32 %v8124_v47, %v8287_v34  ;;  %4845 = vmatpush3.bf16.msra.mxu0 %v5003_v62 }
 0x324   :  { %3699 = vmatprep.mubr.bf16.mxu1 %v9602_v43 }
 0x326   :  { %v2920_v18 = vpop.f32.mrb[16].mxu0  ;;  %v8430_v60 = vpop.f32.mrb[16].mxu1 }
 0x327   :  { %v8435_v38 = vmax.f32 %v10021_v11, %v2920_v18  ;;  %v2922_v52 = vpop.f32.mrb[17].mxu0  ;;  %v8439_v49 = vpop.f32.mrb[17].mxu1 }
 0x328   :  { %v8444_v20 = vmax.f32 %v10022_v45, %v2922_v52  ;;  %v3771_v7 = vmax.f32 %v8276_v12, %v8439_v49  ;;  %v2924_v15 = vpop.f32.mrb[18].mxu0  ;;  %v8448_v61 = vpop.f32.mrb[18].mxu1  ;;  %v10025_v45 = vmax.f32 %v8139_v2, %v8302_v3  ;;  %v10027_v2 = vmax.f32 %v8157_v17, %v8320_v39  ;;  %v5004_v17 = vld [vmem:[%s9464_s3 + $0x50] sm:$0xff]  }
 0x329   :  { %v8453_v25 = vmax.f32 %v10023_v24, %v2924_v15  ;;  %v2926_v11 = vpop.f32.mrb[19].mxu0  ;;  %v8457_v16 = vpop.f32.mrb[19].mxu1  ;;  %v5005_v39 = vld [vmem:[%s9464_s3 + $0x10] sm:$0xff]   ;;  %4846 = vmatprep.subr.bf16.mxu0 %v5004_v17 }
 0x32a   :  { %v8462_v28 = vmax.f32 %v10024_v5, %v2926_v11  ;;  %4847 = vmatpush3.bf16.msra.mxu0 %v5005_v39  ;;  %v10039_v12 = vmax.f32 %v8294_v63, %v8457_v16 }
 0x32b   :  { %4813 = vmatmul.mubr.msk.bf16.gmra.mrb[124].mxu1 %vm368_vm1, %v7223_v4  ;;  %v10026_v4 = vmax.f32 %v8148_v48, %v8311_v41  ;;  %v10028_v48 = vmax.f32 %v8166_v33, %v8329_v30 }
 0x32c   :  { %3709 = vmatprep.mubr.bf16.mxu1 %v9602_v43 }
 0x32e   :  { %v2930_v47 = vpop.f32.mrb[20].mxu0  ;;  %v8475_v34 = vpop.f32.mrb[20].mxu1 }
 0x32f   :  { %v8480_v15 = vmax.f32 %v10025_v45, %v2930_v47  ;;  %v2932_v11 = vpop.f32.mrb[21].mxu0  ;;  %v8484_v5 = vpop.f32.mrb[21].mxu1  ;;  %v10040_v63 = vmax.f32 %v8309_v56, %v8475_v34 }
 0x330   :  { %v8489_v52 = vmax.f32 %v10026_v4, %v2932_v11  ;;  %v3775_v29 = vmax.f32 %v8318_v19, %v8484_v5  ;;  %v2934_v62 = vpop.f32.mrb[22].mxu0  ;;  %v8493_v18 = vpop.f32.mrb[22].mxu1 }
 0x331   :  { %v8498_v3 = vmax.f32 %v10027_v2, %v2934_v62  ;;  %v3776_v47 = vmax.f32 %v8327_v50, %v8493_v18  ;;  %v2936_v45 = vpop.f32.mrb[23].mxu0  ;;  %v8502_v24 = vpop.f32.mrb[23].mxu1  ;;  %v10029_v62 = vmax.f32 %v8183_v1, %v8344_v32  ;;  %v10031_v1 = vmax.f32 %v8201_v10, %v8362_v42  ;;  %v5007_v10 = vld [vmem:[%s9464_s3 + $0x18] sm:$0xff]   ;;  %v5013_v50 = vld [vmem:[%s9464_s3 + $0x30] sm:$0xff]  }
 0x332   :  { %v8507_v41 = vmax.f32 %v10028_v48, %v2936_v45  ;;  %v10041_v19 = vmax.f32 %v8336_v27, %v8502_v24 }
 0x333   :  { %4814 = vmatmul.mubr.msk.bf16.gmra.mrb[128].mxu1 %vm368_vm1, %v7272_v51 }
 0x334   :  { %3719 = vmatprep.mubr.bf16.mxu1 %v9602_v43  ;;  %v10030_v43 = vmax.f32 %v8192_v40, %v8353_v36  ;;  %v10032_v40 = vmax.f32 %v8210_v57, %v8371_v13  ;;  %v10033_v13 = vmax.f32 %v8225_v35, %v8385_v14  ;;  %v10035_v35 = vmax.f32 %v8243_v46, %v8403_v23  ;;  %v5009_v46 = vld [vmem:[%s9464_s3 + $0x20] sm:$0xff]  }
 0x336   :  { %v8520_v33 = vpop.f32.mrb[24].mxu1  ;;  %v3086_v30 = vpop.f32.mrb[24].mxu0 }
 0x337   :  { %v8527_v2 = vmax.f32 %v10029_v62, %v3086_v30  ;;  %v8529_v45 = vpop.f32.mrb[25].mxu1  ;;  %v3088_v48 = vpop.f32.mrb[25].mxu0 }
 0x338   :  { %v8536_v17 = vmax.f32 %v10030_v43, %v3088_v48  ;;  %v8538_v39 = vpop.f32.mrb[26].mxu1  ;;  %v3090_v11 = vpop.f32.mrb[26].mxu0  ;;  %v5006_v48 = vld [vmem:[%s9464_s3 + $0x58] sm:$0xff]  }
 0x339   :  { %v3780_v4 = vmax.f32 %v8367_v21, %v8538_v39  ;;  %v8545_v32 = vmax.f32 %v10031_v1, %v3090_v11  ;;  %v8547_v30 = vpop.f32.mrb[27].mxu1  ;;  %v3092_v62 = vpop.f32.mrb[27].mxu0  ;;  %4848 = vmatprep.subr.bf16.mxu0 %v5006_v48  ;;  %v5014_v21 = vld [vmem:[%s9464_s3 + $0x78] sm:$0xff]  }
 0x33a   :  { %v8554_v36 = vmax.f32 %v10032_v40, %v3092_v62  ;;  %4849 = vmatpush3.bf16.msra.mxu0 %v5007_v10 }
 0x33b   :  { %4815 = vmatmul.mubr.msk.bf16.gmra.mrb[132].mxu1 %vm368_vm1, %v10013_v37  ;;  %v10034_v37 = vmax.f32 %v8234_v54, %v8394_v31  ;;  %v10036_v54 = vmax.f32 %v10019_v26, %v8412_v9  ;;  %v10037_v9 = vmax.f32 %v8267_v44, %v8430_v60  ;;  %v10038_v44 = vmax.f32 %v8285_v55, %v8448_v61  ;;  %v5011_v61 = vld [vmem:[%s9464_s3 + $0x28] sm:$0xff]  }
 0x33e   :  { %v8564_v42 = vpop.f32.mrb[28].mxu1  ;;  %v3096_v11 = vpop.f32.mrb[28].mxu0 }
 0x33f   :  { %v8571_v43 = vmax.f32 %v10033_v13, %v3096_v11  ;;  %v8573_v1 = vpop.f32.mrb[29].mxu1  ;;  %v3098_v62 = vpop.f32.mrb[29].mxu0 }
 0x340   :  { %v8580_v48 = vmax.f32 %v10034_v37, %v3098_v62  ;;  %v8582_v10 = vpop.f32.mrb[30].mxu1  ;;  %v3100_v51 = vpop.f32.mrb[30].mxu0  ;;  %v5008_v62 = vld [vmem:[%s9464_s3 + $0x60] sm:$0xff]  }
 0x341   :  { %v3784_v57 = vmax.f32 %v8408_v8, %v8582_v10  ;;  %v8589_v14 = vmax.f32 %v10035_v35, %v3100_v51  ;;  %v8591_v11 = vpop.f32.mrb[31].mxu1  ;;  %v3102_v13 = vpop.f32.mrb[31].mxu0  ;;  %4850 = vmatprep.subr.bf16.mxu0 %v5008_v62 }
 0x342   :  { %v8598_v31 = vmax.f32 %v10036_v54, %v3102_v13  ;;  %4851 = vmatpush3.bf16.msra.mxu0 %v5009_v46 }
 0x346   :  { %v8606_v23 = vpop.f32.mrb[32].mxu1  ;;  %v3106_v51 = vpop.f32.mrb[32].mxu0 }
 0x347   :  { %v8613_v26 = vmax.f32 %v10037_v9, %v3106_v51  ;;  %v8615_v35 = vpop.f32.mrb[33].mxu1  ;;  %v3108_v13 = vpop.f32.mrb[33].mxu0  ;;  %v10048_v8 = vmax.f32 %v8435_v38, %v8606_v23 }
 0x348   :  { %v8622_v62 = vmax.f32 %v3771_v7, %v3108_v13  ;;  %v8624_v46 = vpop.f32.mrb[34].mxu1  ;;  %v3110_v40 = vpop.f32.mrb[34].mxu0  ;;  %v5010_v7 = vld [vmem:[%s9464_s3 + $0x68] sm:$0xff]  }
 0x349   :  { %v3788_v37 = vmax.f32 %v8453_v25, %v8624_v46  ;;  %v8631_v60 = vmax.f32 %v10038_v44, %v3110_v40  ;;  %v8633_v51 = vpop.f32.mrb[35].mxu1  ;;  %v3112_v9 = vpop.f32.mrb[35].mxu0  ;;  %4852 = vmatprep.subr.bf16.mxu0 %v5010_v7 }
 0x34a   :  { %v8640_v49 = vmax.f32 %v10039_v12, %v3112_v9  ;;  %4853 = vmatpush3.bf16.msra.mxu0 %v5011_v61 }
 0x34e   :  { %v8648_v55 = vpop.f32.mrb[36].mxu1  ;;  %v3116_v40 = vpop.f32.mrb[36].mxu0 }
 0x34f   :  { %v8655_v16 = vmax.f32 %v10040_v63, %v3116_v40  ;;  %v8657_v44 = vpop.f32.mrb[37].mxu1  ;;  %v3118_v9 = vpop.f32.mrb[37].mxu0  ;;  %v10051_v25 = vmax.f32 %v8480_v15, %v8648_v55 }
 0x350   :  { %v8664_v7 = vmax.f32 %v3775_v29, %v3118_v9  ;;  %v8666_v61 = vpop.f32.mrb[38].mxu1  ;;  %v3120_v54 = vpop.f32.mrb[38].mxu0  ;;  %v5012_v29 = vld [vmem:[%s9464_s3 + $0x70] sm:$0xff]  }
 0x351   :  { %v8673_v56 = vmax.f32 %v3776_v47, %v3120_v54  ;;  %v8675_v34 = vpop.f32.mrb[39].mxu1  ;;  %v3122_v40 = vpop.f32.mrb[39].mxu0  ;;  %4854 = vmatprep.subr.bf16.mxu0 %v5012_v29  ;;  %v10042_v54 = vmax.f32 %v8349_v22, %v8520_v33  ;;  %v10053_v15 = vmax.f32 %v8498_v3, %v8666_v61 }
 0x352   :  { %v8682_v5 = vmax.f32 %v10041_v19, %v3122_v40  ;;  %4855 = vmatpush3.bf16.msra.mxu0 %v5013_v50  ;;  %v10043_v19 = vmax.f32 %v8358_v58, %v8529_v45  ;;  %v10044_v58 = vmax.f32 %v8376_v59, %v8547_v30 }
 0x353   :  { %4856 = vmatprep.subr.bf16.mxu0 %v5014_v21 }
 0x356   :  { %v3126_v18 = vpop.f32.mrb[40].mxu0  ;;  %v8690_v47 = vpop.f32.mrb[40].mxu1 }
 0x357   :  { %v8695_v9 = vmax.f32 %v10042_v54, %v3126_v18  ;;  %v3128_v24 = vpop.f32.mrb[41].mxu0  ;;  %v8699_v40 = vpop.f32.mrb[41].mxu1  ;;  %v10055_v61 = vmax.f32 %v8527_v2, %v8690_v47 }
 0x358   :  { %v8704_v63 = vmax.f32 %v10043_v19, %v3128_v24  ;;  %v3130_v50 = vpop.f32.mrb[42].mxu0  ;;  %v8708_v13 = vpop.f32.mrb[42].mxu1  ;;  %v5015_v19 = vld [vmem:[%s9464_s3 + $0x38] sm:$0xff]   ;;  %v10046_v24 = vmax.f32 %v8399_v0, %v8573_v1  ;;  %v10047_v0 = vmax.f32 %v8417_v53, %v8591_v11  ;;  %v10049_v53 = vmax.f32 %v8444_v20, %v8615_v35 }
 0x359   :  { %v8713_v22 = vmax.f32 %v3780_v4, %v3130_v50  ;;  %v3132_v18 = vpop.f32.mrb[43].mxu0  ;;  %v8717_v54 = vpop.f32.mrb[43].mxu1  ;;  %v10045_v50 = vmax.f32 %v8390_v6, %v8564_v42  ;;  %4857 = vmatpush3.bf16.msra.mxu0 %v5015_v19  ;;  %v10050_v20 = vmax.f32 %v8462_v28, %v8633_v51  ;;  %v10052_v28 = vmax.f32 %v8489_v52, %v8657_v44 }
 0x35a   :  { %v8722_v45 = vmax.f32 %v10044_v58, %v3132_v18  ;;  %v10054_v52 = vmax.f32 %v8507_v41, %v8675_v34  ;;  %v10056_v34 = vmax.f32 %v8536_v17, %v8699_v40  ;;  %v10057_v2 = vmax.f32 %v8545_v32, %v8708_v13 }
 0x35b   :  { %v10058_v17 = vmax.f32 %v8554_v36, %v8717_v54 }
 0x35e   :  { %v3136_v4 = vpop.f32.mrb[44].mxu0  ;;  %v8729_v39 = vpop.f32.mrb[44].mxu1 }
 0x35f   :  { %v8737_v59 = vmax.f32 %v10045_v50, %v3136_v4  ;;  %v3830_v30 = vmax.f32 %v8571_v43, %v8729_v39  ;;  %v3138_v18 = vpop.f32.mrb[45].mxu0  ;;  %v8741_v58 = vpop.f32.mrb[45].mxu1 }
 0x360   :  { %v8746_v33 = vmax.f32 %v10046_v24, %v3138_v18  ;;  %v3831_v29 = vmax.f32 %v8580_v48, %v8741_v58  ;;  %v3140_v27 = vpop.f32.mrb[46].mxu0  ;;  %v8750_v12 = vpop.f32.mrb[46].mxu1 }
 0x361   :  { %v8755_v6 = vmax.f32 %v3784_v57, %v3140_v27  ;;  %v3832_v42 = vmax.f32 %v8589_v14, %v8750_v12  ;;  %v3142_v21 = vpop.f32.mrb[47].mxu0  ;;  %v8759_v4 = vpop.f32.mrb[47].mxu1 }
 0x362   :  { %v8764_v1 = vmax.f32 %v10047_v0, %v3142_v21  ;;  %v10059_v48 = vmax.f32 %v8598_v31, %v8759_v4 }
 0x366   :  { %v3146_v19 = vpop.f32.mrb[48].mxu0  ;;  %v8768_v50 = vpop.f32.mrb[48].mxu1 }
 0x367   :  { %v8773_v57 = vmax.f32 %v10048_v8, %v3146_v19  ;;  %v3834_v10 = vmax.f32 %v8613_v26, %v8768_v50  ;;  %v3148_v27 = vpop.f32.mrb[49].mxu0  ;;  %v8777_v18 = vpop.f32.mrb[49].mxu1 }
 0x368   :  { %v8782_v11 = vmax.f32 %v10049_v53, %v3148_v27  ;;  %v3150_v0 = vpop.f32.mrb[50].mxu0  ;;  %v8786_v24 = vpop.f32.mrb[50].mxu1  ;;  %v10060_v31 = vmax.f32 %v8622_v62, %v8777_v18 }
 0x369   :  { %v8791_v38 = vmax.f32 %v3788_v37, %v3150_v0  ;;  %v3152_v19 = vpop.f32.mrb[51].mxu0  ;;  %v8795_v8 = vpop.f32.mrb[51].mxu1  ;;  %v10061_v26 = vmax.f32 %v8631_v60, %v8786_v24 }
 0x36a   :  { %v8800_v35 = vmax.f32 %v10050_v20, %v3152_v19  ;;  %v10062_v62 = vmax.f32 %v8640_v49, %v8795_v8 }
 0x36e   :  { %v3156_v53 = vpop.f32.mrb[52].mxu0  ;;  %v8804_v21 = vpop.f32.mrb[52].mxu1 }
 0x36f   :  { %v8809_v37 = vmax.f32 %v10051_v25, %v3156_v53  ;;  %v3158_v0 = vpop.f32.mrb[53].mxu0  ;;  %v8813_v23 = vpop.f32.mrb[53].mxu1  ;;  %v10063_v60 = vmax.f32 %v8655_v16, %v8804_v21 }
 0x370   :  { %v8818_v51 = vmax.f32 %v10052_v28, %v3158_v0  ;;  %v3160_v20 = vpop.f32.mrb[54].mxu0  ;;  %v8822_v27 = vpop.f32.mrb[54].mxu1  ;;  %v10064_v49 = vmax.f32 %v8664_v7, %v8813_v23 }
 0x371   :  { %v8827_v55 = vmax.f32 %v10053_v15, %v3160_v20  ;;  %v3162_v25 = vpop.f32.mrb[55].mxu0  ;;  %v8831_v46 = vpop.f32.mrb[55].mxu1  ;;  %v10065_v16 = vmax.f32 %v8673_v56, %v8822_v27 }
 0x372   :  { %v8836_v44 = vmax.f32 %v10054_v52, %v3162_v25  ;;  %v10066_v7 = vmax.f32 %v8682_v5, %v8831_v46 }
 0x376   :  { %v8840_v28 = vpop.f32.mrb[56].mxu1  ;;  %v3312_v19 = vpop.f32.mrb[56].mxu0 }
 0x377   :  { %v8847_v20 = vmax.f32 %v10055_v61, %v3312_v19  ;;  %v8849_v15 = vpop.f32.mrb[57].mxu1  ;;  %v3314_v53 = vpop.f32.mrb[57].mxu0 }
 0x378   :  { %v8856_v25 = vmax.f32 %v10056_v34, %v3314_v53  ;;  %v8858_v52 = vpop.f32.mrb[58].mxu1  ;;  %v3316_v0 = vpop.f32.mrb[58].mxu0 }
 0x379   :  { %v8865_v47 = vmax.f32 %v10057_v2, %v3316_v0  ;;  %v8867_v19 = vpop.f32.mrb[59].mxu1  ;;  %v3318_v61 = vpop.f32.mrb[59].mxu0 }
 0x37a   :  { %v3845_v41 = vmax.f32 %v8722_v45, %v8867_v19  ;;  %v8874_v40 = vmax.f32 %v10058_v17, %v3318_v61  ;;  %v10067_v17 = vmax.f32 %v8695_v9, %v8840_v28  ;;  %v10069_v9 = vmax.f32 %v8713_v22, %v8858_v52 }
 0x37e   :  { %v8876_v53 = vpop.f32.mrb[60].mxu1  ;;  %v3322_v34 = vpop.f32.mrb[60].mxu0 }
 0x37f   :  { %v3846_v3 = vmax.f32 %v8737_v59, %v8876_v53  ;;  %v8883_v32 = vmax.f32 %v3830_v30, %v3322_v34  ;;  %v8885_v13 = vpop.f32.mrb[61].mxu1  ;;  %v3324_v0 = vpop.f32.mrb[61].mxu0 }
 0x380   :  { %v3847_v2 = vmax.f32 %v8746_v33, %v8885_v13  ;;  %v8892_v36 = vmax.f32 %v3831_v29, %v3324_v0  ;;  %v8894_v54 = vpop.f32.mrb[62].mxu1  ;;  %v3326_v61 = vpop.f32.mrb[62].mxu0 }
 0x381   :  { %v8901_v43 = vmax.f32 %v3832_v42, %v3326_v61  ;;  %v8903_v39 = vpop.f32.mrb[63].mxu1  ;;  %v3328_v30 = vpop.f32.mrb[63].mxu0  ;;  %v10068_v61 = vmax.f32 %v8704_v63, %v8849_v15 }
 0x382   :  { %v3849_v34 = vmax.f32 %v8764_v1, %v8903_v39  ;;  %v8910_v29 = vmax.f32 %v10059_v48, %v3328_v30 }
 0x386   :  { %v8912_v58 = vpop.f32.mrb[64].mxu1  ;;  %v3332_v0 = vpop.f32.mrb[64].mxu0 }
 0x387   :  { %v8919_v14 = vmax.f32 %v3834_v10, %v3332_v0  ;;  %v8921_v12 = vpop.f32.mrb[65].mxu1  ;;  %v3334_v42 = vpop.f32.mrb[65].mxu0 }
 0x388   :  { %v8928_v4 = vmax.f32 %v10060_v31, %v3334_v42  ;;  %v8930_v30 = vpop.f32.mrb[66].mxu1  ;;  %v3336_v48 = vpop.f32.mrb[66].mxu0 }
 0x389   :  { %v8937_v50 = vmax.f32 %v10061_v26, %v3336_v48  ;;  %v8939_v10 = vpop.f32.mrb[67].mxu1  ;;  %v3338_v0 = vpop.f32.mrb[67].mxu0 }
 0x38a   :  { %v8946_v18 = vmax.f32 %v10062_v62, %v3338_v0 }
 0x38e   :  { %v8948_v42 = vpop.f32.mrb[68].mxu1  ;;  %v3342_v31 = vpop.f32.mrb[68].mxu0 }
 0x38f   :  { %v8955_v24 = vmax.f32 %v10063_v60, %v3342_v31  ;;  %v8957_v48 = vpop.f32.mrb[69].mxu1  ;;  %v3344_v26 = vpop.f32.mrb[69].mxu0 }
 0x390   :  { %v8964_v8 = vmax.f32 %v10064_v49, %v3344_v26  ;;  %v8966_v0 = vpop.f32.mrb[70].mxu1  ;;  %v3346_v62 = vpop.f32.mrb[70].mxu0 }
 0x391   :  { %v8973_v21 = vmax.f32 %v10065_v16, %v3346_v62  ;;  %v8975_v31 = vpop.f32.mrb[71].mxu1  ;;  %v3348_v60 = vpop.f32.mrb[71].mxu0 }
 0x392   :  { %v8982_v23 = vmax.f32 %v10066_v7, %v3348_v60 }
 0x396   :  { %v3352_v26 = vpop.f32.mrb[72].mxu0  ;;  %v8984_v49 = vpop.f32.mrb[72].mxu1 }
 0x397   :  { %v8989_v56 = vmax.f32 %v10067_v17, %v3352_v26  ;;  %v3354_v62 = vpop.f32.mrb[73].mxu0  ;;  %v8993_v16 = vpop.f32.mrb[73].mxu1 }
 0x398   :  { %v8998_v5 = vmax.f32 %v10068_v61, %v3354_v62  ;;  %v3891_v46 = vmax.f32 %v8856_v25, %v8993_v16  ;;  %v3356_v60 = vpop.f32.mrb[74].mxu0  ;;  %v9002_v7 = vpop.f32.mrb[74].mxu1  ;;  %v5016_v61 = vld [vmem:[#allocation5] sm:$0xff]   ;;  %v5017_v62 = vld [vmem:[#allocation5 + $0x8] sm:$0xff]  }
 0x399   :  { %v9007_v28 = vmax.f32 %v10069_v9, %v3356_v60  ;;  %v3358_v26 = vpop.f32.mrb[75].mxu0  ;;  %v9011_v27 = vpop.f32.mrb[75].mxu1  ;;  %4922 = vmatprep.subr.bf16.mxu1 %v5016_v61  ;;  %v5018_v9 = vld [vmem:[#allocation5 + $0x10] sm:$0xff]  }
 0x39a   :  { %v9016_v63 = vmax.f32 %v3845_v41, %v3358_v26  ;;  %4923 = vmatpush3.bf16.msra.mxu1 %v5016_v61  ;;  %v10081_v25 = vmax.f32 %v8874_v40, %v9011_v27 }
 0x39b   :  { %4924 = vmatprep.subr.bf16.mxu1 %v5017_v62 }
 0x39e   :  { %v3362_v22 = vpop.f32.mrb[76].mxu0  ;;  %v9020_v52 = vpop.f32.mrb[76].mxu1  ;;  %4925 = vmatpush3.bf16.msra.mxu1 %v5017_v62 }
 0x39f   :  { %v9025_v60 = vmax.f32 %v3846_v3, %v3362_v22  ;;  %v3364_v41 = vpop.f32.mrb[77].mxu0  ;;  %v9029_v19 = vpop.f32.mrb[77].mxu1  ;;  %v10070_v3 = vmax.f32 %v8755_v6, %v8894_v54  ;;  %4926 = vmatprep.subr.bf16.mxu1 %v5018_v9  ;;  %v10071_v54 = vmax.f32 %v8773_v57, %v8912_v58  ;;  %v10073_v57 = vmax.f32 %v8791_v38, %v8930_v30 }
 0x3a0   :  { %v9034_v26 = vmax.f32 %v3847_v2, %v3364_v41  ;;  %v3895_v61 = vmax.f32 %v8892_v36, %v9029_v19  ;;  %v3366_v15 = vpop.f32.mrb[78].mxu0  ;;  %v9038_v59 = vpop.f32.mrb[78].mxu1  ;;  %v10075_v38 = vmax.f32 %v8809_v37, %v8948_v42  ;;  %v10077_v37 = vmax.f32 %v8827_v55, %v8966_v0 }
 0x3a1   :  { %v9043_v53 = vmax.f32 %v10070_v3, %v3366_v15  ;;  %v3896_v22 = vmax.f32 %v8901_v43, %v9038_v59  ;;  %v3368_v45 = vpop.f32.mrb[79].mxu0  ;;  %v9047_v17 = vpop.f32.mrb[79].mxu1  ;;  %v10079_v0 = vmax.f32 %v8847_v20, %v8984_v49  ;;  %v10080_v20 = vmax.f32 %v8865_v47, %v9002_v7 }
 0x3a2   :  { %v9052_v33 = vmax.f32 %v3849_v34, %v3368_v45  ;;  %v3897_v13 = vmax.f32 %v8910_v29, %v9047_v17  ;;  %4927 = vmatpush3.bf16.msra.mxu1 %v5018_v9  ;;  %v10072_v34 = vmax.f32 %v8782_v11, %v8921_v12  ;;  %v10074_v11 = vmax.f32 %v8800_v35, %v8939_v10 }
 0x3a3   :  { %v10076_v35 = vmax.f32 %v8818_v51, %v8957_v48  ;;  %v10078_v51 = vmax.f32 %v8836_v44, %v8975_v31  ;;  %v10082_v47 = vmax.f32 %v8883_v32, %v9020_v52 }
 0x3a6   :  { %v3372_v2 = vpop.f32.mrb[80].mxu0  ;;  %v9056_v6 = vpop.f32.mrb[80].mxu1 }
 0x3a7   :  { %v9061_v15 = vmax.f32 %v10071_v54, %v3372_v2  ;;  %v3374_v1 = vpop.f32.mrb[81].mxu0  ;;  %v9065_v39 = vpop.f32.mrb[81].mxu1  ;;  %v10083_v43 = vmax.f32 %v8919_v14, %v9056_v6 }
 0x3a8   :  { %v9070_v62 = vmax.f32 %v10072_v34, %v3374_v1  ;;  %v3376_v9 = vpop.f32.mrb[82].mxu0  ;;  %v9074_v3 = vpop.f32.mrb[82].mxu1  ;;  %v10084_v29 = vmax.f32 %v8928_v4, %v9065_v39 }
 0x3a9   :  { %v9079_v58 = vmax.f32 %v10073_v57, %v3376_v9  ;;  %v3378_v54 = vpop.f32.mrb[83].mxu0  ;;  %v9083_v41 = vpop.f32.mrb[83].mxu1  ;;  %v10085_v14 = vmax.f32 %v8937_v50, %v9074_v3 }
 0x3aa   :  { %v9088_v12 = vmax.f32 %v10074_v11, %v3378_v54  ;;  %v10086_v39 = vmax.f32 %v8946_v18, %v9083_v41 }
 0x3ae   :  { %v3382_v34 = vpop.f32.mrb[84].mxu0  ;;  %v9092_v45 = vpop.f32.mrb[84].mxu1 }
 0x3af   :  { %v9097_v30 = vmax.f32 %v10075_v38, %v3382_v34  ;;  %v3384_v57 = vpop.f32.mrb[85].mxu0  ;;  %v9101_v2 = vpop.f32.mrb[85].mxu1  ;;  %v10087_v3 = vmax.f32 %v8955_v24, %v9092_v45 }
 0x3b0   :  { %v9106_v10 = vmax.f32 %v10076_v35, %v3384_v57  ;;  %v3386_v11 = vpop.f32.mrb[86].mxu0  ;;  %v9110_v1 = vpop.f32.mrb[86].mxu1  ;;  %v10088_v41 = vmax.f32 %v8964_v8, %v9101_v2 }
 0x3b1   :  { %v9115_v42 = vmax.f32 %v10077_v37, %v3386_v11  ;;  %v3388_v38 = vpop.f32.mrb[87].mxu0  ;;  %v9119_v9 = vpop.f32.mrb[87].mxu1  ;;  %v10089_v24 = vmax.f32 %v8973_v21, %v9110_v1 }
 0x3b2   :  { %v9124_v48 = vmax.f32 %v10078_v51, %v3388_v38  ;;  %v3905_v57 = vmax.f32 %v8982_v23, %v9119_v9 }
 0x3b6   :  { %v9128_v35 = vpop.f32.mrb[88].mxu1  ;;  %v3538_v54 = vpop.f32.mrb[88].mxu0 }
 0x3b7   :  { %v9135_v11 = vmax.f32 %v10079_v0, %v3538_v54  ;;  %v9137_v37 = vpop.f32.mrb[89].mxu1  ;;  %v3540_v34 = vpop.f32.mrb[89].mxu0  ;;  %v10090_v50 = vmax.f32 %v8989_v56, %v9128_v35 }
 0x3b8   :  { %v9144_v31 = vmax.f32 %v3891_v46, %v3540_v34  ;;  %v9146_v38 = vpop.f32.mrb[90].mxu1  ;;  %v3542_v51 = vpop.f32.mrb[90].mxu0 }
 0x3b9   :  { %v9153_v49 = vmax.f32 %v10080_v20, %v3542_v51  ;;  %v9155_v54 = vpop.f32.mrb[91].mxu1  ;;  %v3544_v0 = vpop.f32.mrb[91].mxu0  ;;  %v10092_v56 = vmax.f32 %v9007_v28, %v9146_v38 }
 0x3ba   :  { %v9162_v16 = vmax.f32 %v10081_v25, %v3544_v0 }
 0x3be   :  { %v9164_v46 = vpop.f32.mrb[92].mxu1  ;;  %v3548_v34 = vpop.f32.mrb[92].mxu0 }
 0x3bf   :  { %v9171_v7 = vmax.f32 %v10082_v47, %v3548_v34  ;;  %v9173_v51 = vpop.f32.mrb[93].mxu1  ;;  %v3550_v20 = vpop.f32.mrb[93].mxu0  ;;  %v3988_v47 = vlaneseq }
 0x3c0   :  { %v9180_v40 = vmax.f32 %v3895_v61, %v3550_v20  ;;  %v9182_v27 = vpop.f32.mrb[94].mxu1  ;;  %v3552_v0 = vpop.f32.mrb[94].mxu0 }
 0x3c1   :  { %v9189_v32 = vmax.f32 %v3896_v22, %v3552_v0  ;;  %v9191_v52 = vpop.f32.mrb[95].mxu1  ;;  %v3554_v34 = vpop.f32.mrb[95].mxu0 }
 0x3c2   :  { %v9198_v36 = vmax.f32 %v3897_v13, %v3554_v34 }
 0x3c6   :  { %v9200_v19 = vpop.f32.mrb[96].mxu1  ;;  %v3558_v61 = vpop.f32.mrb[96].mxu0 }
 0x3c7   :  { %v9207_v59 = vmax.f32 %v10083_v43, %v3558_v61  ;;  %v9209_v22 = vpop.f32.mrb[97].mxu1  ;;  %v3560_v0 = vpop.f32.mrb[97].mxu0 }
 0x3c8   :  { %v9216_v17 = vmax.f32 %v10084_v29, %v3560_v0  ;;  %v9218_v13 = vpop.f32.mrb[98].mxu1  ;;  %v3562_v34 = vpop.f32.mrb[98].mxu0  ;;  %v3989_v29 = vshrl.u32 %v3988_v47, 7 }
 0x3c9   :  { %v9225_v6 = vmax.f32 %v10085_v14, %v3562_v34  ;;  %v9227_v61 = vpop.f32.mrb[99].mxu1  ;;  %v3564_v43 = vpop.f32.mrb[99].mxu0 }
 0x3ca   :  { %v9234_v0 = vmax.f32 %v10086_v39, %v3564_v43  ;;  %v3990_v18 = vsub.s32 0, %v3989_v29 }
 0x3ce   :  { %v9236_v25 = vpop.f32.mrb[100].mxu1  ;;  %v3568_v20 = vpop.f32.mrb[100].mxu0 }
 0x3cf   :  { %v9243_v34 = vmax.f32 %v10087_v3, %v3568_v20  ;;  %v9245_v14 = vpop.f32.mrb[101].mxu1  ;;  %v3570_v4 = vpop.f32.mrb[101].mxu0 }
 0x3d0   :  { %v9252_v47 = vmax.f32 %v10088_v41, %v3570_v4  ;;  %v9254_v43 = vpop.f32.mrb[102].mxu1  ;;  %v3572_v39 = vpop.f32.mrb[102].mxu0  ;;  %v3986_v4 = vld [vmem:[%s9463_s2] sm:$0x3]  ;;  %v3994_v41 = vsub.s32 1, %v3989_v29 }
 0x3d1   :  { %v9261_v45 = vmax.f32 %v10089_v24, %v3572_v39  ;;  %v9263_v20 = vpop.f32.mrb[103].mxu1  ;;  %v3574_v3 = vpop.f32.mrb[103].mxu0  ;;  %v9275_v21 = vrot.slane %v3986_v4, %v3990_v18 }
 0x3d2   :  { %v9270_v2 = vmax.f32 %v3905_v57, %v3574_v3  ;;  %v9277_v24 = vrot.slane %v3986_v4, %v3994_v41  ;;  %v10091_v3 = vmax.f32 %v8998_v5, %v9137_v37  ;;  %v10093_v5 = vmax.f32 %v9016_v63, %v9155_v54 }
 0x3d6   :  { %v3578_v1 = vpop.f32.mrb[104].mxu0  ;;  %v3651_v39 = vpop.f32.mrb[104].mxu1 }
 0x3d7   :  { %v9282_v8 = vmax.f32 %v10090_v50, %v3578_v1  ;;  %v3954_v23 = vmax.f32 %v9135_v11, %v3651_v39  ;;  %v3580_v9 = vpop.f32.mrb[105].mxu0  ;;  %v3653_v57 = vpop.f32.mrb[105].mxu1 }
 0x3d8   :  { %v9288_v44 = vmax.f32 %v10091_v3, %v3580_v9  ;;  %v3955_v29 = vmax.f32 %v9144_v31, %v3653_v57  ;;  %v3582_v18 = vpop.f32.mrb[106].mxu0  ;;  %v3655_v55 = vpop.f32.mrb[106].mxu1 }
 0x3d9   :  { %v3998_v4 = vadd.f32 %v9275_v21, %v3954_v23  ;;  %v9295_v35 = vmax.f32 %v10092_v56, %v3582_v18  ;;  %v3956_v11 = vmax.f32 %v9153_v49, %v3655_v55  ;;  %v3584_v50 = vpop.f32.mrb[107].mxu0  ;;  %v3657_v41 = vpop.f32.mrb[107].mxu1  ;;  %v10095_v56 = vmax.f32 %v9034_v26, %v9173_v51 }
 0x3da   :  { %v3999_v1 = vadd.f32 %v9277_v24, %v3955_v29  ;;  %v9302_v37 = vmax.f32 %v10093_v5, %v3584_v50  ;;  %v3957_v31 = vmax.f32 %v9162_v16, %v3657_v41  ;;  %v10094_v29 = vmax.f32 %v9025_v60, %v9164_v46 }
 0x3db   :  { %v4000_v39 = vadd.f32 %v9275_v21, %v3956_v11  ;;  %v4030_v28 = vmax.f32 %v3998_v4, 0.0  ;;  %v10096_v60 = vmax.f32 %v9043_v53, %v9182_v27  ;;  %v10097_v51 = vmax.f32 %v9052_v33, %v9191_v52 }
 0x3dc   :  { %v4001_v23 = vadd.f32 %v9277_v24, %v3957_v31  ;;  %v4031_v9 = vmax.f32 %v3999_v1, 0.0  ;;  %v10098_v33 = vmax.f32 %v9061_v15, %v9200_v19  ;;  %v10100_v15 = vmax.f32 %v9079_v58, %v9218_v13 }
 0x3dd   :  { %v4032_v38 = vmax.f32 %v4000_v39, 0.0 }
 0x3de   :  { %v4033_v57 = vmax.f32 %v4001_v23, 0.0  ;;  %v3588_v55 = vpop.f32.mrb[108].mxu0  ;;  %v3661_v49 = vpop.f32.mrb[108].mxu1 }
 0x3df   :  { %v4062_v3 = vpack.c.bf16 %v4032_v38, %v4030_v28  ;;  %v9310_v18 = vmax.f32 %v10094_v29, %v3588_v55  ;;  %v3958_v63 = vmax.f32 %v9171_v7, %v3661_v49  ;;  %v3590_v54 = vpop.f32.mrb[109].mxu0  ;;  %v3663_v16 = vpop.f32.mrb[109].mxu1 }
 0x3e0   :  { %v9316_v11 = vmax.f32 %v10095_v56, %v3590_v54  ;;  %v3959_v4 = vmax.f32 %v9180_v40, %v3663_v16  ;;  %v3592_v50 = vpop.f32.mrb[110].mxu0  ;;  %v3665_v41 = vpop.f32.mrb[110].mxu1  ;;  %v4063_v1 = vpack.c.bf16 %v4033_v57, %v4031_v9 }
 0x3e1   :  { %v4002_v5 = vadd.f32 %v9275_v21, %v3958_v63  ;;  %v9323_v46 = vmax.f32 %v10096_v60, %v3592_v50  ;;  %v3960_v7 = vmax.f32 %v9189_v32, %v3665_v41  ;;  %v3594_v31 = vpop.f32.mrb[111].mxu0  ;;  %v3667_v39 = vpop.f32.mrb[111].mxu1 }
 0x3e2   :  { %v4003_v26 = vadd.f32 %v9277_v24, %v3959_v4  ;;  %v9330_v40 = vmax.f32 %v10097_v51, %v3594_v31  ;;  %v3961_v23 = vmax.f32 %v9198_v36, %v3667_v39  ;;  %4245 = vmatprep.mubr.bf16.mxu0 %v4063_v1 }
 0x3e3   :  { %v4004_v28 = vadd.f32 %v9275_v21, %v3960_v7  ;;  %4246 = vmatmul.mubr.bf16.vlgmr.msra.gmra.mrb[120].mxu0 %v4062_v3  ;;  %v4034_v27 = vmax.f32 %v4002_v5, 0.0  ;;  %v10099_v3 = vmax.f32 %v9070_v62, %v9209_v22  ;;  %v10101_v22 = vmax.f32 %v9088_v12, %v9227_v61 }
 0x3e4   :  { %v4005_v53 = vadd.f32 %v9277_v24, %v3961_v23  ;;  %v4035_v32 = vmax.f32 %v4003_v26, 0.0  ;;  %v10102_v12 = vmax.f32 %v9097_v30, %v9236_v25  ;;  %v10104_v30 = vmax.f32 %v9115_v42, %v9254_v43 }
 0x3e5   :  { %v4036_v38 = vmax.f32 %v4004_v28, 0.0 }
 0x3e6   :  { %v4037_v9 = vmax.f32 %v4005_v53, 0.0  ;;  %v3598_v57 = vpop.f32.mrb[112].mxu0  ;;  %v3671_v55 = vpop.f32.mrb[112].mxu1 }
 0x3e7   :  { %v4064_v49 = vpack.c.bf16 %v4036_v38, %v4034_v27  ;;  %v9338_v52 = vmax.f32 %v10098_v33, %v3598_v57  ;;  %v3962_v36 = vmax.f32 %v9207_v59, %v3671_v55  ;;  %v3600_v29 = vpop.f32.mrb[113].mxu0  ;;  %v3673_v63 = vpop.f32.mrb[113].mxu1  ;;  %v10103_v27 = vmax.f32 %v9106_v10, %v9245_v14 }
 0x3e8   :  { %v9344_v54 = vmax.f32 %v10099_v3, %v3600_v29  ;;  %v3963_v16 = vmax.f32 %v9216_v17, %v3673_v63  ;;  %v3602_v56 = vpop.f32.mrb[114].mxu0  ;;  %v3675_v4 = vpop.f32.mrb[114].mxu1  ;;  %v4065_v50 = vpack.c.bf16 %v4037_v9, %v4035_v32  ;;  %v10105_v14 = vmax.f32 %v9124_v48, %v9263_v20 }
 0x3e9   :  { %v4006_v41 = vadd.f32 %v9275_v21, %v3962_v36  ;;  %v9351_v19 = vmax.f32 %v10100_v15, %v3602_v56  ;;  %v3964_v59 = vmax.f32 %v9225_v6, %v3675_v4  ;;  %v3604_v1 = vpop.f32.mrb[115].mxu0  ;;  %v3677_v5 = vpop.f32.mrb[115].mxu1 }
 0x3ea   :  { %v4007_v62 = vadd.f32 %v9277_v24, %v3963_v16  ;;  %v9358_v17 = vmax.f32 %v10101_v22, %v3604_v1  ;;  %v3965_v60 = vmax.f32 %v9234_v0, %v3677_v5  ;;  %4253 = vmatprep.mubr.bf16.mxu0 %v4065_v50 }
 0x3eb   :  { %v4008_v7 = vadd.f32 %v9275_v21, %v3964_v59  ;;  %4254 = vmatmul.mubr.bf16.gmra.mrb[124].mxu0 %v4064_v49  ;;  %v4038_v13 = vmax.f32 %v4006_v41, 0.0 }
 0x3ec   :  { %v4009_v58 = vadd.f32 %v9277_v24, %v3965_v60  ;;  %v4039_v6 = vmax.f32 %v4007_v62, 0.0 }
 0x3ed   :  { %v4040_v31 = vmax.f32 %v4008_v7, 0.0 }
 0x3ee   :  { %v4041_v39 = vmax.f32 %v4009_v58, 0.0  ;;  %v3608_v26 = vpop.f32.mrb[116].mxu0  ;;  %v3681_v51 = vpop.f32.mrb[116].mxu1 }
 0x3ef   :  { %v4066_v23 = vpack.c.bf16 %v4040_v31, %v4038_v13  ;;  %v9366_v61 = vmax.f32 %v10102_v12, %v3608_v26  ;;  %v3966_v0 = vmax.f32 %v9243_v34, %v3681_v51  ;;  %v3610_v28 = vpop.f32.mrb[117].mxu0  ;;  %v3683_v53 = vpop.f32.mrb[117].mxu1 }
 0x3f0   :  { %v9372_v38 = vmax.f32 %v10103_v27, %v3610_v28  ;;  %v3967_v32 = vmax.f32 %v9252_v47, %v3683_v53  ;;  %v3612_v9 = vpop.f32.mrb[118].mxu0  ;;  %v3685_v57 = vpop.f32.mrb[118].mxu1  ;;  %v4067_v55 = vpack.c.bf16 %v4041_v39, %v4039_v6 }
 0x3f1   :  { %v4010_v49 = vadd.f32 %v9275_v21, %v3966_v0  ;;  %v9379_v25 = vmax.f32 %v10104_v30, %v3612_v9  ;;  %v3968_v34 = vmax.f32 %v9261_v45, %v3685_v57  ;;  %v3614_v33 = vpop.f32.mrb[119].mxu0  ;;  %v3687_v36 = vpop.f32.mrb[119].mxu1 }
 0x3f2   :  { %v4011_v10 = vadd.f32 %v9277_v24, %v3967_v32  ;;  %v9386_v47 = vmax.f32 %v10105_v14, %v3614_v33  ;;  %v3969_v29 = vmax.f32 %v9270_v2, %v3687_v36  ;;  %4261 = vmatprep.mubr.bf16.mxu0 %v4067_v55 }
 0x3f3   :  { %v4012_v63 = vadd.f32 %v9275_v21, %v3968_v34  ;;  %4262 = vmatmul.mubr.bf16.gmra.mrb[128].mxu0 %v4066_v23  ;;  %v4042_v43 = vmax.f32 %v4010_v49, 0.0 }
 0x3f4   :  { %v4013_v42 = vadd.f32 %v9277_v24, %v3969_v29  ;;  %v4043_v45 = vmax.f32 %v4011_v10, 0.0 }
 0x3f5   :  { %v4044_v3 = vmax.f32 %v4012_v63, 0.0 }
 0x3f6   :  { %v4045_v16 = vmax.f32 %v4013_v42, 0.0  ;;  %v3691_v56 = vpop.f32.mrb[120].mxu1 }
 0x3f7   :  { %v4068_v4 = vpack.c.bf16 %v4044_v3, %v4042_v43  ;;  %v3970_v50 = vmax.f32 %v9282_v8, %v3691_v56  ;;  %v3693_v41 = vpop.f32.mrb[121].mxu1 }
 0x3f8   :  { %v3971_v48 = vmax.f32 %v9288_v44, %v3693_v41  ;;  %v3695_v20 = vpop.f32.mrb[122].mxu1  ;;  %v4069_v15 = vpack.c.bf16 %v4045_v16, %v4043_v45 }
 0x3f9   :  { %v4014_v2 = vadd.f32 %v9275_v21, %v3970_v50  ;;  %v3972_v59 = vmax.f32 %v9295_v35, %v3695_v20  ;;  %v3697_v1 = vpop.f32.mrb[123].mxu1 }
 0x3fa   :  { %v4015_v5 = vadd.f32 %v9277_v24, %v3971_v48  ;;  %v3973_v62 = vmax.f32 %v9302_v37, %v3697_v1  ;;  %4269 = vmatprep.mubr.bf16.mxu0 %v4069_v15 }
 0x3fb   :  { %v4016_v22 = vadd.f32 %v9275_v21, %v3972_v59  ;;  %4270 = vmatmul.mubr.bf16.gmra.mrb[132].mxu0 %v4068_v4  ;;  %v4046_v60 = vmax.f32 %v4014_v2, 0.0 }
 0x3fc   :  { %v4017_v8 = vadd.f32 %v9277_v24, %v3973_v62  ;;  %v4047_v44 = vmax.f32 %v4015_v5, 0.0 }
 0x3fd   :  { %v4048_v7 = vmax.f32 %v4016_v22, 0.0 }
 0x3fe   :  { %v4049_v58 = vmax.f32 %v4017_v8, 0.0  ;;  %v3701_v13 = vpop.f32.mrb[124].mxu1 }
 0x3ff   :  { %v4070_v31 = vpack.c.bf16 %v4048_v7, %v4046_v60  ;;  %v3974_v6 = vmax.f32 %v9310_v18, %v3701_v13  ;;  %v3703_v35 = vpop.f32.mrb[125].mxu1  ;;  %v5020_v60 = vld [vmem:[#allocation5 + $0x20] sm:$0xff]  }
 0x400   :  { %v3975_v39 = vmax.f32 %v9316_v11, %v3703_v35  ;;  %v3705_v26 = vpop.f32.mrb[126].mxu1  ;;  %v4071_v51 = vpack.c.bf16 %v4049_v58, %v4047_v44  ;;  %v9426_v44 = vld [vmem:[%s9465_s4] ss:$0 sm:$0xff] }
 0x401   :  { %v4018_v37 = vadd.f32 %v9275_v21, %v3974_v6  ;;  %v3976_v23 = vmax.f32 %v9323_v46, %v3705_v26  ;;  %v3707_v12 = vpop.f32.mrb[127].mxu1 }
 0x402   :  { %v4019_v0 = vadd.f32 %v9277_v24, %v3975_v39  ;;  %v3977_v28 = vmax.f32 %v9330_v40, %v3707_v12  ;;  %4277 = vmatprep.mubr.bf16.mxu0 %v4071_v51 }
 0x403   :  { %v4020_v53 = vadd.f32 %v9275_v21, %v3976_v23  ;;  %4278 = vmatmul.mubr.bf16.gmra.mrb[136].mxu0 %v4070_v31  ;;  %v4050_v27 = vmax.f32 %v4018_v37, 0.0 }
 0x404   :  { %v4021_v18 = vadd.f32 %v9277_v24, %v3977_v28  ;;  %v4051_v11 = vmax.f32 %v4019_v0, 0.0 }
 0x405   :  { %v4052_v32 = vmax.f32 %v4020_v53, 0.0 }
 0x406   :  { %v4053_v9 = vmax.f32 %v4021_v18, 0.0  ;;  %v3711_v57 = vpop.f32.mrb[128].mxu1 }
 0x407   :  { %v4072_v55 = vpack.c.bf16 %v4052_v32, %v4050_v27  ;;  %v3978_v49 = vmax.f32 %v9338_v52, %v3711_v57  ;;  %v3713_v46 = vpop.f32.mrb[129].mxu1 }
 0x408   :  { %v3979_v30 = vmax.f32 %v9344_v54, %v3713_v46  ;;  %v3715_v34 = vpop.f32.mrb[130].mxu1  ;;  %v4073_v33 = vpack.c.bf16 %v4053_v9, %v4051_v11 }
 0x409   :  { %v4022_v40 = vadd.f32 %v9275_v21, %v3978_v49  ;;  %v3980_v36 = vmax.f32 %v9351_v19, %v3715_v34  ;;  %v3717_v10 = vpop.f32.mrb[131].mxu1 }
 0x40a   :  { %v4023_v14 = vadd.f32 %v9277_v24, %v3979_v30  ;;  %v3981_v29 = vmax.f32 %v9358_v17, %v3717_v10  ;;  %4285 = vmatprep.mubr.bf16.mxu0 %v4073_v33 }
 0x40b   :  { %v4024_v63 = vadd.f32 %v9275_v21, %v3980_v36  ;;  %4286 = vmatmul.mubr.bf16.gmra.mrb[140].mxu0 %v4072_v55  ;;  %v4054_v42 = vmax.f32 %v4022_v40, 0.0 }
 0x40c   :  { %v4025_v52 = vadd.f32 %v9277_v24, %v3981_v29  ;;  %v4055_v54 = vmax.f32 %v4023_v14, 0.0 }
 0x40d   :  { %v4056_v43 = vmax.f32 %v4024_v63, 0.0 }
 0x40e   :  { %v4057_v3 = vmax.f32 %v4025_v52, 0.0  ;;  %v3721_v45 = vpop.f32.mrb[132].mxu1 }
 0x40f   :  { %v4074_v16 = vpack.c.bf16 %v4056_v43, %v4054_v42  ;;  %v3982_v56 = vmax.f32 %v9366_v61, %v3721_v45  ;;  %v3723_v19 = vpop.f32.mrb[133].mxu1 }
 0x410   :  { %v3983_v4 = vmax.f32 %v9372_v38, %v3723_v19  ;;  %v3725_v50 = vpop.f32.mrb[134].mxu1  ;;  %v4075_v41 = vpack.c.bf16 %v4057_v3, %v4055_v54 }
 0x411   :  { %v4026_v17 = vadd.f32 %v9275_v21, %v3982_v56  ;;  %v3984_v48 = vmax.f32 %v9379_v25, %v3725_v50  ;;  %v3727_v20 = vpop.f32.mrb[135].mxu1  ;;  %v5019_v25 = vld [vmem:[#allocation5 + $0x18] sm:$0xff]  }
 0x412   :  { %v4027_v15 = vadd.f32 %v9277_v24, %v3983_v4  ;;  %v3985_v2 = vmax.f32 %v9386_v47, %v3727_v20  ;;  %4293 = vmatprep.mubr.bf16.mxu0 %v4075_v41  ;;  %4928 = vmatprep.subr.bf16.mxu1 %v5019_v25  ;;  %v5021_v47 = vld [vmem:[#allocation5 + $0x28] sm:$0xff]  }
 0x413   :  { %v4028_v59 = vadd.f32 %v9275_v21, %v3984_v48  ;;  %4294 = vmatmul.mubr.bf16.gmra.mrb[144].mxu0 %v4074_v16  ;;  %v4058_v1 = vmax.f32 %v4026_v17, 0.0  ;;  %4929 = vmatpush3.bf16.msra.mxu1 %v5019_v25  ;;  %v5022_v21 = vld [vmem:[#allocation5 + $0x30] sm:$0xff]  }
 0x414   :  { %v4029_v61 = vadd.f32 %v9277_v24, %v3985_v2  ;;  %v4059_v38 = vmax.f32 %v4027_v15, 0.0  ;;  %4930 = vmatprep.subr.bf16.mxu1 %v5020_v60  ;;  %v5023_v24 = vld [vmem:[#allocation5 + $0x38] sm:$0xff]  }
 0x415   :  { %v4060_v5 = vmax.f32 %v4028_v59, 0.0 }
 0x416   :  { %v4061_v62 = vmax.f32 %v4029_v61, 0.0 }
 0x417   :  { %v4076_v22 = vpack.c.bf16 %v4060_v5, %v4058_v1  ;;  %4931 = vmatpush3.bf16.msra.mxu1 %v5020_v60 }
 0x418   :  { %v4077_v8 = vpack.c.bf16 %v4061_v62, %v4059_v38  ;;  %4932 = vmatprep.subr.bf16.mxu1 %v5021_v47 }
 0x41a   :  { %4301 = vmatprep.mubr.bf16.mxu0 %v4077_v8 }
 0x41b   :  { %4302 = vmatmul.mubr.bf16.gmra.mrb[148].mxu0 %v4076_v22  ;;  %4933 = vmatpush3.bf16.msra.mxu1 %v5021_v47 }
 0x41c   :  { %4934 = vmatprep.subr.bf16.mxu1 %v5022_v21 }
 0x41f   :  { %4935 = vmatpush3.bf16.msra.mxu1 %v5022_v21 }
 0x420   :  { %4936 = vmatprep.subr.bf16.mxu1 %v5023_v24 }
 0x423   :  { %4937 = vmatpush3.bf16.msra.mxu1 %v5023_v24 }
 0x4b6   :  { %v4858_v7 = vpop.f32.mrb[120].mxu0 }
 0x4b7   :  { %v4859_v58 = vpop.f32.mrb[121].mxu0 }
 0x4b8   :  { %v4860_v13 = vadd.f32 %v4859_v58, %v4858_v7  ;;  %v4861_v31 = vpop.f32.mrb[122].mxu0 }
 0x4b9   :  { %v4862_v6 = vpop.f32.mrb[123].mxu0 }
 0x4ba   :  { %v4248_v35 = vadd.f32 %v4860_v13, %v9426_v44  ;;  %v4863_v39 = vadd.f32 %v4862_v6, %v4861_v31 }
 0x4bc   :  { %v4251_v26 = vadd.f32 %v4863_v39, %v9426_v44  ;;  %v4310_v51 = vmax.f32 %v4248_v35, 0.0 }
 0x4be   :  { %v4311_v37 = vmax.f32 %v4251_v26, 0.0  ;;  %v4864_v23 = vpop.f32.mrb[124].mxu0 }
 0x4bf   :  { %v4865_v12 = vpop.f32.mrb[125].mxu0 }
 0x4c0   :  { %v4866_v0 = vadd.f32 %v4865_v12, %v4864_v23  ;;  %v4867_v28 = vpop.f32.mrb[126].mxu0  ;;  %v4326_v53 = vpack.c.bf16 %v4311_v37, %v4310_v51 }
 0x4c1   :  { %v4868_v18 = vpop.f32.mrb[127].mxu0 }
 0x4c2   :  { %v4256_v27 = vadd.f32 %v4866_v0, %v9426_v44  ;;  %v4869_v32 = vadd.f32 %v4868_v18, %v4867_v28  ;;  %4938 = vmatprep.mubr.bf16.mxu1 %v4326_v53 }
 0x4c4   :  { %v4259_v11 = vadd.f32 %v4869_v32, %v9426_v44  ;;  %v4312_v9 = vmax.f32 %v4256_v27, 0.0 }
 0x4c6   :  { %v4313_v57 = vmax.f32 %v4259_v11, 0.0  ;;  %v4870_v55 = vpop.f32.mrb[128].mxu0 }
 0x4c7   :  { %v4871_v49 = vpop.f32.mrb[129].mxu0 }
 0x4c8   :  { %v4327_v46 = vpack.c.bf16 %v4313_v57, %v4312_v9  ;;  %v4872_v30 = vadd.f32 %v4871_v49, %v4870_v55  ;;  %v4873_v34 = vpop.f32.mrb[130].mxu0 }
 0x4c9   :  { %v4874_v33 = vpop.f32.mrb[131].mxu0 }
 0x4ca   :  { %v4264_v40 = vadd.f32 %v4872_v30, %v9426_v44  ;;  %v4875_v36 = vadd.f32 %v4874_v33, %v4873_v34  ;;  %4939 = vmatmul.mubr.bf16.vlgmr.msra.gmra.mrb[136].mxu1 %v4327_v46  ;;  %v4833_v34 = vld [vmem:[%s9467_s6] ss:$0 sm:$0xff]  ;;  %s5104_s6 = smov [#allocation7]  }
 0x4cb   :  { %s4523_s23 = sshll.u32 %s5104_s6, 4  ;;  %s4524_s23 = int_to_ptr.vmem [resolvable:$true] %s4523_s23 }
 0x4cc   :  { %v4267_v10 = vadd.f32 %v4875_v36, %v9426_v44  ;;  %v4314_v14 = vmax.f32 %v4264_v40, 0.0  ;;  %s5068_s24 = scalar_lea.vmem %s4524_s23, 2048  ;;  %p5073_p3 = scmp.lt.s32.totalorder %s4524_s23, %s4524_s23 }
 0x4cd   :  { %p5069_p2 = scmp.ne.s32.totalorder %s4524_s23, %s5068_s24  ;;  %p5074_p4 = scmp.lt.s32.totalorder %s5068_s24, %s5068_s24 }
 0x4ce   :  { %v4315_v29 = vmax.f32 %v4267_v10, 0.0  ;;  %v4876_v63 = vpop.f32.mrb[132].mxu0 }
 0x4cf   :  { %v4877_v52 = vpop.f32.mrb[133].mxu0  ;;  %p5075_p5 = por %p5074_p4, %p5073_p3 }
 0x4d0   :  { %v4878_v42 = vadd.f32 %v4877_v52, %v4876_v63  ;;  %v4879_v43 = vpop.f32.mrb[134].mxu0  ;;  %v4328_v54 = vpack.c.bf16 %v4315_v29, %v4314_v14 }
 0x4d1   :  { %v4880_v3 = vpop.f32.mrb[135].mxu0  ;;  %p5076_p6 = pnand %p5075_p5, %p5069_p2 }
 0x4d2   :  { %v4272_v45 = vadd.f32 %v4878_v42, %v9426_v44  ;;  %v4881_v16 = vadd.f32 %v4880_v3, %v4879_v43  ;;  %4942 = vmatprep.mubr.bf16.mxu1 %v4328_v54 }
 0x4d4   :  { %v4275_v56 = vadd.f32 %v4881_v16, %v9426_v44  ;;  %v4316_v19 = vmax.f32 %v4272_v45, 0.0 }
 0x4d6   :  { %v4317_v4 = vmax.f32 %v4275_v56, 0.0  ;;  %v4882_v50 = vpop.f32.mrb[136].mxu0 }
 0x4d7   :  { %v4883_v41 = vpop.f32.mrb[137].mxu0 }
 0x4d8   :  { %v4329_v17 = vpack.c.bf16 %v4317_v4, %v4316_v19  ;;  %v4884_v48 = vadd.f32 %v4883_v41, %v4882_v50  ;;  %v4885_v20 = vpop.f32.mrb[138].mxu0 }
 0x4d9   :  { %v4886_v15 = vpop.f32.mrb[139].mxu0 }
 0x4da   :  { %v4280_v2 = vadd.f32 %v4884_v48, %v9426_v44  ;;  %v4887_v59 = vadd.f32 %v4886_v15, %v4885_v20  ;;  %4943 = vmatmul.mubr.bf16.gmra.mrb[140].mxu1 %v4329_v17 }
 0x4dc   :  { %v4283_v61 = vadd.f32 %v4887_v59, %v9426_v44  ;;  %v4318_v1 = vmax.f32 %v4280_v2, 0.0 }
 0x4de   :  { %v4319_v5 = vmax.f32 %v4283_v61, 0.0  ;;  %v4888_v38 = vpop.f32.mrb[140].mxu0 }
 0x4df   :  { %v4889_v62 = vpop.f32.mrb[141].mxu0 }
 0x4e0   :  { %v4890_v22 = vadd.f32 %v4889_v62, %v4888_v38  ;;  %v4891_v8 = vpop.f32.mrb[142].mxu0  ;;  %v4330_v25 = vpack.c.bf16 %v4319_v5, %v4318_v1 }
 0x4e1   :  { %v4892_v60 = vpop.f32.mrb[143].mxu0 }
 0x4e2   :  { %v4288_v47 = vadd.f32 %v4890_v22, %v9426_v44  ;;  %v4893_v21 = vadd.f32 %v4892_v60, %v4891_v8  ;;  %4946 = vmatprep.mubr.bf16.mxu1 %v4330_v25 }
 0x4e4   :  { %v4291_v24 = vadd.f32 %v4893_v21, %v9426_v44  ;;  %v4320_v7 = vmax.f32 %v4288_v47, 0.0 }
 0x4e6   :  { %v4321_v58 = vmax.f32 %v4291_v24, 0.0  ;;  %v4894_v13 = vpop.f32.mrb[144].mxu0 }
 0x4e7   :  { %v4895_v31 = vpop.f32.mrb[145].mxu0 }
 0x4e8   :  { %v4331_v6 = vpack.c.bf16 %v4321_v58, %v4320_v7  ;;  %v4896_v35 = vadd.f32 %v4895_v31, %v4894_v13  ;;  %v4897_v39 = vpop.f32.mrb[146].mxu0 }
 0x4e9   :  { %v4898_v26 = vpop.f32.mrb[147].mxu0 }
 0x4ea   :  { %v4296_v51 = vadd.f32 %v4896_v35, %v9426_v44  ;;  %v4899_v37 = vadd.f32 %v4898_v26, %v4897_v39  ;;  %4947 = vmatmul.mubr.bf16.gmra.mrb[144].mxu1 %v4331_v6 }
 0x4ec   :  { %v4299_v23 = vadd.f32 %v4899_v37, %v9426_v44  ;;  %v4322_v12 = vmax.f32 %v4296_v51, 0.0 }
 0x4ee   :  { %v4323_v0 = vmax.f32 %v4299_v23, 0.0  ;;  %v4900_v28 = vpop.f32.mrb[148].mxu0 }
 0x4ef   :  { %v4901_v53 = vpop.f32.mrb[149].mxu0 }
 0x4f0   :  { %v4902_v18 = vadd.f32 %v4901_v53, %v4900_v28  ;;  %v4903_v27 = vpop.f32.mrb[150].mxu0  ;;  %v4332_v32 = vpack.c.bf16 %v4323_v0, %v4322_v12 }
 0x4f1   :  { %v4904_v11 = vpop.f32.mrb[151].mxu0 }
 0x4f2   :  { %v4304_v9 = vadd.f32 %v4902_v18, %v9426_v44  ;;  %v4905_v57 = vadd.f32 %v4904_v11, %v4903_v27  ;;  %4950 = vmatprep.mubr.bf16.mxu1 %v4332_v32 }
 0x4f4   :  { %v4307_v55 = vadd.f32 %v4905_v57, %v9426_v44  ;;  %v4324_v49 = vmax.f32 %v4304_v9, 0.0 }
 0x4f6   :  { %v4325_v46 = vmax.f32 %v4307_v55, 0.0 }
 0x4f8   :  { %v4333_v30 = vpack.c.bf16 %v4325_v46, %v4324_v49 }
 0x4fa   :  { %4951 = vmatmul.mubr.bf16.gmra.mrb[148].mxu1 %v4333_v30 }
 0x59d   :  { %v4940_v33 = vpop.f32.mrb[136].mxu1 }
 0x59e   :  { %v4448_v40 = vadd.f32 %v4940_v33, %v4833_v34  ;;  %v4439_v36 = vpop.f32.mrb[137].mxu1 }
 0x59f   :  { %v4440_v10 = vadd.f32 %v4833_v34, %v4439_v36  ;;  %v4941_v14 = vpop.f32.mrb[138].mxu1 }
 0x5a0   :  { %4504 = vst [vmem:[#allocation7 + $0x10] sm:$0xff] %v4448_v40  ;;  %v4451_v29 = vadd.f32 %v4941_v14, %v4833_v34  ;;  %v4442_v63 = vpop.f32.mrb[139].mxu1 }
 0x5a1   :  { %4502 = vst [vmem:[#allocation7] sm:$0xff] %v4440_v10  ;;  %v4443_v52 = vadd.f32 %v4833_v34, %v4442_v63 }
 0x5a2   :  { %4505 = vst [vmem:[#allocation7 + $0x18] sm:$0xff] %v4451_v29 }
 0x5a3   :  { %4503 = vst [vmem:[#allocation7 + $0x8] sm:$0xff] %v4443_v52 }
 0x5ad   :  { %v4944_v44 = vpop.f32.mrb[140].mxu1 }
 0x5ae   :  { %v4464_v42 = vadd.f32 %v4944_v44, %v4833_v34  ;;  %v4455_v43 = vpop.f32.mrb[141].mxu1 }
 0x5af   :  { %v4456_v54 = vadd.f32 %v4833_v34, %v4455_v43  ;;  %v4945_v3 = vpop.f32.mrb[142].mxu1 }
 0x5b0   :  { %4508 = vst [vmem:[#allocation7 + $0x30] sm:$0xff] %v4464_v42  ;;  %v4467_v45 = vadd.f32 %v4945_v3, %v4833_v34  ;;  %v4458_v16 = vpop.f32.mrb[143].mxu1 }
 0x5b1   :  { %4506 = vst [vmem:[#allocation7 + $0x20] sm:$0xff] %v4456_v54  ;;  %v4459_v56 = vadd.f32 %v4833_v34, %v4458_v16 }
 0x5b2   :  { %4509 = vst [vmem:[#allocation7 + $0x38] sm:$0xff] %v4467_v45 }
 0x5b3   :  { %4507 = vst [vmem:[#allocation7 + $0x28] sm:$0xff] %v4459_v56 }
 0x5bd   :  { %v4948_v19 = vpop.f32.mrb[144].mxu1 }
 0x5be   :  { %v4480_v4 = vadd.f32 %v4948_v19, %v4833_v34  ;;  %v4471_v50 = vpop.f32.mrb[145].mxu1 }
 0x5bf   :  { %v4472_v41 = vadd.f32 %v4833_v34, %v4471_v50  ;;  %v4949_v17 = vpop.f32.mrb[146].mxu1 }
 0x5c0   :  { %4512 = vst [vmem:[#allocation7 + $0x50] sm:$0xff] %v4480_v4  ;;  %v4483_v48 = vadd.f32 %v4949_v17, %v4833_v34  ;;  %v4474_v20 = vpop.f32.mrb[147].mxu1 }
 0x5c1   :  { %4510 = vst [vmem:[#allocation7 + $0x40] sm:$0xff] %v4472_v41  ;;  %v4475_v15 = vadd.f32 %v4833_v34, %v4474_v20 }
 0x5c2   :  { %4513 = vst [vmem:[#allocation7 + $0x58] sm:$0xff] %v4483_v48 }
 0x5c3   :  { %4511 = vst [vmem:[#allocation7 + $0x48] sm:$0xff] %v4475_v15 }
 0x5cd   :  { %v4952_v2 = vpop.f32.mrb[148].mxu1 }
 0x5ce   :  { %v4496_v59 = vadd.f32 %v4952_v2, %v4833_v34  ;;  %v4487_v61 = vpop.f32.mrb[149].mxu1 }
 0x5cf   :  { %v4488_v1 = vadd.f32 %v4833_v34, %v4487_v61  ;;  %v4953_v5 = vpop.f32.mrb[150].mxu1 }
 0x5d0   :  { %4516 = vst [vmem:[#allocation7 + $0x70] sm:$0xff] %v4496_v59  ;;  %v4499_v38 = vadd.f32 %v4953_v5, %v4833_v34  ;;  %v4490_v62 = vpop.f32.mrb[151].mxu1 }
 0x5d1   :  { %4514 = vst [vmem:[#allocation7 + $0x60] sm:$0xff] %v4488_v1  ;;  %v4491_v22 = vadd.f32 %v4833_v34, %v4490_v62 }
 0x5d2   :  { %4517 = vst [vmem:[#allocation7 + $0x78] sm:$0xff] %v4499_v38 }
 0x5d3   :  { %4515 = vst [vmem:[#allocation7 + $0x68] sm:$0xff] %v4491_v22 }
 0x5d4   :  { %5079 = shalt.err (!%p5076_p6)
}
 0x5d5   :  { %s5080_s26 = scalar_lea.hbm %s9468_s7, 2048 }
 0x5d6   :  { %p5081_p7 = scmp.ne.s32.totalorder %s9468_s7, %s5080_s26  ;;  %p5084_p8 = scmp.lt.u32.totalorder %s5080_s26, %s9468_s7 }
 0x5d8   :  { %p5086_p9 = pnand %p5084_p8, %p5081_p7 }
 0x5da   :  { %5089 = shalt.err (!%p5086_p9)
}
 0x5db   :  { %s5105_s30 = smov 8  }
 0x5dc   :  { %4529 = dma.vmem_to_hbm [thread:$0]  %s4524_s23, 2048, %s9468_s7, [#allocation4], %s5098_s12, %s5098_s12, %s5105_s30  }
 0x5dd   :  { %5094 = dma.done.wait [#allocation4], 2048  }
 0x5de   :  { %5095 = vsyncadd [#allocation4], 4294965248 }
 0x5df   :  { %4533 = vsyncpa [#allocation3], 1 }
 0x5e0   :  { %4534 = vsyncpa [#allocation6], 1 }
 0x5e1   :  { %4535 = vsyncpa [#allocation4], 1 }

</bundles_post_ra>
